<compile_context>
chip_gen: v7x
topology: tpu7x:2x2x1
jax: 0.10.0
libtpu: 0.0.40
codegen_flags: <defaults>
</compile_context>

<pallas_src>
import functools

import jax
import jax.numpy as jnp
import numpy as np
from jax.experimental import pallas as pl
from jax.experimental.pallas import tpu as pltpu


def decoder_kernel(tok_ref, h_ref, emb_ref, wih_ref, whh_ref,
                   b_gates_ref, b_hn_ref, wfc_ref, bfc_ref,
                   logits_ref, hnew_ref, h_scr):
    """Grid axis 0 = vocab tile of the output projection.

    tok_ref:   [B, 1]  int32      h_ref:   [B, H]  f32
    emb_ref:   [V, E]  bf16       wih_ref: [E, 3H] bf16   whh_ref: [H, 3H] bf16
    b_gates:   [1, 3H] f32 (r,z slots already = b_ih+b_hh; n slot = b_in)
    b_hn:      [1, H]  f32        wfc_ref: [H, TV] bf16   bfc_ref: [1, TV] f32
    outputs:   logits [B, TV] f32 tile,  hnew [B, H] f32 (constant block)
    scratch:   h_scr  [B, H]  f32 (hidden state reused by every vocab tile)
    """
    B, H = h_ref.shape
    V = emb_ref.shape[0]

    # GRU cell (and in-kernel embedding lookup) only on the first vocab tile.
    @pl.when(pl.program_id(0) == 0)
    def _():
        # --- embedding lookup as a one-hot matmul (MXU, no XLA gather) ---
        tok = tok_ref[...]                                           # [B, 1]
        col = jax.lax.broadcasted_iota(jnp.int32, (B, V), 1)
        onehot = jnp.where(col == tok, 1.0, 0.0).astype(emb_ref.dtype)
        emb = jnp.dot(onehot, emb_ref[...],
                      preferred_element_type=jnp.float32)            # [B, E] f32

        h = h_ref[...]                                               # [B, H] f32
        cdt = wih_ref.dtype                                          # bf16 weights

        # --- two fused gate matmuls instead of six (gate order r, z, n) ---
        gi = jnp.dot(emb.astype(cdt), wih_ref[...],
                     preferred_element_type=jnp.float32) + b_gates_ref[...]
        gh = jnp.dot(h.astype(cdt), whh_ref[...],
                     preferred_element_type=jnp.float32)

        rz = jax.nn.sigmoid(gi[:, :2 * H] + gh[:, :2 * H])           # [B, 2H]
        r = rz[:, :H]
        z = rz[:, H:]
        n = jnp.tanh(gi[:, 2 * H:] + r * (gh[:, 2 * H:] + b_hn_ref[...]))
        h_new = (1.0 - z) * n + z * h                                # [B, H] f32

        h_scr[...] = h_new
        hnew_ref[...] = h_new.astype(hnew_ref.dtype)

    # --- output projection for this vocab tile (runs every grid step) ---
    logits_ref[...] = (
        jnp.dot(h_scr[...].astype(wfc_ref.dtype), wfc_ref[...],
                preferred_element_type=jnp.float32) + bfc_ref[...]
    ).astype(logits_ref.dtype)


def decoder_forward(x_tokens, hidden, params, *, v_tile=256):
    """x_tokens: int32 [B]; hidden: f32 [1, B, H] (PyTorch GRU hidden layout)."""
    emb_table = params["embedding"]          # [V, E]
    V, E = emb_table.shape
    B = x_tokens.shape[0]
    H = hidden.shape[-1]
    H3 = 3 * H

    v_tile = min(v_tile, V)
    assert V % v_tile == 0, "vocab_size must be a multiple of v_tile"
    n_vt = V // v_tile

    tok = x_tokens.reshape(B, 1).astype(jnp.int32)
    h0 = hidden[0].astype(jnp.float32)       # [B, H]

    logits, h_new = pl.pallas_call(
        decoder_kernel,
        out_shape=(jax.ShapeDtypeStruct((B, V), jnp.float32),
                   jax.ShapeDtypeStruct((B, H), jnp.float32)),
        grid_spec=pltpu.PrefetchScalarGridSpec(
            num_scalar_prefetch=0,
            grid=(n_vt,),
            in_specs=[
                pl.BlockSpec((B, 1), lambda v: (0, 0)),        # tokens
                pl.BlockSpec((B, H), lambda v: (0, 0)),        # h0
                pl.BlockSpec((V, E), lambda v: (0, 0)),        # embedding table
                pl.BlockSpec((E, H3), lambda v: (0, 0)),       # W_ih stacked (r,z,n)
                pl.BlockSpec((H, H3), lambda v: (0, 0)),       # W_hh stacked (r,z,n)
                pl.BlockSpec((1, H3), lambda v: (0, 0)),       # folded gate biases
                pl.BlockSpec((1, H), lambda v: (0, 0)),        # b_hn
                pl.BlockSpec((H, v_tile), lambda v: (0, v)),   # W_fc vocab tile
                pl.BlockSpec((1, v_tile), lambda v: (0, v)),   # b_fc vocab tile
            ],
            out_specs=(
                pl.BlockSpec((B, v_tile), lambda v: (0, v)),   # logits tile
                pl.BlockSpec((B, H), lambda v: (0, 0)),        # new hidden (resident)
            ),
            scratch_shapes=[pltpu.VMEM((B, H), jnp.float32)],
        ),
        compiler_params=pltpu.CompilerParams(
            dimension_semantics=("arbitrary",)),
        # h0 (input idx 1) aliases h_new (output idx 1): no extra output buffer.
        input_output_aliases={1: 1},
    )(tok, h0, emb_table, params["w_ih"], params["w_hh"],
      params["b_gates"], params["b_hn"], params["w_fc"], params["b_fc"])

    # Match PyTorch: (logits [B, V], hidden [1, B, H])
    return logits, h_new[None, :, :]


def init_params(key, vocab_size, embed_size, hidden_size,
                weight_dtype=jnp.bfloat16):
    """Creates params in the kernel's packed layout.

    Weights stored [in, out] (transposed vs torch), GRU gates stacked on the
    output axis in PyTorch order (r, z, n); r/z biases pre-folded.
    """
    ks = jax.random.split(key, 7)
    s = 1.0 / np.sqrt(hidden_size)
    emb = jax.random.normal(ks[0], (vocab_size, embed_size), jnp.float32)
    w_ih = jax.random.uniform(ks[1], (3, embed_size, hidden_size), jnp.float32, -s, s)
    w_hh = jax.random.uniform(ks[2], (3, hidden_size, hidden_size), jnp.float32, -s, s)
    b_ih = jax.random.uniform(ks[3], (3, hidden_size), jnp.float32, -s, s)
    b_hh = jax.random.uniform(ks[4], (3, hidden_size), jnp.float32, -s, s)
    w_fc = jax.random.uniform(ks[5], (hidden_size, vocab_size), jnp.float32, -s, s)
    b_fc = jax.random.uniform(ks[6], (1, vocab_size), jnp.float32, -s, s)

    w_ih_s = jnp.concatenate([w_ih[0], w_ih[1], w_ih[2]], axis=1)   # [E, 3H]
    w_hh_s = jnp.concatenate([w_hh[0], w_hh[1], w_hh[2]], axis=1)   # [H, 3H]
    b_gates = jnp.concatenate(
        [b_ih[0] + b_hh[0], b_ih[1] + b_hh[1], b_ih[2]])[None, :]   # [1, 3H]
    b_hn = b_hh[2][None, :]                                         # [1, H]

    return {
        "embedding": emb.astype(weight_dtype),
        "w_ih": w_ih_s.astype(weight_dtype),
        "w_hh": w_hh_s.astype(weight_dtype),
        "b_gates": b_gates.astype(jnp.float32),
        "b_hn": b_hn.astype(jnp.float32),
        "w_fc": w_fc.astype(weight_dtype),
        "b_fc": b_fc.astype(jnp.float32),
    }


def decoder_reference(x_tokens, hidden, p):
    """Pure-JAX reference of torch Embedding -> GRU(step) -> Linear using the same
    stored (bf16) parameters and the same bf16-operand / f32-accumulate matmul
    numerics as the kernel's MXU path."""
    f32 = jnp.float32
    H = hidden.shape[-1]

    def mxu_dot(a, b):
        a = a.astype(jnp.bfloat16).astype(f32)
        b = b.astype(f32)
        return jnp.dot(a, b, precision=jax.lax.Precision.HIGHEST)

    emb = jnp.take(p["embedding"], x_tokens, axis=0)        # bf16 rows
    h = hidden[0].astype(f32)
    gi = mxu_dot(emb, p["w_ih"]) + p["b_gates"]
    gh = mxu_dot(h, p["w_hh"])
    r = jax.nn.sigmoid(gi[:, :H] + gh[:, :H])
    z = jax.nn.sigmoid(gi[:, H:2 * H] + gh[:, H:2 * H])
    n = jnp.tanh(gi[:, 2 * H:] + r * (gh[:, 2 * H:] + p["b_hn"]))
    h_new = (1.0 - z) * n + z * h
    logits = mxu_dot(h_new, p["w_fc"]) + p["b_fc"]
    return logits, h_new[None]


if __name__ == "__main__":
    # Module globals: embed_size=256, hidden_size=512; small vocab/batch for test.
    VOCAB, EMBED, HIDDEN, BATCH = 512, 256, 512, 16

    key = jax.random.PRNGKey(0)
    kp, kx, kh = jax.random.split(key, 3)
    params = init_params(kp, VOCAB, EMBED, HIDDEN)

    x = jax.random.randint(kx, (BATCH,), 0, VOCAB, dtype=jnp.int32)
    hidden = jax.random.normal(kh, (1, BATCH, HIDDEN), jnp.float32)

    fwd = jax.jit(functools.partial(decoder_forward, v_tile=256))
    logits, h_new = fwd(x, hidden, params)
    jax.block_until_ready((logits, h_new))

    ref_logits, ref_h = decoder_reference(x, hidden, params)
    np.testing.assert_allclose(np.asarray(logits), np.asarray(ref_logits),
                               rtol=2e-3, atol=2e-3)
    np.testing.assert_allclose(np.asarray(h_new), np.asarray(ref_h),
                               rtol=2e-3, atol=2e-3)

    print("KERNEL_OK")
</pallas_src>

<mosaic_0001>
module attributes {stable_mosaic.version = 11 : i64} {
  func.func @decoder_kernel(%arg0: i32, %arg1: memref<16x1xi32, #tpu.memory_space<vmem>>, %arg2: memref<16x512xf32, #tpu.memory_space<vmem>>, %arg3: memref<512x256xbf16, #tpu.memory_space<vmem>>, %arg4: memref<256x1536xbf16, #tpu.memory_space<vmem>>, %arg5: memref<512x1536xbf16, #tpu.memory_space<vmem>>, %arg6: memref<1x1536xf32, #tpu.memory_space<vmem>>, %arg7: memref<1x512xf32, #tpu.memory_space<vmem>>, %arg8: memref<512x256xbf16, #tpu.memory_space<vmem>>, %arg9: memref<1x256xf32, #tpu.memory_space<vmem>>, %arg10: memref<16x256xf32, #tpu.memory_space<vmem>>, %arg11: memref<16x512xf32, #tpu.memory_space<vmem>>, %arg12: memref<16x512xf32, #tpu.memory_space<vmem>>) attributes {dimension_semantics = [#tpu.dimension_semantics<arbitrary>], iteration_bounds = array<i64: 2>, scalar_prefetch = 0 : i64, scratch_operands = 1 : i64, tpu.core_type = #tpu.core_type<tc>, window_params = [{pipeline_mode = #tpu.pipeline_mode<synchronous>, transform_indices = @transform_0, window_bounds = array<i64: 16, 1>}, {pipeline_mode = #tpu.pipeline_mode<synchronous>, transform_indices = @transform_1, window_bounds = array<i64: 16, 512>}, {pipeline_mode = #tpu.pipeline_mode<synchronous>, transform_indices = @transform_2, window_bounds = array<i64: 512, 256>}, {pipeline_mode = #tpu.pipeline_mode<synchronous>, transform_indices = @transform_3, window_bounds = array<i64: 256, 1536>}, {pipeline_mode = #tpu.pipeline_mode<synchronous>, transform_indices = @transform_4, window_bounds = array<i64: 512, 1536>}, {pipeline_mode = #tpu.pipeline_mode<synchronous>, transform_indices = @transform_5, window_bounds = array<i64: 1, 1536>}, {pipeline_mode = #tpu.pipeline_mode<synchronous>, transform_indices = @transform_6, window_bounds = array<i64: 1, 512>}, {transform_indices = @transform_7, window_bounds = array<i64: 512, 256>}, {transform_indices = @transform_8, window_bounds = array<i64: 1, 256>}, {transform_indices = @transform_9, window_bounds = array<i64: 16, 256>}, {pipeline_mode = #tpu.pipeline_mode<synchronous>, transform_indices = @transform_10, window_bounds = array<i64: 16, 512>}]} {
    %c0_i32 = arith.constant 0 : i32
    %0 = arith.cmpi eq, %arg0, %c0_i32 : i32
    %1 = arith.extui %0 : i1 to i32
    %c0_i32_0 = arith.constant 0 : i32
    %2 = arith.cmpi ne, %1, %c0_i32_0 : i32
    scf.if %2 {
      %c0_8 = arith.constant 0 : index
      %c0_9 = arith.constant 0 : index
      %11 = vector.load %arg1[%c0_8, %c0_9] : memref<16x1xi32, #tpu.memory_space<vmem>>, vector<16x1xi32>
      %12 = tpu.iota {dimensions = array<i32: 1>} : vector<16x512xi32>
      %13 = vector.broadcast %11 : vector<16x1xi32> to vector<16x512xi32>
      %14 = arith.cmpi eq, %12, %13 : vector<16x512xi32>
      %cst_10 = arith.constant 1.000000e+00 : f32
      %cst_11 = arith.constant 0.000000e+00 : f32
      %15 = vector.broadcast %cst_10 : f32 to vector<16x512xf32>
      %16 = vector.broadcast %cst_11 : f32 to vector<16x512xf32>
      %17 = arith.select %14, %15, %16 : vector<16x512xi1>, vector<16x512xf32>
      %18 = arith.truncf %17 : vector<16x512xf32> to vector<16x512xbf16>
      %c0_12 = arith.constant 0 : index
      %c0_13 = arith.constant 0 : index
      %19 = vector.load %arg3[%c0_12, %c0_13] : memref<512x256xbf16, #tpu.memory_space<vmem>>, vector<512x256xbf16>
      %cst_14 = arith.constant dense<0.000000e+00> : vector<16x256xf32>
      %20 = tpu.matmul %18, %19, %cst_14 {dimension_numbers = #tpu.dot_dimension_numbers<[1], [0], [0], [1], [0, 0, 1, 1], [], []>} : vector<16x512xbf16>, vector<512x256xbf16>, vector<16x256xf32> -> vector<16x256xf32>
      %c0_15 = arith.constant 0 : index
      %c0_16 = arith.constant 0 : index
      %21 = vector.load %arg2[%c0_15, %c0_16] : memref<16x512xf32, #tpu.memory_space<vmem>>, vector<16x512xf32>
      %22 = arith.truncf %20 : vector<16x256xf32> to vector<16x256xbf16>
      %c0_17 = arith.constant 0 : index
      %c0_18 = arith.constant 0 : index
      %23 = vector.load %arg4[%c0_17, %c0_18] : memref<256x1536xbf16, #tpu.memory_space<vmem>>, vector<256x1536xbf16>
      %cst_19 = arith.constant dense<0.000000e+00> : vector<16x1536xf32>
      %24 = tpu.matmul %22, %23, %cst_19 {dimension_numbers = #tpu.dot_dimension_numbers<[1], [0], [0], [1], [0, 0, 1, 1], [], []>} : vector<16x256xbf16>, vector<256x1536xbf16>, vector<16x1536xf32> -> vector<16x1536xf32>
      %c0_20 = arith.constant 0 : index
      %c0_21 = arith.constant 0 : index
      %25 = vector.load %arg6[%c0_20, %c0_21] : memref<1x1536xf32, #tpu.memory_space<vmem>>, vector<1x1536xf32>
      %26 = vector.broadcast %25 : vector<1x1536xf32> to vector<16x1536xf32>
      %27 = arith.addf %24, %26 : vector<16x1536xf32>
      %28 = arith.truncf %21 : vector<16x512xf32> to vector<16x512xbf16>
      %c0_22 = arith.constant 0 : index
      %c0_23 = arith.constant 0 : index
      %29 = vector.load %arg5[%c0_22, %c0_23] : memref<512x1536xbf16, #tpu.memory_space<vmem>>, vector<512x1536xbf16>
      %cst_24 = arith.constant dense<0.000000e+00> : vector<16x1536xf32>
      %30 = tpu.matmul %28, %29, %cst_24 {dimension_numbers = #tpu.dot_dimension_numbers<[1], [0], [0], [1], [0, 0, 1, 1], [], []>} : vector<16x512xbf16>, vector<512x1536xbf16>, vector<16x1536xf32> -> vector<16x1536xf32>
      %31 = vector.extract_strided_slice %27 {offsets = [0, 0], sizes = [16, 1024], strides = [1, 1]} : vector<16x1536xf32> to vector<16x1024xf32>
      %32 = vector.extract_strided_slice %30 {offsets = [0, 0], sizes = [16, 1024], strides = [1, 1]} : vector<16x1536xf32> to vector<16x1024xf32>
      %33 = arith.addf %31, %32 : vector<16x1024xf32>
      %34 = arith.negf %33 : vector<16x1024xf32>
      %35 = math.exp %34 : vector<16x1024xf32>
      %cst_25 = arith.constant 1.000000e+00 : f32
      %36 = vector.broadcast %cst_25 : f32 to vector<16x1024xf32>
      %37 = arith.addf %36, %35 : vector<16x1024xf32>
      %38 = arith.divf %36, %37 : vector<16x1024xf32>
      %39 = vector.extract_strided_slice %38 {offsets = [0, 0], sizes = [16, 512], strides = [1, 1]} : vector<16x1024xf32> to vector<16x512xf32>
      %40 = vector.extract_strided_slice %38 {offsets = [0, 512], sizes = [16, 512], strides = [1, 1]} : vector<16x1024xf32> to vector<16x512xf32>
      %41 = vector.extract_strided_slice %27 {offsets = [0, 1024], sizes = [16, 512], strides = [1, 1]} : vector<16x1536xf32> to vector<16x512xf32>
      %42 = vector.extract_strided_slice %30 {offsets = [0, 1024], sizes = [16, 512], strides = [1, 1]} : vector<16x1536xf32> to vector<16x512xf32>
      %c0_26 = arith.constant 0 : index
      %c0_27 = arith.constant 0 : index
      %43 = vector.load %arg7[%c0_26, %c0_27] : memref<1x512xf32, #tpu.memory_space<vmem>>, vector<1x512xf32>
      %44 = vector.broadcast %43 : vector<1x512xf32> to vector<16x512xf32>
      %45 = arith.addf %42, %44 : vector<16x512xf32>
      %46 = arith.mulf %39, %45 : vector<16x512xf32>
      %47 = arith.addf %41, %46 : vector<16x512xf32>
      %48 = math.tanh %47 : vector<16x512xf32>
      %cst_28 = arith.constant 1.000000e+00 : f32
      %49 = vector.broadcast %cst_28 : f32 to vector<16x512xf32>
      %50 = arith.subf %49, %40 : vector<16x512xf32>
      %51 = arith.mulf %50, %48 : vector<16x512xf32>
      %52 = arith.mulf %40, %21 : vector<16x512xf32>
      %53 = arith.addf %51, %52 : vector<16x512xf32>
      %c0_29 = arith.constant 0 : index
      %c0_30 = arith.constant 0 : index
      %54 = vector.load %arg12[%c0_29, %c0_30] : memref<16x512xf32, #tpu.memory_space<vmem>>, vector<16x512xf32>
      tpu.vector_store %arg12[%c0_29, %c0_30], %53 {strides = array<i32>} : memref<16x512xf32, #tpu.memory_space<vmem>>, vector<16x512xf32>,
      %c0_31 = arith.constant 0 : index
      %c0_32 = arith.constant 0 : index
      %55 = vector.load %arg11[%c0_31, %c0_32] : memref<16x512xf32, #tpu.memory_space<vmem>>, vector<16x512xf32>
      tpu.vector_store %arg11[%c0_31, %c0_32], %53 {strides = array<i32>} : memref<16x512xf32, #tpu.memory_space<vmem>>, vector<16x512xf32>,
    } else {
    }
    %c0 = arith.constant 0 : index
    %c0_1 = arith.constant 0 : index
    %3 = vector.load %arg12[%c0, %c0_1] : memref<16x512xf32, #tpu.memory_space<vmem>>, vector<16x512xf32>
    %4 = arith.truncf %3 : vector<16x512xf32> to vector<16x512xbf16>
    %c0_2 = arith.constant 0 : index
    %c0_3 = arith.constant 0 : index
    %5 = vector.load %arg8[%c0_2, %c0_3] : memref<512x256xbf16, #tpu.memory_space<vmem>>, vector<512x256xbf16>
    %cst = arith.constant dense<0.000000e+00> : vector<16x256xf32>
    %6 = tpu.matmul %4, %5, %cst {dimension_numbers = #tpu.dot_dimension_numbers<[1], [0], [0], [1], [0, 0, 1, 1], [], []>} : vector<16x512xbf16>, vector<512x256xbf16>, vector<16x256xf32> -> vector<16x256xf32>
    %c0_4 = arith.constant 0 : index
    %c0_5 = arith.constant 0 : index
    %7 = vector.load %arg9[%c0_4, %c0_5] : memref<1x256xf32, #tpu.memory_space<vmem>>, vector<1x256xf32>
    %8 = vector.broadcast %7 : vector<1x256xf32> to vector<16x256xf32>
    %9 = arith.addf %6, %8 : vector<16x256xf32>
    %c0_6 = arith.constant 0 : index
    %c0_7 = arith.constant 0 : index
    %10 = vector.load %arg10[%c0_6, %c0_7] : memref<16x256xf32, #tpu.memory_space<vmem>>, vector<16x256xf32>
    tpu.vector_store %arg10[%c0_6, %c0_7], %9 {strides = array<i32>} : memref<16x256xf32, #tpu.memory_space<vmem>>, vector<16x256xf32>,
    return
  }
  func.func @transform_0(%arg0: i32) -> (i32, i32) {
    %c0_i32 = arith.constant 0 : i32
    %c0_i32_0 = arith.constant 0 : i32
    %c0_i32_1 = arith.constant 0 : i32
    return %c0_i32, %c0_i32_0 : i32, i32
  }
  func.func @transform_1(%arg0: i32) -> (i32, i32) {
    %c0_i32 = arith.constant 0 : i32
    %c0_i32_0 = arith.constant 0 : i32
    %c0_i32_1 = arith.constant 0 : i32
    return %c0_i32, %c0_i32_0 : i32, i32
  }
  func.func @transform_2(%arg0: i32) -> (i32, i32) {
    %c0_i32 = arith.constant 0 : i32
    %c0_i32_0 = arith.constant 0 : i32
    %c0_i32_1 = arith.constant 0 : i32
    return %c0_i32, %c0_i32_0 : i32, i32
  }
  func.func @transform_3(%arg0: i32) -> (i32, i32) {
    %c0_i32 = arith.constant 0 : i32
    %c0_i32_0 = arith.constant 0 : i32
    %c0_i32_1 = arith.constant 0 : i32
    return %c0_i32, %c0_i32_0 : i32, i32
  }
  func.func @transform_4(%arg0: i32) -> (i32, i32) {
    %c0_i32 = arith.constant 0 : i32
    %c0_i32_0 = arith.constant 0 : i32
    %c0_i32_1 = arith.constant 0 : i32
    return %c0_i32, %c0_i32_0 : i32, i32
  }
  func.func @transform_5(%arg0: i32) -> (i32, i32) {
    %c0_i32 = arith.constant 0 : i32
    %c0_i32_0 = arith.constant 0 : i32
    %c0_i32_1 = arith.constant 0 : i32
    return %c0_i32, %c0_i32_0 : i32, i32
  }
  func.func @transform_6(%arg0: i32) -> (i32, i32) {
    %c0_i32 = arith.constant 0 : i32
    %c0_i32_0 = arith.constant 0 : i32
    %c0_i32_1 = arith.constant 0 : i32
    return %c0_i32, %c0_i32_0 : i32, i32
  }
  func.func @transform_7(%arg0: i32) -> (i32, i32) {
    %c0_i32 = arith.constant 0 : i32
    %c0_i32_0 = arith.constant 0 : i32
    return %c0_i32, %arg0 : i32, i32
  }
  func.func @transform_8(%arg0: i32) -> (i32, i32) {
    %c0_i32 = arith.constant 0 : i32
    %c0_i32_0 = arith.constant 0 : i32
    return %c0_i32, %arg0 : i32, i32
  }
  func.func @transform_9(%arg0: i32) -> (i32, i32) {
    %c0_i32 = arith.constant 0 : i32
    %c0_i32_0 = arith.constant 0 : i32
    return %c0_i32, %arg0 : i32, i32
  }
  func.func @transform_10(%arg0: i32) -> (i32, i32) {
    %c0_i32 = arith.constant 0 : i32
    %c0_i32_0 = arith.constant 0 : i32
    %c0_i32_1 = arith.constant 0 : i32
    return %c0_i32, %c0_i32_0 : i32, i32
  }
}

</mosaic_0001>

<bundles_post_ra>
// kernel: decoder_forward.1
= control target key start
LH: loop header
LB: loop body
LE: loop exit
PB: predicated region body
PF: predicated region fallthrough
CT: control target
= control target key end

     0   :  { %s9246_s0 = inlined_call_operand.vmem [shape: s32[16,1], index: 0, kind: input, shape index: {}]   ;;  %s9247_s1 = inlined_call_operand.vmem [shape: f32[16,512], index: 1, kind: input, shape index: {}, may-alias: {1,10}]   ;;  %s9248_s2 = inlined_call_operand.hbm [shape: bf16[512,256], index: 2, kind: input, shape index: {}]   ;;  %s9249_s3 = inlined_call_operand.hbm [shape: bf16[256,1536], index: 3, kind: input, shape index: {}]   ;;  %s9250_s4 = inlined_call_operand.hbm [shape: bf16[512,1536], index: 4, kind: input, shape index: {}]   ;;  %s9251_s5 = inlined_call_operand.hbm [shape: f32[1,1536], index: 5, kind: input, shape index: {}]   ;;  %s9252_s6 = inlined_call_operand.hbm [shape: f32[1,512], index: 6, kind: input, shape index: {}]   ;;  %s9253_s7 = inlined_call_operand.hbm [shape: bf16[512,512], index: 7, kind: input, shape index: {}]   ;;  %s9254_s8 = inlined_call_operand.hbm [shape: f32[1,512], index: 8, kind: input, shape index: {}]   ;;  %s9255_s9 = inlined_call_operand.hbm [shape: f32[16,512], index: 9, kind: output, shape index: {0}]   ;;  %s9256_s10 = inlined_call_operand.vmem [shape: f32[16,512], index: 10, kind: output, shape index: {1}, may-alias: {1,10}]  }
   0x1   :  { %9278 = sst [smem:[#allocation26_spill]] %s9247_s1 }
   0x2   :  { %9279 = sst [smem:[#allocation27_spill]] %s9249_s3 }
   0x3   :  { %9280 = sst [smem:[#allocation28_spill]] %s9251_s5 }
   0x4   :  { %9281 = sst [smem:[#allocation29_spill]] %s9253_s7 }
   0x5   :  { %9282 = sst [smem:[#allocation30_spill]] %s9255_s9 }
   0x6   :  { %9283 = sst [smem:[#allocation31_spill]] %s9256_s10 }
   0x7   :  { %16 = vsyncpa [#allocation4], 0 }
   0x8   :  { %17 = vsyncpa [#allocation7], 0 }
   0x9   :  { %18 = vsyncpa [#allocation10], 0 }
   0xa   :  { %19 = vsyncpa [#allocation13], 0 }
   0xb   :  { %21 = vsyncpa [#allocation13 + $0x1], 0 }
   0xc   :  { %22 = vsyncpa [#allocation5], 0 }
   0xd   :  { %24 = vsyncpa [#allocation5 + $0x1], 0  ;;  %s8611_s13 = smov 0   ;;  %s8613_s14 = smov 0  }
   0xe   :  { %s8615_s15 = smov 0   ;;  %s8617_s16 = smov 0  }
   0xf LB: > { %9284 = sst [smem:[#allocation21_spill]] %s8524_s13  ;;  %s8632_s17 = sadd.s32 4294967295, %s8536_s16   ;;  %s8536_s16 = sphi %s8617_s16, %s9327_s16   ;;  %s8532_s15 = sphi %s8615_s15, %s9331_s15   ;;  %s8528_s14 = sphi %s8613_s14, %s9330_s14   ;;  %s8524_s13 = sphi %s8611_s13, %s9329_s13  }
  0x10   : > { %s6173_s18 = sadd.s32 4294967294, %s8536_s16   ;;  %p197_p0 = scmp.ne.s32.totalorder %s8528_s14, %s8524_s13 }
  0x11   : > { %p9257_p1 = scmp.eq.s32.totalorder %s8632_s17, 0  ;;  %p253_p3 = scmp.eq.s32.totalorder %s6173_s18, 1 }
  0x12   : > { %p6174_p5 = scmp.ge.s32.totalorder %s8536_s16, 1  ;;  %p281_p7 = scmp.lt.s32.totalorder %s8536_s16, 3 }
  0x13   : > { %p8641_p4 = por %p9257_p1, %p197_p0  ;;  %p8646_p6 = por %p253_p3, %p197_p0 }
  0x14   : > { %p8652_p9 = pnand %p6174_p5, %p281_p7  ;;  %s8538_s22 = smov [#allocation6]  }
  0x15   : > { %s9285_s19 = scalar_select %p8641_p4, 1, 0 }
  0x16   : > { %s9286_s20 = scalar_select %p8646_p6, 1, 0 }
  0x17   : > { %s9288_s21 = scalar_select %p8652_p9, 1, 0 }
  0x18   : > { %9287 = sst [smem:[#allocation22_spill]] %s9286_s20  ;;  %s312_s23 = sshll.u32 %s8538_s22, 4  ;;  %s8656_s23 = int_to_ptr.vmem [resolvable:$true] %s312_s23 }
  0x19   : > { %p7027_p10 = pneg %p8652_p9  ;;  %s8539_s25 = smov [#allocation9]  }
  0x1a   : > { %s339_s26 = sshll.u32 %s8539_s25, 4  ;;  %s9290_s3 = sld [smem:[#allocation27_spill]]  ;;  %s8667_s26 = int_to_ptr.vmem [resolvable:$true] %s339_s26 }
  0x1b   : > { %p8663_p12 = pnand %p7027_p10, %p9257_p1 }
  0x1d   : > { %s9289_s24 = scalar_select %p8663_p12, 1, 0 }
  0x1e   : > { %p8677_p0 = pneg %p8663_p12 }
  0x20   : > { %s8258_s29 = scalar_lea.hbm %s9290_s3, 24576 }
  0x21   : > { %p8259_p13 = scmp.ne.s32.totalorder %s9290_s3, %s8258_s29  ;;  %p8265_p7 = scmp.lt.u32.totalorder %s8258_s29, %s9290_s3 }
  0x23   : > { %p8261_p3 = pnand %p8677_p0, %p8259_p13 }
  0x25   : > { %p8262_p5 = pneg %p8261_p3 }
  0x27   : > { %p8267_p10 = pnand %p8265_p7, %p8262_p5 }
  0x29   : > { %8270 = shalt.err (!%p8267_p10)
}
  0x2a   : > { %s8271_s25 = scalar_lea.vmem %s8656_s23, 24576  ;;  %p8279_p2 = scmp.lt.s32.totalorder %s8656_s23, %s8656_s23 }
  0x2b   : > { %p8272_p11 = scmp.ne.s32.totalorder %s8656_s23, %s8271_s25  ;;  %p8280_p6 = scmp.lt.s32.totalorder %s8271_s25, %s8271_s25 }
  0x2d   : > { %p8274_p8 = pnand %p8272_p11, %p8677_p0  ;;  %p8281_p13 = por %p8280_p6, %p8279_p2 }
  0x2f   : > { %p8275_p1 = pneg %p8274_p8 }
  0x31   : > { %p8282_p3 = pnand %p8281_p13, %p8275_p1 }
  0x33   : > { %8285 = shalt.err (!%p8282_p3)
}
  0x34   : > { %s9261_s27 = smov 768   ;;  %s9262_s28 = smov 48  }
  0x35   : > { %7033 = dma.hbm_to_vmem [thread:$0]  (!%p8663_p12), %s9290_s3, 24576, %s8656_s23, [#allocation7], %s9261_s27, %s9261_s27, %s9262_s28  }
  0x36   : > { %s9292_s5 = sld [smem:[#allocation28_spill]] }
  0x3c   : > { %s8286_s22 = scalar_lea.hbm %s9292_s5, 192 }
  0x3d   : > { %p8287_p1 = scmp.ne.s32.totalorder %s9292_s5, %s8286_s22  ;;  %p8293_p8 = scmp.lt.u32.totalorder %s8286_s22, %s9292_s5 }
  0x3f   : > { %p8289_p2 = pnand %p8287_p1, %p8677_p0 }
  0x41   : > { %p8290_p6 = pneg %p8289_p2 }
  0x43   : > { %p8295_p11 = pnand %p8293_p8, %p8290_p6 }
  0x45   : > { %8298 = shalt.err (!%p8295_p11)
}
  0x46   : > { %s8299_s23 = scalar_lea.vmem %s8667_s26, 192  ;;  %p8307_p13 = scmp.lt.s32.totalorder %s8667_s26, %s8667_s26 }
  0x47   : > { %p8300_p5 = scmp.ne.s32.totalorder %s8667_s26, %s8299_s23  ;;  %p8308_p3 = scmp.lt.s32.totalorder %s8299_s23, %s8299_s23 }
  0x49   : > { %p8302_p7 = pnand %p8300_p5, %p8677_p0  ;;  %p8309_p1 = por %p8308_p3, %p8307_p13 }
  0x4b   : > { %p8303_p10 = pneg %p8302_p7 }
  0x4d   : > { %p8310_p2 = pnand %p8309_p1, %p8303_p10 }
  0x4f   : > { %8313 = shalt.err (!%p8310_p2)
}
  0x50   : > { %7039 = dma.hbm_to_vmem [thread:$0]  (!%p8663_p12), %s9292_s5, 192, %s8667_s26, [#allocation10]  }
  0x51   : > { %s8725_s20 = sadd.s32 1, %s8536_s16   ;;  %s184_s29 = sadd.s32 1, %s8532_s15 }
  0x52   : > { %9293 = sst [smem:[#allocation23_spill]] %s8725_s20  ;;  %s181_s30 = ssub.s32 %s8536_s16, %s8725_s20 }
  0x53   : > { %p191_p6 = scmp.ne.s32.totalorder %s8532_s15, %s8528_s14  ;;  %p182_p8 = scmp.eq.s32.totalorder %s181_s30, 0 }
  0x54   : > { %p192_p11 = scmp.eq.s32.totalorder %s8536_s16, 0  ;;  %p9294_p5 = scmp.eq.s32.totalorder %s8632_s17, 1 }
  0x55   : > { %s8740_s18 = scalar_select %p182_p8, %s8532_s15, %s184_s29  }
  0x56   : > { %p8735_p7 = por %p9294_p5, %p191_p6  ;;  %p193_p10 = por %p192_p11, %p191_p6 }
  0x57   : > { %9297 = sst [smem:[#allocation25_spill]] %s8740_s18  ;;  %p7059_p13 = scmp.lt.s32.totalorder %s8536_s16, 2 }
  0x58   : > { %s9295_s11 = scalar_select %p8735_p7, 1, 0 }
  0x59   : > { %s361_s22 = sand.u32 1, %s8536_s16   ;;  %s9263_s25 = sand.u32 1, %s8532_s15  }
  0x5a   : > { %9296 = sst [smem:[#allocation24_spill]] %s9295_s11  ;;  %s6181_s26 = sshll.u32 %s9263_s25, 9 }
  0x5b   : > { %s6930_s23 = sshll.u32 %s8536_s16, 7  ;;  %s9298_s7 = sld [smem:[#allocation29_spill]] }
  0x5c   : > { %s365_s30 = scalar_lea.vmem [#allocation12], %s6181_s26  ;;  %p8753_p3 = pnand %p7059_p13, %p193_p10 }
  0x5d   : > { %s372_s28 = sshll.u32 %s365_s30, 4  ;;  %s8759_s25 = scalar_lea.sflag [#allocation13], %s361_s22  ;;  %s8757_s28 = int_to_ptr.vmem [resolvable:$true] %s372_s28 }
  0x5e   : > { %s9299_s29 = scalar_select %p8753_p3, 1, 0 }
  0x5f   : > { %p9275_p2 = pneg %p8753_p3 }
  0x61   : > { %s8751_s27 = scalar_lea.hbm %s9298_s7, %s6930_s23  ;;  %s8319_s9 = scalar_lea.hbm %s9298_s7, 16384 }
  0x62   : > { %s8314_s3 = scalar_lea.hbm %s8751_s27, 8192  ;;  %p8320_p11 = scmp.lt.u32.totalorder %s8751_s27, %s9298_s7 }
  0x63   : > { %p8315_p1 = scmp.ne.s32.totalorder %s8751_s27, %s8314_s3  ;;  %p8321_p5 = scmp.lt.u32.totalorder %s8319_s9, %s8314_s3 }
  0x64   : > { %p8323_p13 = scmp.lt.u32.totalorder %s8314_s3, %s8751_s27 }
  0x65   : > { %p8317_p6 = pnand %p9275_p2, %p8315_p1  ;;  %p8322_p10 = por %p8321_p5, %p8320_p11 }
  0x67   : > { %p8318_p8 = pneg %p8317_p6  ;;  %p8324_p7 = por %p8323_p13, %p8322_p10 }
  0x69   : > { %p8325_p4 = pnand %p8324_p7, %p8318_p8 }
  0x6b   : > { %8328 = shalt.err (!%p8325_p4)
}
  0x6c   : > { %s8329_s22 = scalar_lea.vmem %s8757_s28, 8192  ;;  %s8542_s26 = smov [#allocation12]  }
  0x6d   : > { %p8330_p1 = scmp.ne.s32.totalorder %s8757_s28, %s8329_s22  ;;  %s8334_s23 = sshll.u32 %s8542_s26, 4  ;;  %s8335_s23 = int_to_ptr.vmem [resolvable:$false] %s8334_s23 }
  0x6e   : > { %s8336_s13 = scalar_lea.vmem %s8335_s23, 16384  ;;  %p8337_p12 = scmp.lt.s32.totalorder %s8757_s28, %s8335_s23 }
  0x6f   : > { %p8332_p6 = pnand %p8330_p1, %p9275_p2  ;;  %p8338_p11 = scmp.lt.s32.totalorder %s8336_s13, %s8329_s22 }
  0x71   : > { %p8333_p9 = pneg %p8332_p6  ;;  %p8339_p5 = por %p8338_p11, %p8337_p12 }
  0x73   : > { %p8340_p10 = pnand %p8339_p5, %p8333_p9 }
  0x75   : > { %8343 = shalt.err (!%p8340_p10)
}
  0x76   : > { %s8543_s3 = smov 256   ;;  %s8544_s9 = smov 128  }
  0x77   : > { %s8545_s30 = smov 8   ;;  %s8546_s5 = smov [#allocation3]  }
  0x78   : > { %7046 = dma.hbm_to_vmem [thread:$0]  (!%p8753_p3), %s8751_s27, 8192, %s8757_s28, %s8759_s25, %s8543_s3, %s8544_s9, %s8545_s30  }
  0x79   : > { %s299_s7 = sshll.u32 %s8546_s5, 4  ;;  %s8547_s26 = smov [#allocation8]   ;;  %s300_s7 = int_to_ptr.vmem [resolvable:$true] %s299_s7 }
  0x7a   : > { %s325_s18 = sshll.u32 %s8547_s26, 4  ;;  %s8344_s13 = scalar_lea.hbm %s9248_s2, 8192  ;;  %s326_s18 = int_to_ptr.vmem [resolvable:$true] %s325_s18 }
  0x7b   : > { %p8345_p4 = scmp.ne.s32.totalorder %s9248_s2, %s8344_s13  ;;  %p8351_p7 = scmp.lt.u32.totalorder %s8344_s13, %s9248_s2 }
  0x7d   : > { %p8347_p9 = pnand %p8345_p4, %p8677_p0 }
  0x7f   : > { %p8348_p12 = pneg %p8347_p9 }
  0x81   : > { %p8353_p8 = pnand %p8351_p7, %p8348_p12 }
  0x83   : > { %8356 = shalt.err (!%p8353_p8)
}
  0x84   : > { %s8357_s5 = scalar_lea.vmem %s300_s7, 8192  ;;  %p8365_p11 = scmp.lt.s32.totalorder %s300_s7, %s300_s7 }
  0x85   : > { %p8358_p13 = scmp.ne.s32.totalorder %s300_s7, %s8357_s5  ;;  %p8366_p5 = scmp.lt.s32.totalorder %s8357_s5, %s8357_s5 }
  0x87   : > { %p8360_p1 = pnand %p8358_p13, %p8677_p0  ;;  %p8367_p10 = por %p8366_p5, %p8365_p11 }
  0x89   : > { %p8361_p6 = pneg %p8360_p1 }
  0x8b   : > { %p8368_p2 = pnand %p8367_p10, %p8361_p6 }
  0x8d   : > { %8371 = shalt.err (!%p8368_p2)
}
  0x8e   : > { %p9300_p4 = scmp.ne.s32.totalorder %s9289_s24, 0  ;;  %s8372_s20 = scalar_lea.hbm %s9250_s4, 49152 }
  0x8f   : > { %p8373_p9 = scmp.ne.s32.totalorder %s9250_s4, %s8372_s20  ;;  %p8379_p2 = scmp.lt.u32.totalorder %s8372_s20, %s9250_s4 }
  0x90   : > { %7030 = dma.hbm_to_vmem [thread:$0]  (!%p9300_p4), %s9248_s2, 8192, %s300_s7, [#allocation4], %s8544_s9, %s8544_s9, %s8545_s30  }
  0x91   : > { %p8375_p12 = pnand %p8373_p9, %p8677_p0 }
  0x93   : > { %p8376_p7 = pneg %p8375_p12 }
  0x95   : > { %p8381_p8 = pnand %p8379_p2, %p8376_p7 }
  0x97   : > { %8384 = shalt.err (!%p8381_p8)
}
  0x98   : > { %s8385_s22 = scalar_lea.vmem %s326_s18, 49152  ;;  %p8393_p11 = scmp.lt.s32.totalorder %s326_s18, %s326_s18 }
  0x99   : > { %p8386_p13 = scmp.ne.s32.totalorder %s326_s18, %s8385_s22  ;;  %p8394_p5 = scmp.lt.s32.totalorder %s8385_s22, %s8385_s22 }
  0x9b   : > { %p8388_p1 = pnand %p8386_p13, %p8677_p0  ;;  %p8395_p10 = por %p8394_p5, %p8393_p11 }
  0x9d   : > { %p8389_p6 = pneg %p8388_p1 }
  0x9f   : > { %p8396_p3 = pnand %p8395_p10, %p8389_p6 }
  0xa1   : > { %8399 = shalt.err (!%p8396_p3)
}
  0xa2   : > { %s9301_s7 = smov 48   ;;  %s9302_s9 = smov 768  }
  0xa3   : > { %7036 = dma.hbm_to_vmem [thread:$0]  (!%p9300_p4), %s9250_s4, 49152, %s326_s18, [#allocation7], %s9302_s9, %s9302_s9, %s9301_s7  }
  0xa4   : > { %s8548_s5 = smov [#allocation11]   ;;  %s9303_s28 = sand.u32 1, %s8532_s15  }
  0xa5   : > { %s350_s27 = sshll.u32 %s8548_s5, 4  ;;  %s6184_s1 = sshll.u32 %s9303_s28, 1  ;;  %s351_s27 = int_to_ptr.vmem [resolvable:$true] %s350_s27 }
  0xa6   : > { %s8400_s11 = scalar_lea.hbm %s9252_s6, 64 }
  0xa7   : > { %p8401_p3 = scmp.ne.s32.totalorder %s9252_s6, %s8400_s11  ;;  %p8407_p7 = scmp.lt.u32.totalorder %s8400_s11, %s9252_s6 }
  0xa9   : > { %p8403_p9 = pnand %p8401_p3, %p8677_p0 }
  0xab   : > { %p8404_p12 = pneg %p8403_p9 }
  0xad   : > { %p8409_p2 = pnand %p8407_p7, %p8404_p12 }
  0xaf   : > { %8412 = shalt.err (!%p8409_p2)
}
  0xb0   : > { %s8413_s18 = scalar_lea.vmem %s351_s27, 64  ;;  %p8421_p6 = scmp.lt.s32.totalorder %s351_s27, %s351_s27 }
  0xb1   : > { %p8414_p8 = scmp.ne.s32.totalorder %s351_s27, %s8413_s18  ;;  %p8422_p11 = scmp.lt.s32.totalorder %s8413_s18, %s8413_s18 }
  0xb3   : > { %p8416_p13 = pnand %p8414_p8, %p8677_p0  ;;  %p8423_p5 = por %p8422_p11, %p8421_p6 }
  0xb5   : > { %p8417_p1 = pneg %p8416_p13 }
  0xb7   : > { %p8424_p10 = pnand %p8423_p5, %p8417_p1 }
  0xb9   : > { %8427 = shalt.err (!%p8424_p10)
}
  0xba   : > { %7042 = dma.hbm_to_vmem [thread:$0]  (!%p9300_p4), %s9252_s6, 64, %s351_s27, [#allocation10]  }
  0xbb   : > { %s6931_s30 = sshll.u32 %s8536_s16, 5  ;;  %s386_s13 = scalar_lea.vmem [#allocation14], %s6184_s1 }
  0xbc   : > { %s394_s5 = sshll.u32 %s386_s13, 4  ;;  %s392_s10 = scalar_lea.hbm %s9254_s8, %s6931_s30  ;;  %s395_s5 = int_to_ptr.vmem [resolvable:$true] %s394_s5 }
  0xbd   : > { %s8428_s20 = scalar_lea.hbm %s392_s10, 32  ;;  %p9304_p3 = scmp.ne.s32.totalorder %s9299_s29, 0 }
  0xbe   : > { %p8429_p0 = scmp.ne.s32.totalorder %s392_s10, %s8428_s20  ;;  %s8433_s3 = scalar_lea.hbm %s9254_s8, 64 }
  0xbf   : > { %p9305_p9 = pneg %p9304_p3  ;;  %p8434_p4 = scmp.lt.u32.totalorder %s392_s10, %s9254_s8 }
  0xc0   : > { %p8435_p2 = scmp.lt.u32.totalorder %s8433_s3, %s8428_s20  ;;  %p8437_p13 = scmp.lt.u32.totalorder %s8428_s20, %s392_s10 }
  0xc1   : > { %p8431_p12 = pnand %p8429_p0, %p9305_p9 }
  0xc2   : > { %p8436_p8 = por %p8435_p2, %p8434_p4 }
  0xc3   : > { %p8432_p7 = pneg %p8431_p12 }
  0xc4   : > { %p8438_p1 = por %p8437_p13, %p8436_p8 }
  0xc6   : > { %p8439_p6 = pnand %p8438_p1, %p8432_p7 }
  0xc8   : > { %8442 = shalt.err (!%p8439_p6)
}
  0xc9   : > { %s8443_s1 = scalar_lea.vmem %s395_s5, 32  ;;  %p9306_p5 = pmov %p9305_p9 }
  0xca   : > { %p8444_p11 = scmp.ne.s32.totalorder %s395_s5, %s8443_s1  ;;  %s8549_s23 = smov [#allocation14]  }
  0xcb   : > { %s8448_s22 = sshll.u32 %s8549_s23, 4  ;;  %s8449_s22 = int_to_ptr.vmem [resolvable:$false] %s8448_s22 }
  0xcc   : > { %p8446_p10 = pnand %p8444_p11, %p9306_p5  ;;  %s8450_s18 = scalar_lea.vmem %s8449_s22, 64 }
  0xcd   : > { %p8451_p9 = scmp.lt.s32.totalorder %s395_s5, %s8449_s22  ;;  %p8452_p12 = scmp.lt.s32.totalorder %s8450_s18, %s8443_s1 }
  0xce   : > { %p8447_p0 = pneg %p8446_p10 }
  0xcf   : > { %p8453_p2 = por %p8452_p12, %p8451_p9 }
  0xd1   : > { %p8454_p4 = pnand %p8453_p2, %p8447_p0 }
  0xd3   : > { %8457 = shalt.err (!%p8454_p4)
}
  0xd4   : > { %7049 = dma.hbm_to_vmem [thread:$0]  (!%p9304_p3), %s392_s10, 32, %s395_s5, %s8759_s25  }
  0xd5   : > { %p9307_p7 = scmp.ne.s32.totalorder %s9288_s21, 0 }
  0xd6   : > { %p9308_p8 = scmp.eq.s32.totalorder (!%p9307_p7), %s8632_s17, 0 }
  0xd7   : > { %403 = sbr.rel (%p9307_p7) target bundleno = 1783 (0x6f7), region = 56 }
  0xde   : > { %8503 = dma.done.wait (%p9308_p8), [#allocation4], 8192   ;;  %p9309_p13 = pmov %p9308_p8 }
  0xdf   : > { %p9310_p1 = pmov %p9308_p8 }
  0xe0   : > { %8505 = vsyncadd (%p9309_p13), [#allocation4], 4294959104 }
  0xe1   : > { %8507 = dma.done.wait (%p9310_p1), [#allocation7], 73728   ;;  %p9311_p6 = pmov %p9310_p1 }
  0xe2   : > { %p9312_p11 = pmov %p9310_p1 }
  0xe3   : > { %8509 = vsyncadd (%p9311_p6), [#allocation7], 4294893568 }
  0xe4   : > { %8511 = dma.done.wait (%p9312_p11), [#allocation10], 256   ;;  %p9313_p3 = pmov %p9310_p1 }
  0xe5   : > { %s425_s21 = sand.u32 1, %s8632_s17   ;;  %s8881_s25 = sand.u32 1, %s8528_s14  }
  0xe6   : > { %8513 = vsyncadd (%p9313_p3), [#allocation10], 4294967040  ;;  %s6193_s29 = sshll.u32 %s8881_s25, 9  ;;  %s426_s7 = scalar_lea.sflag [#allocation13], %s425_s21 }
  0xe7   : > { %s8884_s9 = scalar_lea.vmem [#allocation12], %s6193_s29  ;;  %p9314_p5 = scmp.ne.s32.totalorder %s9285_s19, 0 }
  0xe9   : > { %8515 = dma.done.wait (%p9314_p5), %s426_s7, 8224  }
  0xea   : > { %8517 = vsyncadd (%p9314_p5), %s426_s7, 4294959072  ;;  %s6194_s30 = sshll.u32 %s8881_s25, 1  ;;  %s6195_s13 = sshll.u32 %s8881_s25, 5 }
  0xeb   : > { %s8892_s5 = scalar_lea.vmem [#allocation14], %s6194_s30  ;;  %s8894_s28 = scalar_lea.vmem [#allocation15], %s6195_s13 }
  0xec   : > { %p9315_p10 = scmp.ne.s32.totalorder %s8632_s17, 0 }
  0xed   : > { %v487_v0 = vld [vmem:[%s9246_s0] sm:$0xff] (!%p9315_p10)  ;;  %v8550_v1 = vmov (!%p9315_p10), 0   ;;  %v7117_v4 = vld [vmem:[#allocation3 + $0x14] ss:$8 sps:$4 sm:$0xff] (!%p9315_p10)   ;;  %v488_v5 = vld [vmem:[%s9246_s0 + $0x8] sm:$0xff] (!%p9315_p10)  ;;  %v489_v62 = vlaneseq (!%p9315_p10)  ;;  %s9318_s3 = sld [smem:[#allocation26_spill]] (!%p9315_p10) }
  0xee   : > { %486 = sbr.rel (%p9315_p10) target bundleno = 1483 (0x5cb), region = 88  ;;  %7113 = vset.pattern.permute.xlu0 (!%p9315_p10), %v8550_v1  ;;  %v7114_v2 = vld [vmem:[#allocation3 + $0x4] ss:$8 sps:$4 sm:$0xff] (!%p9315_p10)   ;;  %v7116_v3 = vld [vmem:[#allocation3] ss:$8 sps:$4 sm:$0xff] (!%p9315_p10)   ;;  %s9319_s29 = sld [smem:[#allocation31_spill]] (!%p9315_p10) }
  0xef   : > { %495 = vperm.xlu0 (!%p9315_p10), %7113, %v487_v0   ;;  %904 = vmatprep.subr.bf16.mxu0 (!%p9315_p10), %v7114_v2  ;;  %v7119_v6 = vld [vmem:[#allocation3 + $0x10] ss:$8 sps:$4 sm:$0xff] (!%p9315_p10)   ;;  %v7120_v7 = vld [vmem:[#allocation3 + $0x24] ss:$8 sps:$4 sm:$0xff] (!%p9315_p10)   ;;  %v7122_v8 = vld [vmem:[#allocation3 + $0x20] ss:$8 sps:$4 sm:$0xff] (!%p9315_p10)  }
  0xf0   : > { %905 = vmatpush1.bf16.msra.mxu0 (!%p9315_p10), %v7116_v3  ;;  %v7123_v9 = vld [vmem:[#allocation3 + $0x34] ss:$8 sps:$4 sm:$0xff] (!%p9315_p10)   ;;  %v7125_v10 = vld [vmem:[#allocation3 + $0x30] ss:$8 sps:$4 sm:$0xff] (!%p9315_p10)   ;;  %v7126_v11 = vld [vmem:[#allocation3 + $0x44] ss:$8 sps:$4 sm:$0xff] (!%p9315_p10)  }
  0xf1   : > { %906 = vmatprep.subr.bf16.mxu0 (!%p9315_p10), %v7117_v4  ;;  %v7128_v12 = vld [vmem:[#allocation3 + $0x40] ss:$8 sps:$4 sm:$0xff] (!%p9315_p10)   ;;  %v7129_v13 = vld [vmem:[#allocation3 + $0x54] ss:$8 sps:$4 sm:$0xff] (!%p9315_p10)   ;;  %v7131_v14 = vld [vmem:[#allocation3 + $0x50] ss:$8 sps:$4 sm:$0xff] (!%p9315_p10)  }
  0xf2   : > { %v7132_v15 = vld [vmem:[#allocation3 + $0x64] ss:$8 sps:$4 sm:$0xff] (!%p9315_p10)   ;;  %v7134_v16 = vld [vmem:[#allocation3 + $0x60] ss:$8 sps:$4 sm:$0xff] (!%p9315_p10)   ;;  %v7135_v17 = vld [vmem:[#allocation3 + $0x74] ss:$8 sps:$4 sm:$0xff] (!%p9315_p10)  }
  0xf3   : > { %498 = vperm.xlu0 (!%p9315_p10), %7113, %v488_v5   ;;  %v7137_v18 = vld [vmem:[#allocation3 + $0x70] ss:$8 sps:$4 sm:$0xff] (!%p9315_p10)   ;;  %v7138_v19 = vld [vmem:[#allocation3 + $0x84] ss:$8 sps:$4 sm:$0xff] (!%p9315_p10)   ;;  %v7140_v20 = vld [vmem:[#allocation3 + $0x80] ss:$8 sps:$4 sm:$0xff] (!%p9315_p10)  }
  0xf4   : > { %907 = vmatpush1.bf16.msra.mxu0 (!%p9315_p10), %v7119_v6  ;;  %v7141_v21 = vld [vmem:[#allocation3 + $0x94] ss:$8 sps:$4 sm:$0xff] (!%p9315_p10)   ;;  %v7143_v22 = vld [vmem:[#allocation3 + $0x90] ss:$8 sps:$4 sm:$0xff] (!%p9315_p10)   ;;  %v7144_v23 = vld [vmem:[#allocation3 + $0xa4] ss:$8 sps:$4 sm:$0xff] (!%p9315_p10)  }
  0xf5   : > { %908 = vmatprep.subr.bf16.mxu0 %v7120_v7  ;;  %v7146_v24 = vld [vmem:[#allocation3 + $0xa0] ss:$8 sps:$4 sm:$0xff]   ;;  %v7147_v25 = vld [vmem:[#allocation3 + $0xb4] ss:$8 sps:$4 sm:$0xff]   ;;  %v7149_v26 = vld [vmem:[#allocation3 + $0xb0] ss:$8 sps:$4 sm:$0xff]  }
  0xf6   : > { %v7150_v27 = vld [vmem:[#allocation3 + $0xc4] ss:$8 sps:$4 sm:$0xff]   ;;  %v7152_v28 = vld [vmem:[#allocation3 + $0xc0] ss:$8 sps:$4 sm:$0xff]   ;;  %v7153_v29 = vld [vmem:[#allocation3 + $0xd4] ss:$8 sps:$4 sm:$0xff]  }
  0xf7   : > { %v7155_v30 = vld [vmem:[#allocation3 + $0xd0] ss:$8 sps:$4 sm:$0xff]   ;;  %v7156_v31 = vld [vmem:[#allocation3 + $0xe4] ss:$8 sps:$4 sm:$0xff]   ;;  %v7158_v32 = vld [vmem:[#allocation3 + $0xe0] ss:$8 sps:$4 sm:$0xff]  }
  0xf8   : > { %909 = vmatpush1.bf16.msra.mxu0 %v7122_v8  ;;  %v7159_v33 = vld [vmem:[#allocation3 + $0xf4] ss:$8 sps:$4 sm:$0xff]   ;;  %v7161_v34 = vld [vmem:[#allocation3 + $0xf0] ss:$8 sps:$4 sm:$0xff]   ;;  %v7164_v35 = vld [vmem:[#allocation3 + $0x104] ss:$8 sps:$4 sm:$0xff]  }
  0xf9   : > { %910 = vmatprep.subr.bf16.mxu0 %v7123_v9  ;;  %v7210_v36 = vld [vmem:[#allocation6 + $0x4] ss:$48 sps:$4 sm:$0xff]   ;;  %v7215_v37 = vld [vmem:[#allocation6] ss:$48 sps:$4 sm:$0xff]   ;;  %v490_v1 = vand.u32 127, %v489_v62 }
  0xfa   : > { %v7216_v38 = vld [vmem:[#allocation6 + $0x64] ss:$48 sps:$4 sm:$0xff]   ;;  %2216 = vmatprep.subr.bf16.mxu1 %v7210_v36  ;;  %v7221_v39 = vld [vmem:[#allocation6 + $0x60] ss:$48 sps:$4 sm:$0xff]  }
  0xfb   : > { %2217 = vmatpush1.bf16.msra.mxu1 %v7215_v37  ;;  %v7222_v40 = vld [vmem:[#allocation6 + $0xc4] ss:$48 sps:$4 sm:$0xff]   ;;  %v7227_v41 = vld [vmem:[#allocation6 + $0xc0] ss:$48 sps:$4 sm:$0xff]   ;;  %v492_v5 = vadd.s32 256, %v490_v1  ;;  %v491_v6 = vadd.s32 128, %v490_v1 }
  0xfc   : > { %911 = vmatpush1.bf16.msra.mxu0 %v7125_v10  ;;  %2218 = vmatprep.subr.bf16.mxu1 %v7216_v38  ;;  %v7228_v42 = vld [vmem:[#allocation6 + $0x124] ss:$48 sps:$4 sm:$0xff]   ;;  %v7233_v43 = vld [vmem:[#allocation6 + $0x120] ss:$48 sps:$4 sm:$0xff]   ;;  %v493_v7 = vadd.s32 384, %v490_v1 }
  0xfd   : > { %912 = vmatprep.subr.bf16.mxu0 %v7126_v11  ;;  %v7234_v44 = vld [vmem:[#allocation6 + $0x184] ss:$48 sps:$4 sm:$0xff]   ;;  %v7239_v45 = vld [vmem:[#allocation6 + $0x180] ss:$48 sps:$4 sm:$0xff]  }
  0xfe   : > { %v7240_v46 = vld [vmem:[#allocation6 + $0x1e4] ss:$48 sps:$4 sm:$0xff]   ;;  %v7245_v47 = vld [vmem:[#allocation6 + $0x1e0] ss:$48 sps:$4 sm:$0xff]  }
  0xff   : > { %2219 = vmatpush1.bf16.msra.mxu1 %v7221_v39  ;;  %v7246_v48 = vld [vmem:[#allocation6 + $0x244] ss:$48 sps:$4 sm:$0xff]   ;;  %v7251_v49 = vld [vmem:[#allocation6 + $0x240] ss:$48 sps:$4 sm:$0xff]  }
 0x100   : > { %913 = vmatpush1.bf16.msra.mxu0 %v7128_v12  ;;  %2220 = vmatprep.subr.bf16.mxu1 %v7222_v40  ;;  %v7252_v50 = vld [vmem:[#allocation6 + $0x2a4] ss:$48 sps:$4 sm:$0xff]   ;;  %v7257_v51 = vld [vmem:[#allocation6 + $0x2a0] ss:$48 sps:$4 sm:$0xff]   ;;  %v8551_v12 = vmov 1.0|1.0  }
 0x101   : > { %914 = vmatprep.subr.bf16.mxu0 %v7129_v13  ;;  %v7258_v52 = vld [vmem:[#allocation6 + $0x304] ss:$48 sps:$4 sm:$0xff]   ;;  %v7263_v53 = vld [vmem:[#allocation6 + $0x300] ss:$48 sps:$4 sm:$0xff]  }
 0x102   : > { %v7264_v54 = vld [vmem:[#allocation6 + $0x364] ss:$48 sps:$4 sm:$0xff]   ;;  %v7269_v55 = vld [vmem:[#allocation6 + $0x360] ss:$48 sps:$4 sm:$0xff]  }
 0x103   : > { %2221 = vmatpush1.bf16.msra.mxu1 %v7227_v41  ;;  %v7270_v56 = vld [vmem:[#allocation6 + $0x3c4] ss:$48 sps:$4 sm:$0xff]   ;;  %v7275_v57 = vld [vmem:[#allocation6 + $0x3c0] ss:$48 sps:$4 sm:$0xff]  }
 0x104   : > { %915 = vmatpush1.bf16.msra.mxu0 %v7131_v14  ;;  %2222 = vmatprep.subr.bf16.mxu1 %v7228_v42  ;;  %v7276_v58 = vld [vmem:[#allocation6 + $0x424] ss:$48 sps:$4 sm:$0xff]   ;;  %v7281_v59 = vld [vmem:[#allocation6 + $0x420] ss:$48 sps:$4 sm:$0xff]  }
 0x105   : > { %916 = vmatprep.subr.bf16.mxu0 %v7132_v15  ;;  %v7282_v60 = vld [vmem:[#allocation6 + $0x484] ss:$48 sps:$4 sm:$0xff]   ;;  %v7287_v61 = vld [vmem:[#allocation6 + $0x480] ss:$48 sps:$4 sm:$0xff]  }
 0x106   : > { %v7288_v63 = vld [vmem:[#allocation6 + $0x4e4] ss:$48 sps:$4 sm:$0xff]   ;;  %v7293_v0 = vld [vmem:[#allocation6 + $0x4e0] ss:$48 sps:$4 sm:$0xff]  }
 0x107   : > { %2223 = vmatpush1.bf16.msra.mxu1 %v7233_v43  ;;  %v7294_v2 = vld [vmem:[#allocation6 + $0x544] ss:$48 sps:$4 sm:$0xff]   ;;  %v7299_v3 = vld [vmem:[#allocation6 + $0x540] ss:$48 sps:$4 sm:$0xff]  }
 0x108   : > { %917 = vmatpush1.bf16.msra.mxu0 %v7134_v16  ;;  %2224 = vmatprep.subr.bf16.mxu1 %v7234_v44  ;;  %v7162_v9 = vld [vmem:[#allocation3 + $0x100] ss:$8 sps:$4 sm:$0xff]   ;;  %v7167_v10 = vld [vmem:[#allocation3 + $0x114] ss:$8 sps:$4 sm:$0xff]   ;;  %v7165_v13 = vld [vmem:[#allocation3 + $0x110] ss:$8 sps:$4 sm:$0xff]  }
 0x109   : > { %918 = vmatprep.subr.bf16.mxu0 %v7135_v17  ;;  %v7170_v14 = vld [vmem:[#allocation3 + $0x124] ss:$8 sps:$4 sm:$0xff]   ;;  %v7168_v15 = vld [vmem:[#allocation3 + $0x120] ss:$8 sps:$4 sm:$0xff]   ;;  %v7173_v16 = vld [vmem:[#allocation3 + $0x134] ss:$8 sps:$4 sm:$0xff]  }
 0x10a   : > { %v7171_v17 = vld [vmem:[#allocation3 + $0x130] ss:$8 sps:$4 sm:$0xff]   ;;  %v7203_v36 = vld [vmem:[#allocation3 + $0x1d4] ss:$8 sps:$4 sm:$0xff]   ;;  %v7206_v38 = vld [vmem:[#allocation3 + $0x1e4] ss:$8 sps:$4 sm:$0xff]  }
 0x10b   : > { %2225 = vmatpush1.bf16.msra.mxu1 %v7239_v45  ;;  %v7201_v37 = vld [vmem:[#allocation3 + $0x1d0] ss:$8 sps:$4 sm:$0xff]   ;;  %v7204_v39 = vld [vmem:[#allocation3 + $0x1e0] ss:$8 sps:$4 sm:$0xff]   ;;  %v7209_v40 = vld [vmem:[#allocation3 + $0x1f4] ss:$8 sps:$4 sm:$0xff]  }
 0x10c   : > { %919 = vmatpush1.bf16.msra.mxu0 %v7137_v18  ;;  %2226 = vmatprep.subr.bf16.mxu1 %v7240_v46  ;;  %v7176_v18 = vld [vmem:[#allocation3 + $0x144] ss:$8 sps:$4 sm:$0xff]   ;;  %v7207_v41 = vld [vmem:[#allocation3 + $0x1f0] ss:$8 sps:$4 sm:$0xff]  }
 0x10d   : > { %920 = vmatprep.subr.bf16.mxu0 %v7138_v19  ;;  %v7174_v19 = vld [vmem:[#allocation3 + $0x140] ss:$8 sps:$4 sm:$0xff]   ;;  %v7214_v42 = vld [vmem:[#allocation6 + $0x14] ss:$48 sps:$4 sm:$0xff]  }
 0x10e   : > { %v7212_v43 = vld [vmem:[#allocation6 + $0x10] ss:$48 sps:$4 sm:$0xff]   ;;  %v7220_v44 = vld [vmem:[#allocation6 + $0x74] ss:$48 sps:$4 sm:$0xff]  }
 0x10f   : > { %2227 = vmatpush1.bf16.msra.mxu1 %v7245_v47  ;;  %v7218_v45 = vld [vmem:[#allocation6 + $0x70] ss:$48 sps:$4 sm:$0xff]   ;;  %v7226_v46 = vld [vmem:[#allocation6 + $0xd4] ss:$48 sps:$4 sm:$0xff]  }
 0x110   : > { %921 = vmatpush1.bf16.msra.mxu0 %v7140_v20  ;;  %2228 = vmatprep.subr.bf16.mxu1 %v7246_v48  ;;  %v7179_v20 = vld [vmem:[#allocation3 + $0x154] ss:$8 sps:$4 sm:$0xff]   ;;  %v7224_v47 = vld [vmem:[#allocation6 + $0xd0] ss:$48 sps:$4 sm:$0xff]  }
 0x111   : > { %922 = vmatprep.subr.bf16.mxu0 %v7141_v21  ;;  %v7177_v21 = vld [vmem:[#allocation3 + $0x150] ss:$8 sps:$4 sm:$0xff]   ;;  %v7232_v48 = vld [vmem:[#allocation6 + $0x134] ss:$48 sps:$4 sm:$0xff]  }
 0x112   : > { %v7302_v11 = vld [vmem:[#allocation6 + $0x5b0] ss:$48 sps:$4 sm:$0xff]  }
 0x113   : > { %2229 = vmatpush1.bf16.msra.mxu1 %v7251_v49  ;;  %v7230_v49 = vld [vmem:[#allocation6 + $0x130] ss:$48 sps:$4 sm:$0xff]  }
 0x114   : > { %923 = vmatpush1.bf16.msra.mxu0 %v7143_v22  ;;  %2230 = vmatprep.subr.bf16.mxu1 %v7252_v50  ;;  %v7182_v22 = vld [vmem:[#allocation3 + $0x164] ss:$8 sps:$4 sm:$0xff]  }
 0x115   : > { %924 = vmatprep.subr.bf16.mxu0 %v7144_v23  ;;  %v7180_v23 = vld [vmem:[#allocation3 + $0x160] ss:$8 sps:$4 sm:$0xff]   ;;  %v7238_v50 = vld [vmem:[#allocation6 + $0x194] ss:$48 sps:$4 sm:$0xff]  }
 0x117   : > { %2231 = vmatpush1.bf16.msra.mxu1 %v7257_v51  ;;  %v7236_v51 = vld [vmem:[#allocation6 + $0x190] ss:$48 sps:$4 sm:$0xff]  }
 0x118   : > { %925 = vmatpush1.bf16.msra.mxu0 %v7146_v24  ;;  %2232 = vmatprep.subr.bf16.mxu1 %v7258_v52  ;;  %v7185_v24 = vld [vmem:[#allocation3 + $0x174] ss:$8 sps:$4 sm:$0xff]  }
 0x119   : > { %926 = vmatprep.subr.bf16.mxu0 %v7147_v25  ;;  %v7183_v25 = vld [vmem:[#allocation3 + $0x170] ss:$8 sps:$4 sm:$0xff]   ;;  %v7244_v52 = vld [vmem:[#allocation6 + $0x1f4] ss:$48 sps:$4 sm:$0xff]  }
 0x11b   : > { %2233 = vmatpush1.bf16.msra.mxu1 %v7263_v53  ;;  %v7242_v53 = vld [vmem:[#allocation6 + $0x1f0] ss:$48 sps:$4 sm:$0xff]  }
 0x11c   : > { %927 = vmatpush1.bf16.msra.mxu0 %v7149_v26  ;;  %2234 = vmatprep.subr.bf16.mxu1 %v7264_v54  ;;  %v7188_v26 = vld [vmem:[#allocation3 + $0x184] ss:$8 sps:$4 sm:$0xff]  }
 0x11d   : > { %928 = vmatprep.subr.bf16.mxu0 %v7150_v27  ;;  %v7186_v27 = vld [vmem:[#allocation3 + $0x180] ss:$8 sps:$4 sm:$0xff]   ;;  %v7250_v54 = vld [vmem:[#allocation6 + $0x254] ss:$48 sps:$4 sm:$0xff]  }
 0x11f   : > { %2235 = vmatpush1.bf16.msra.mxu1 %v7269_v55  ;;  %v7248_v55 = vld [vmem:[#allocation6 + $0x250] ss:$48 sps:$4 sm:$0xff]  }
 0x120   : > { %929 = vmatpush1.bf16.msra.mxu0 %v7152_v28  ;;  %2236 = vmatprep.subr.bf16.mxu1 %v7270_v56  ;;  %v7191_v28 = vld [vmem:[#allocation3 + $0x194] ss:$8 sps:$4 sm:$0xff]  }
 0x121   : > { %930 = vmatprep.subr.bf16.mxu0 %v7153_v29  ;;  %v7189_v29 = vld [vmem:[#allocation3 + $0x190] ss:$8 sps:$4 sm:$0xff]   ;;  %v7256_v56 = vld [vmem:[#allocation6 + $0x2b4] ss:$48 sps:$4 sm:$0xff]  }
 0x123   : > { %2237 = vmatpush1.bf16.msra.mxu1 %v7275_v57  ;;  %v7254_v57 = vld [vmem:[#allocation6 + $0x2b0] ss:$48 sps:$4 sm:$0xff]  }
 0x124   : > { %931 = vmatpush1.bf16.msra.mxu0 %v7155_v30  ;;  %2238 = vmatprep.subr.bf16.mxu1 %v7276_v58  ;;  %v7194_v30 = vld [vmem:[#allocation3 + $0x1a4] ss:$8 sps:$4 sm:$0xff]  }
 0x125   : > { %932 = vmatprep.subr.bf16.mxu0 %v7156_v31  ;;  %v7192_v31 = vld [vmem:[#allocation3 + $0x1a0] ss:$8 sps:$4 sm:$0xff]   ;;  %v7262_v58 = vld [vmem:[#allocation6 + $0x314] ss:$48 sps:$4 sm:$0xff]  }
 0x127   : > { %2239 = vmatpush1.bf16.msra.mxu1 %v7281_v59  ;;  %v7260_v59 = vld [vmem:[#allocation6 + $0x310] ss:$48 sps:$4 sm:$0xff]  }
 0x128   : > { %933 = vmatpush1.bf16.msra.mxu0 %v7158_v32  ;;  %2240 = vmatprep.subr.bf16.mxu1 %v7282_v60  ;;  %v7197_v32 = vld [vmem:[#allocation3 + $0x1b4] ss:$8 sps:$4 sm:$0xff]  }
 0x129   : > { %934 = vmatprep.subr.bf16.mxu0 %v7159_v33  ;;  %v7195_v33 = vld [vmem:[#allocation3 + $0x1b0] ss:$8 sps:$4 sm:$0xff]   ;;  %v7268_v60 = vld [vmem:[#allocation6 + $0x374] ss:$48 sps:$4 sm:$0xff]  }
 0x12b   : > { %2241 = vmatpush1.bf16.msra.mxu1 %v7287_v61  ;;  %v7266_v61 = vld [vmem:[#allocation6 + $0x370] ss:$48 sps:$4 sm:$0xff]  }
 0x12c   : > { %935 = vmatpush1.bf16.msra.mxu0 %v7161_v34  ;;  %2242 = vmatprep.subr.bf16.mxu1 %v7288_v63  ;;  %v7200_v34 = vld [vmem:[#allocation3 + $0x1c4] ss:$8 sps:$4 sm:$0xff]  }
 0x12d   : > { %947 = vmatprep.subr.bf16.mxu0 %v7164_v35  ;;  %v7198_v35 = vld [vmem:[#allocation3 + $0x1c0] ss:$8 sps:$4 sm:$0xff]   ;;  %v7274_v63 = vld [vmem:[#allocation6 + $0x3d4] ss:$48 sps:$4 sm:$0xff]  }
 0x12f   : > { %2243 = vmatpush1.bf16.msra.mxu1 %v7293_v0  ;;  %v7272_v0 = vld [vmem:[#allocation6 + $0x3d0] ss:$48 sps:$4 sm:$0xff]  }
 0x130   : > { %2244 = vmatprep.subr.bf16.mxu1 %v7294_v2  ;;  %v7278_v2 = vld [vmem:[#allocation6 + $0x430] ss:$48 sps:$4 sm:$0xff]  }
 0x133   : > { %2245 = vmatpush1.bf16.msra.mxu1 %v7299_v3  ;;  %v7286_v3 = vld [vmem:[#allocation6 + $0x494] ss:$48 sps:$4 sm:$0xff]  }
 0x16e   : > { %v496_v4 = vpop.permute.xlu0 %495 }
 0x16f   : > { %vm502_vm0 = vcmp.eq.s32.totalorder %v492_v5, %v496_v4  ;;  %vm501_vm6 = vcmp.eq.s32.totalorder %v491_v6, %v496_v4  ;;  %vm500_vm8 = vcmp.eq.s32.totalorder %v490_v1, %v496_v4  ;;  %vm503_vm10 = vcmp.eq.s32.totalorder %v493_v7, %v496_v4  ;;  %v7284_v4 = vld [vmem:[#allocation6 + $0x490] ss:$48 sps:$4 sm:$0xff]  }
 0x172   : > { %v499_v8 = vpop.permute.xlu0 %498 }
 0x173   : > { %vm504_vm1 = vcmp.eq.s32.totalorder %v490_v1, %v499_v8  ;;  %vm506_vm2 = vcmp.eq.s32.totalorder %v492_v5, %v499_v8  ;;  %vm505_vm3 = vcmp.eq.s32.totalorder %v491_v6, %v499_v8  ;;  %vm507_vm4 = vcmp.eq.s32.totalorder %v493_v7, %v499_v8  ;;  %v7280_v1 = vld [vmem:[#allocation6 + $0x434] ss:$48 sps:$4 sm:$0xff]   ;;  %v7290_v6 = vld [vmem:[#allocation6 + $0x4f0] ss:$48 sps:$4 sm:$0xff]  }
 0x174   : > { %vm8905_vm5 = vmpackc.low %vm506_vm2, %vm502_vm0  ;;  %v7292_v5 = vld [vmem:[#allocation6 + $0x4f4] ss:$48 sps:$4 sm:$0xff]   ;;  %v7296_v8 = vld [vmem:[#allocation6 + $0x550] ss:$48 sps:$4 sm:$0xff]  }
 0x175   : > { %vm6261_vm7 = vmpackc.low %vm505_vm3, %vm501_vm6  ;;  %v7298_v7 = vld [vmem:[#allocation6 + $0x554] ss:$48 sps:$4 sm:$0xff]  }
 0x176   : > { %6262 = vmatprep.mubr.msk.bf16.mxu0 %vm6261_vm7, %v8551_v12  ;;  %vm6263_vm9 = vmpackc.low %vm504_vm1, %vm500_vm8 }
 0x177   : > { %6264 = vmatmul.mubr.msk.bf16.vlgmr.msra.gmra.mrb[0].mxu0 %vm6263_vm9, %v8551_v12  ;;  %vm6265_vm11 = vmpackc.low %vm507_vm4, %vm503_vm10 }
 0x178   : > { %948 = vmatpush1.bf16.msra.mxu0 %v7162_v9  ;;  %6266 = vmatprep.mubr.msk.bf16.mxu0 %vm6265_vm11, %v8551_v12  ;;  %v7300_v9 = vld [vmem:[#allocation6 + $0x5a4] ss:$48 sps:$4 sm:$0xff]  }
 0x179   : > { %949 = vmatprep.subr.bf16.mxu0 %v7167_v10  ;;  %v7304_v10 = vld [vmem:[#allocation6 + $0x5b4] ss:$48 sps:$4 sm:$0xff]   ;;  %2246 = vmatprep.subr.bf16.mxu1 %v7300_v9 }
 0x17a   : > { %v7389_v9 = vld [vmem:[#allocation6 + $0x504] ss:$48 sps:$4 sm:$0xff]  }
 0x17c   : > { %950 = vmatpush1.bf16.msra.mxu0 %v7165_v13  ;;  %v7308_v13 = vld [vmem:[#allocation6 + $0xc] ss:$48 sps:$4 sm:$0xff]  }
 0x17d   : > { %951 = vmatprep.subr.bf16.mxu0 %v7170_v14  ;;  %v7311_v14 = vld [vmem:[#allocation6 + $0x24] ss:$48 sps:$4 sm:$0xff]  }
 0x180   : > { %952 = vmatpush1.bf16.msra.mxu0 %v7168_v15 }
 0x181   : > { %953 = vmatprep.subr.bf16.mxu0 %v7173_v16 }
 0x184   : > { %954 = vmatpush1.bf16.msra.mxu0 %v7171_v17 }
 0x185   : > { %955 = vmatprep.subr.bf16.mxu0 %v7176_v18 }
 0x188   : > { %956 = vmatpush1.bf16.msra.mxu0 %v7174_v19 }
 0x189   : > { %957 = vmatprep.subr.bf16.mxu0 %v7179_v20 }
 0x18c   : > { %958 = vmatpush1.bf16.msra.mxu0 %v7177_v21  ;;  %v7306_v21 = vld [vmem:[#allocation6 + $0x8] ss:$48 sps:$4 sm:$0xff]  }
 0x18d   : > { %959 = vmatprep.subr.bf16.mxu0 %v7182_v22  ;;  %v7309_v22 = vld [vmem:[#allocation6 + $0x20] ss:$48 sps:$4 sm:$0xff]  }
 0x190   : > { %960 = vmatpush1.bf16.msra.mxu0 %v7180_v23  ;;  %v7314_v23 = vld [vmem:[#allocation6 + $0x6c] ss:$48 sps:$4 sm:$0xff]  }
 0x191   : > { %961 = vmatprep.subr.bf16.mxu0 %v7185_v24  ;;  %v7317_v24 = vld [vmem:[#allocation6 + $0x84] ss:$48 sps:$4 sm:$0xff]  }
 0x194   : > { %962 = vmatpush1.bf16.msra.mxu0 %v7183_v25  ;;  %v7312_v25 = vld [vmem:[#allocation6 + $0x68] ss:$48 sps:$4 sm:$0xff]  }
 0x195   : > { %963 = vmatprep.subr.bf16.mxu0 %v7188_v26  ;;  %v7315_v26 = vld [vmem:[#allocation6 + $0x80] ss:$48 sps:$4 sm:$0xff]  }
 0x198   : > { %964 = vmatpush1.bf16.msra.mxu0 %v7186_v27  ;;  %v7320_v27 = vld [vmem:[#allocation6 + $0xcc] ss:$48 sps:$4 sm:$0xff]  }
 0x199   : > { %965 = vmatprep.subr.bf16.mxu0 %v7191_v28  ;;  %v7323_v28 = vld [vmem:[#allocation6 + $0xe4] ss:$48 sps:$4 sm:$0xff]  }
 0x19c   : > { %966 = vmatpush1.bf16.msra.mxu0 %v7189_v29  ;;  %v7318_v29 = vld [vmem:[#allocation6 + $0xc8] ss:$48 sps:$4 sm:$0xff]  }
 0x19d   : > { %967 = vmatprep.subr.bf16.mxu0 %v7194_v30  ;;  %v7321_v30 = vld [vmem:[#allocation6 + $0xe0] ss:$48 sps:$4 sm:$0xff]  }
 0x1a0   : > { %968 = vmatpush1.bf16.msra.mxu0 %v7192_v31  ;;  %v7326_v31 = vld [vmem:[#allocation6 + $0x12c] ss:$48 sps:$4 sm:$0xff]  }
 0x1a1   : > { %969 = vmatprep.subr.bf16.mxu0 %v7197_v32  ;;  %v7329_v32 = vld [vmem:[#allocation6 + $0x144] ss:$48 sps:$4 sm:$0xff]  }
 0x1a4   : > { %970 = vmatpush1.bf16.msra.mxu0 %v7195_v33  ;;  %v7324_v33 = vld [vmem:[#allocation6 + $0x128] ss:$48 sps:$4 sm:$0xff]  }
 0x1a5   : > { %971 = vmatprep.subr.bf16.mxu0 %v7200_v34  ;;  %v7327_v34 = vld [vmem:[#allocation6 + $0x140] ss:$48 sps:$4 sm:$0xff]  }
 0x1a8   : > { %972 = vmatpush1.bf16.msra.mxu0 %v7198_v35  ;;  %v7332_v35 = vld [vmem:[#allocation6 + $0x18c] ss:$48 sps:$4 sm:$0xff]  }
 0x1a9   : > { %973 = vmatprep.subr.bf16.mxu0 %v7203_v36  ;;  %v7335_v36 = vld [vmem:[#allocation6 + $0x1a4] ss:$48 sps:$4 sm:$0xff]  }
 0x1ac   : > { %974 = vmatpush1.bf16.msra.mxu0 %v7201_v37  ;;  %v7330_v37 = vld [vmem:[#allocation6 + $0x188] ss:$48 sps:$4 sm:$0xff]  }
 0x1ad   : > { %975 = vmatprep.subr.bf16.mxu0 %v7206_v38  ;;  %v7333_v38 = vld [vmem:[#allocation6 + $0x1a0] ss:$48 sps:$4 sm:$0xff]  }
 0x1b0   : > { %976 = vmatpush1.bf16.msra.mxu0 %v7204_v39  ;;  %v7338_v39 = vld [vmem:[#allocation6 + $0x1ec] ss:$48 sps:$4 sm:$0xff]  }
 0x1b1   : > { %977 = vmatprep.subr.bf16.mxu0 %v7209_v40  ;;  %v7341_v40 = vld [vmem:[#allocation6 + $0x204] ss:$48 sps:$4 sm:$0xff]  }
 0x1b4   : > { %978 = vmatpush1.bf16.msra.mxu0 %v7207_v41  ;;  %v7336_v41 = vld [vmem:[#allocation6 + $0x1e8] ss:$48 sps:$4 sm:$0xff]  }
 0x1b5   : > { %2302 = vmatprep.subr.bf16.mxu0 %v7214_v42  ;;  %v7339_v42 = vld [vmem:[#allocation6 + $0x200] ss:$48 sps:$4 sm:$0xff]  }
 0x1b7   : > { %6268 = vmatmul.mubr.msk.bf16.vlgmr.msra.gmra.mrb[0].mxu0 %vm8905_vm5, %v8551_v12  ;;  %v7305_v12 = vld [vmem:[#allocation6 + $0x5a0] ss:$48 sps:$4 sm:$0xff]  }
 0x1b8   : > { %2303 = vmatpush1.bf16.msra.mxu0 %v7212_v43  ;;  %2247 = vmatpush1.bf16.msra.mxu1 %v7305_v12  ;;  %v7344_v43 = vld [vmem:[#allocation6 + $0x24c] ss:$48 sps:$4 sm:$0xff]  }
 0x1b9   : > { %2304 = vmatprep.subr.bf16.mxu0 %v7220_v44  ;;  %2259 = vmatprep.subr.bf16.mxu1 %v7308_v13  ;;  %v7347_v44 = vld [vmem:[#allocation6 + $0x264] ss:$48 sps:$4 sm:$0xff]   ;;  %v7392_v12 = vld [vmem:[#allocation6 + $0x54c] ss:$48 sps:$4 sm:$0xff]  }
 0x1ba   : > { %v7395_v13 = vld [vmem:[#allocation6 + $0x564] ss:$48 sps:$4 sm:$0xff]  }
 0x1bc   : > { %2305 = vmatpush1.bf16.msra.mxu0 %v7218_v45  ;;  %v7342_v45 = vld [vmem:[#allocation6 + $0x248] ss:$48 sps:$4 sm:$0xff]  }
 0x1bd   : > { %2306 = vmatprep.subr.bf16.mxu0 %v7226_v46  ;;  %v7345_v46 = vld [vmem:[#allocation6 + $0x260] ss:$48 sps:$4 sm:$0xff]  }
 0x1c0   : > { %2307 = vmatpush1.bf16.msra.mxu0 %v7224_v47  ;;  %v7350_v47 = vld [vmem:[#allocation6 + $0x2ac] ss:$48 sps:$4 sm:$0xff]  }
 0x1c1   : > { %2308 = vmatprep.subr.bf16.mxu0 %v7232_v48  ;;  %v7353_v48 = vld [vmem:[#allocation6 + $0x2c4] ss:$48 sps:$4 sm:$0xff]  }
 0x1c4   : > { %2309 = vmatpush1.bf16.msra.mxu0 %v7230_v49  ;;  %v7348_v49 = vld [vmem:[#allocation6 + $0x2a8] ss:$48 sps:$4 sm:$0xff]  }
 0x1c5   : > { %2310 = vmatprep.subr.bf16.mxu0 %v7238_v50  ;;  %v7351_v50 = vld [vmem:[#allocation6 + $0x2c0] ss:$48 sps:$4 sm:$0xff]  }
 0x1c8   : > { %2311 = vmatpush1.bf16.msra.mxu0 %v7236_v51  ;;  %v7356_v51 = vld [vmem:[#allocation6 + $0x30c] ss:$48 sps:$4 sm:$0xff]  }
 0x1c9   : > { %2312 = vmatprep.subr.bf16.mxu0 %v7244_v52  ;;  %v7359_v52 = vld [vmem:[#allocation6 + $0x324] ss:$48 sps:$4 sm:$0xff]  }
 0x1cc   : > { %2313 = vmatpush1.bf16.msra.mxu0 %v7242_v53  ;;  %v7354_v53 = vld [vmem:[#allocation6 + $0x308] ss:$48 sps:$4 sm:$0xff]  }
 0x1cd   : > { %2314 = vmatprep.subr.bf16.mxu0 %v7250_v54  ;;  %v7357_v54 = vld [vmem:[#allocation6 + $0x320] ss:$48 sps:$4 sm:$0xff]  }
 0x1d0   : > { %2315 = vmatpush1.bf16.msra.mxu0 %v7248_v55  ;;  %v7362_v55 = vld [vmem:[#allocation6 + $0x36c] ss:$48 sps:$4 sm:$0xff]  }
 0x1d1   : > { %2316 = vmatprep.subr.bf16.mxu0 %v7256_v56  ;;  %v7365_v56 = vld [vmem:[#allocation6 + $0x384] ss:$48 sps:$4 sm:$0xff]  }
 0x1d4   : > { %2317 = vmatpush1.bf16.msra.mxu0 %v7254_v57  ;;  %v7360_v57 = vld [vmem:[#allocation6 + $0x368] ss:$48 sps:$4 sm:$0xff]  }
 0x1d5   : > { %2318 = vmatprep.subr.bf16.mxu0 %v7262_v58  ;;  %v7363_v58 = vld [vmem:[#allocation6 + $0x380] ss:$48 sps:$4 sm:$0xff]  }
 0x1d8   : > { %2319 = vmatpush1.bf16.msra.mxu0 %v7260_v59  ;;  %v7368_v59 = vld [vmem:[#allocation6 + $0x3cc] ss:$48 sps:$4 sm:$0xff]  }
 0x1d9   : > { %2320 = vmatprep.subr.bf16.mxu0 %v7268_v60  ;;  %v7371_v60 = vld [vmem:[#allocation6 + $0x3e4] ss:$48 sps:$4 sm:$0xff]  }
 0x1dc   : > { %2321 = vmatpush1.bf16.msra.mxu0 %v7266_v61  ;;  %v7366_v61 = vld [vmem:[#allocation6 + $0x3c8] ss:$48 sps:$4 sm:$0xff]  }
 0x1dd   : > { %2322 = vmatprep.subr.bf16.mxu0 %v7274_v63  ;;  %v7369_v63 = vld [vmem:[#allocation6 + $0x3e0] ss:$48 sps:$4 sm:$0xff]  }
 0x1e0   : > { %2323 = vmatpush1.bf16.msra.mxu0 %v7272_v0  ;;  %v7374_v0 = vld [vmem:[#allocation6 + $0x42c] ss:$48 sps:$4 sm:$0xff]  }
 0x1e1   : > { %2324 = vmatprep.subr.bf16.mxu0 %v7280_v1  ;;  %v7377_v1 = vld [vmem:[#allocation6 + $0x444] ss:$48 sps:$4 sm:$0xff]  }
 0x1e4   : > { %2325 = vmatpush1.bf16.msra.mxu0 %v7278_v2  ;;  %v7372_v2 = vld [vmem:[#allocation6 + $0x428] ss:$48 sps:$4 sm:$0xff]  }
 0x1e5   : > { %2326 = vmatprep.subr.bf16.mxu0 %v7286_v3  ;;  %v7375_v3 = vld [vmem:[#allocation6 + $0x440] ss:$48 sps:$4 sm:$0xff]  }
 0x1e8   : > { %2327 = vmatpush1.bf16.msra.mxu0 %v7284_v4  ;;  %v7380_v4 = vld [vmem:[#allocation6 + $0x48c] ss:$48 sps:$4 sm:$0xff]  }
 0x1e9   : > { %2328 = vmatprep.subr.bf16.mxu0 %v7292_v5  ;;  %v7383_v5 = vld [vmem:[#allocation6 + $0x4a4] ss:$48 sps:$4 sm:$0xff]  }
 0x1ec   : > { %2329 = vmatpush1.bf16.msra.mxu0 %v7290_v6  ;;  %v7378_v6 = vld [vmem:[#allocation6 + $0x488] ss:$48 sps:$4 sm:$0xff]  }
 0x1ed   : > { %2330 = vmatprep.subr.bf16.mxu0 %v7298_v7  ;;  %v7381_v7 = vld [vmem:[#allocation6 + $0x4a0] ss:$48 sps:$4 sm:$0xff]  }
 0x1f0   : > { %2331 = vmatpush1.bf16.msra.mxu0 %v7296_v8  ;;  %v7386_v8 = vld [vmem:[#allocation6 + $0x4ec] ss:$48 sps:$4 sm:$0xff]  }
 0x1f1   : > { %2332 = vmatprep.subr.bf16.mxu0 %v7304_v10  ;;  %v7384_v10 = vld [vmem:[#allocation6 + $0x4e8] ss:$48 sps:$4 sm:$0xff]  }
 0x1f4   : > { %2333 = vmatpush1.bf16.msra.mxu0 %v7302_v11  ;;  %v7387_v11 = vld [vmem:[#allocation6 + $0x500] ss:$48 sps:$4 sm:$0xff]  }
 0x1f5   : > { %2388 = vmatprep.subr.bf16.mxu0 %v7311_v14  ;;  %v7390_v14 = vld [vmem:[#allocation6 + $0x548] ss:$48 sps:$4 sm:$0xff]  }
 0x28a   : > { %v981_v15 = vpop.f32.mrb[0].mxu0 }
 0x28b   : > { %v983_v16 = vpop.f32.mrb[1].mxu0 }
 0x28c   : > { %v985_v17 = vpop.f32.mrb[2].mxu0 }
 0x28d   : > { %v8915_v18 = vpack.c.bf16 %v985_v17, %v981_v15  ;;  %v987_v19 = vpop.f32.mrb[3].mxu0  ;;  %v7393_v15 = vld [vmem:[#allocation6 + $0x560] ss:$48 sps:$4 sm:$0xff]   ;;  %v7401_v17 = vld [vmem:[#allocation6 + $0x5c4] ss:$48 sps:$4 sm:$0xff]  }
 0x28e   : > { %v8917_v20 = vpack.c.bf16 %v987_v19, %v983_v16  ;;  %v7398_v16 = vld [vmem:[#allocation6 + $0x5ac] ss:$48 sps:$4 sm:$0xff]   ;;  %v7396_v19 = vld [vmem:[#allocation6 + $0x5a8] ss:$48 sps:$4 sm:$0xff]  }
 0x290   : > { %2248 = vmatprep.mubr.bf16.mxu1 %v8917_v20  ;;  %2334 = vmatprep.mubr.bf16.mxu0 %v8917_v20 }
 0x291   : > { %2249 = vmatmul.mubr.bf16.vlgmr.msra.gmra.mrb[0].mxu1 %v8915_v18  ;;  %2335 = vmatmul.mubr.bf16.vlgmr.msra.gmra.mrb[4].mxu0 %v8915_v18 }
 0x292   : > { %2260 = vmatpush1.bf16.msra.mxu1 %v7306_v21  ;;  %2389 = vmatpush1.bf16.msra.mxu0 %v7309_v22  ;;  %v7399_v21 = vld [vmem:[#allocation6 + $0x5c0] ss:$48 sps:$4 sm:$0xff]   ;;  %v7404_v22 = vld [vmem:[#allocation6 + $0x1c] ss:$48 sps:$4 sm:$0xff]  }
 0x293   : > { %2291 = vmatprep.mubr.bf16.mxu1 %v8917_v20  ;;  %2420 = vmatprep.mubr.bf16.mxu0 %v8917_v20 }
 0x294   : > { %2261 = vmatprep.subr.bf16.mxu1 %v7314_v23  ;;  %2390 = vmatprep.subr.bf16.mxu0 %v7317_v24  ;;  %v7407_v23 = vld [vmem:[#allocation8 + $0x14] ss:$48 sps:$4 sm:$0xff]   ;;  %v991_v24 = vld [vmem:[%s9318_s3 + $0x8] sm:$0xff] }
 0x296   : > { %2262 = vmatpush1.bf16.msra.mxu1 %v7312_v25  ;;  %2391 = vmatpush1.bf16.msra.mxu0 %v7315_v26  ;;  %v995_v25 = vld [vmem:[%s9318_s3 + $0x28] sm:$0xff] }
 0x297   : > { %2263 = vmatprep.subr.bf16.mxu1 %v7320_v27  ;;  %2392 = vmatprep.subr.bf16.mxu0 %v7323_v28  ;;  %v7402_v26 = vld [vmem:[#allocation6 + $0x18] ss:$48 sps:$4 sm:$0xff]   ;;  %v7405_v27 = vld [vmem:[#allocation8 + $0x10] ss:$48 sps:$4 sm:$0xff]   ;;  %v7410_v28 = vld [vmem:[#allocation6 + $0x7c] ss:$48 sps:$4 sm:$0xff]  }
 0x29a   : > { %2264 = vmatpush1.bf16.msra.mxu1 %v7318_v29  ;;  %2393 = vmatpush1.bf16.msra.mxu0 %v7321_v30  ;;  %v7413_v29 = vld [vmem:[#allocation8 + $0x74] ss:$48 sps:$4 sm:$0xff]   ;;  %v8931_v30 = vpack.c.bf16 %v995_v25, %v991_v24  ;;  %v7494_v24 = vld [vmem:[#allocation6 + $0x5bc] ss:$48 sps:$4 sm:$0xff]  }
 0x29b   : > { %2265 = vmatprep.subr.bf16.mxu1 %v7326_v31  ;;  %2394 = vmatprep.subr.bf16.mxu0 %v7329_v32  ;;  %v7408_v31 = vld [vmem:[#allocation6 + $0x78] ss:$48 sps:$4 sm:$0xff]   ;;  %v7411_v32 = vld [vmem:[#allocation8 + $0x70] ss:$48 sps:$4 sm:$0xff]   ;;  %v7497_v25 = vld [vmem:[#allocation8 + $0x5b4] ss:$48 sps:$4 sm:$0xff]  }
 0x29e   : > { %2266 = vmatpush1.bf16.msra.mxu1 %v7324_v33  ;;  %2395 = vmatpush1.bf16.msra.mxu0 %v7327_v34  ;;  %v7416_v33 = vld [vmem:[#allocation6 + $0xdc] ss:$48 sps:$4 sm:$0xff]   ;;  %v7419_v34 = vld [vmem:[#allocation8 + $0xd4] ss:$48 sps:$4 sm:$0xff]  }
 0x29f   : > { %2267 = vmatprep.subr.bf16.mxu1 %v7332_v35  ;;  %2396 = vmatprep.subr.bf16.mxu0 %v7335_v36  ;;  %v7414_v35 = vld [vmem:[#allocation6 + $0xd8] ss:$48 sps:$4 sm:$0xff]   ;;  %v7417_v36 = vld [vmem:[#allocation8 + $0xd0] ss:$48 sps:$4 sm:$0xff]  }
 0x2a2   : > { %2268 = vmatpush1.bf16.msra.mxu1 %v7330_v37  ;;  %2397 = vmatpush1.bf16.msra.mxu0 %v7333_v38  ;;  %v7422_v37 = vld [vmem:[#allocation6 + $0x13c] ss:$48 sps:$4 sm:$0xff]   ;;  %v7425_v38 = vld [vmem:[#allocation8 + $0x134] ss:$48 sps:$4 sm:$0xff]  }
 0x2a3   : > { %2269 = vmatprep.subr.bf16.mxu1 %v7338_v39  ;;  %2398 = vmatprep.subr.bf16.mxu0 %v7341_v40  ;;  %v7420_v39 = vld [vmem:[#allocation6 + $0x138] ss:$48 sps:$4 sm:$0xff]   ;;  %v7423_v40 = vld [vmem:[#allocation8 + $0x130] ss:$48 sps:$4 sm:$0xff]  }
 0x2a6   : > { %2270 = vmatpush1.bf16.msra.mxu1 %v7336_v41  ;;  %2399 = vmatpush1.bf16.msra.mxu0 %v7339_v42  ;;  %v7428_v41 = vld [vmem:[#allocation6 + $0x19c] ss:$48 sps:$4 sm:$0xff]   ;;  %v7431_v42 = vld [vmem:[#allocation8 + $0x194] ss:$48 sps:$4 sm:$0xff]  }
 0x2a7   : > { %2271 = vmatprep.subr.bf16.mxu1 %v7344_v43  ;;  %2400 = vmatprep.subr.bf16.mxu0 %v7347_v44  ;;  %v7426_v43 = vld [vmem:[#allocation6 + $0x198] ss:$48 sps:$4 sm:$0xff]   ;;  %v7429_v44 = vld [vmem:[#allocation8 + $0x190] ss:$48 sps:$4 sm:$0xff]  }
 0x2aa   : > { %2272 = vmatpush1.bf16.msra.mxu1 %v7342_v45  ;;  %2401 = vmatpush1.bf16.msra.mxu0 %v7345_v46  ;;  %v7434_v45 = vld [vmem:[#allocation6 + $0x1fc] ss:$48 sps:$4 sm:$0xff]   ;;  %v7437_v46 = vld [vmem:[#allocation8 + $0x1f4] ss:$48 sps:$4 sm:$0xff]  }
 0x2ab   : > { %2273 = vmatprep.subr.bf16.mxu1 %v7350_v47  ;;  %2402 = vmatprep.subr.bf16.mxu0 %v7353_v48  ;;  %v7432_v47 = vld [vmem:[#allocation6 + $0x1f8] ss:$48 sps:$4 sm:$0xff]   ;;  %v7435_v48 = vld [vmem:[#allocation8 + $0x1f0] ss:$48 sps:$4 sm:$0xff]  }
 0x2ae   : > { %2274 = vmatpush1.bf16.msra.mxu1 %v7348_v49  ;;  %2403 = vmatpush1.bf16.msra.mxu0 %v7351_v50  ;;  %v7440_v49 = vld [vmem:[#allocation6 + $0x25c] ss:$48 sps:$4 sm:$0xff]   ;;  %v7443_v50 = vld [vmem:[#allocation8 + $0x254] ss:$48 sps:$4 sm:$0xff]  }
 0x2af   : > { %2275 = vmatprep.subr.bf16.mxu1 %v7356_v51  ;;  %2404 = vmatprep.subr.bf16.mxu0 %v7359_v52  ;;  %v7438_v51 = vld [vmem:[#allocation6 + $0x258] ss:$48 sps:$4 sm:$0xff]   ;;  %v7441_v52 = vld [vmem:[#allocation8 + $0x250] ss:$48 sps:$4 sm:$0xff]  }
 0x2b2   : > { %2276 = vmatpush1.bf16.msra.mxu1 %v7354_v53  ;;  %2405 = vmatpush1.bf16.msra.mxu0 %v7357_v54  ;;  %v7446_v53 = vld [vmem:[#allocation6 + $0x2bc] ss:$48 sps:$4 sm:$0xff]   ;;  %v7449_v54 = vld [vmem:[#allocation8 + $0x2b4] ss:$48 sps:$4 sm:$0xff]  }
 0x2b3   : > { %2277 = vmatprep.subr.bf16.mxu1 %v7362_v55  ;;  %2406 = vmatprep.subr.bf16.mxu0 %v7365_v56  ;;  %v7444_v55 = vld [vmem:[#allocation6 + $0x2b8] ss:$48 sps:$4 sm:$0xff]   ;;  %v7447_v56 = vld [vmem:[#allocation8 + $0x2b0] ss:$48 sps:$4 sm:$0xff]  }
 0x2b6   : > { %2278 = vmatpush1.bf16.msra.mxu1 %v7360_v57  ;;  %2407 = vmatpush1.bf16.msra.mxu0 %v7363_v58  ;;  %v7452_v57 = vld [vmem:[#allocation6 + $0x31c] ss:$48 sps:$4 sm:$0xff]   ;;  %v7455_v58 = vld [vmem:[#allocation8 + $0x314] ss:$48 sps:$4 sm:$0xff]  }
 0x2b7   : > { %2279 = vmatprep.subr.bf16.mxu1 %v7368_v59  ;;  %2408 = vmatprep.subr.bf16.mxu0 %v7371_v60  ;;  %v7450_v59 = vld [vmem:[#allocation6 + $0x318] ss:$48 sps:$4 sm:$0xff]   ;;  %v7453_v60 = vld [vmem:[#allocation8 + $0x310] ss:$48 sps:$4 sm:$0xff]  }
 0x2ba   : > { %2280 = vmatpush1.bf16.msra.mxu1 %v7366_v61  ;;  %2409 = vmatpush1.bf16.msra.mxu0 %v7369_v63  ;;  %v7458_v61 = vld [vmem:[#allocation6 + $0x37c] ss:$48 sps:$4 sm:$0xff]   ;;  %v7461_v63 = vld [vmem:[#allocation8 + $0x374] ss:$48 sps:$4 sm:$0xff]  }
 0x2bb   : > { %2281 = vmatprep.subr.bf16.mxu1 %v7374_v0  ;;  %2410 = vmatprep.subr.bf16.mxu0 %v7377_v1  ;;  %v7456_v0 = vld [vmem:[#allocation6 + $0x378] ss:$48 sps:$4 sm:$0xff]   ;;  %v7459_v1 = vld [vmem:[#allocation8 + $0x370] ss:$48 sps:$4 sm:$0xff]  }
 0x2be   : > { %2282 = vmatpush1.bf16.msra.mxu1 %v7372_v2  ;;  %2411 = vmatpush1.bf16.msra.mxu0 %v7375_v3  ;;  %v7464_v2 = vld [vmem:[#allocation6 + $0x3dc] ss:$48 sps:$4 sm:$0xff]   ;;  %v7467_v3 = vld [vmem:[#allocation8 + $0x3d4] ss:$48 sps:$4 sm:$0xff]  }
 0x2bf   : > { %2283 = vmatprep.subr.bf16.mxu1 %v7380_v4  ;;  %2412 = vmatprep.subr.bf16.mxu0 %v7383_v5  ;;  %v7462_v4 = vld [vmem:[#allocation6 + $0x3d8] ss:$48 sps:$4 sm:$0xff]   ;;  %v7465_v5 = vld [vmem:[#allocation8 + $0x3d0] ss:$48 sps:$4 sm:$0xff]  }
 0x2c2   : > { %2284 = vmatpush1.bf16.msra.mxu1 %v7378_v6  ;;  %2413 = vmatpush1.bf16.msra.mxu0 %v7381_v7  ;;  %v7470_v6 = vld [vmem:[#allocation6 + $0x43c] ss:$48 sps:$4 sm:$0xff]   ;;  %v7473_v7 = vld [vmem:[#allocation8 + $0x434] ss:$48 sps:$4 sm:$0xff]  }
 0x2c3   : > { %2285 = vmatprep.subr.bf16.mxu1 %v7386_v8  ;;  %2414 = vmatprep.subr.bf16.mxu0 %v7389_v9  ;;  %v7468_v8 = vld [vmem:[#allocation6 + $0x438] ss:$48 sps:$4 sm:$0xff]   ;;  %v7471_v9 = vld [vmem:[#allocation8 + $0x430] ss:$48 sps:$4 sm:$0xff]  }
 0x2c6   : > { %2286 = vmatpush1.bf16.msra.mxu1 %v7384_v10  ;;  %2415 = vmatpush1.bf16.msra.mxu0 %v7387_v11  ;;  %v7476_v10 = vld [vmem:[#allocation6 + $0x49c] ss:$48 sps:$4 sm:$0xff]   ;;  %v7479_v11 = vld [vmem:[#allocation8 + $0x494] ss:$48 sps:$4 sm:$0xff]  }
 0x2c7   : > { %2287 = vmatprep.subr.bf16.mxu1 %v7392_v12  ;;  %2416 = vmatprep.subr.bf16.mxu0 %v7395_v13  ;;  %v7474_v12 = vld [vmem:[#allocation6 + $0x498] ss:$48 sps:$4 sm:$0xff]   ;;  %v7477_v13 = vld [vmem:[#allocation8 + $0x490] ss:$48 sps:$4 sm:$0xff]  }
 0x2ca   : > { %2288 = vmatpush1.bf16.msra.mxu1 %v7390_v14  ;;  %2417 = vmatpush1.bf16.msra.mxu0 %v7393_v15  ;;  %v7482_v14 = vld [vmem:[#allocation6 + $0x4fc] ss:$48 sps:$4 sm:$0xff]   ;;  %v7485_v15 = vld [vmem:[#allocation8 + $0x4f4] ss:$48 sps:$4 sm:$0xff]  }
 0x2cb   : > { %2289 = vmatprep.subr.bf16.mxu1 %v7398_v16  ;;  %2418 = vmatprep.subr.bf16.mxu0 %v7401_v17  ;;  %v7480_v16 = vld [vmem:[#allocation6 + $0x4f8] ss:$48 sps:$4 sm:$0xff]   ;;  %v7483_v17 = vld [vmem:[#allocation8 + $0x4f0] ss:$48 sps:$4 sm:$0xff]  }
 0x2ce   : > { %2290 = vmatpush1.bf16.msra.mxu1 %v7396_v19  ;;  %2419 = vmatpush1.bf16.msra.mxu0 %v7399_v21  ;;  %v7488_v19 = vld [vmem:[#allocation6 + $0x55c] ss:$48 sps:$4 sm:$0xff]   ;;  %v7491_v21 = vld [vmem:[#allocation8 + $0x554] ss:$48 sps:$4 sm:$0xff]  }
 0x2cf   : > { %2345 = vmatprep.subr.bf16.mxu1 %v7404_v22  ;;  %4954 = vmatprep.subr.bf16.mxu0 %v7407_v23  ;;  %v7486_v22 = vld [vmem:[#allocation6 + $0x558] ss:$48 sps:$4 sm:$0xff]   ;;  %v7489_v23 = vld [vmem:[#allocation8 + $0x550] ss:$48 sps:$4 sm:$0xff]  }
 0x2d1   : > { %2292 = vmatmul.mubr.bf16.vlgmr.msra.gmra.mrb[4].mxu1 %v8915_v18  ;;  %2421 = vmatmul.mubr.bf16.vlgmr.msra.gmra.mrb[8].mxu0 %v8915_v18 }
 0x2d2   : > { %2346 = vmatpush1.bf16.msra.mxu1 %v7402_v26  ;;  %2377 = vmatprep.mubr.bf16.mxu1 %v8917_v20  ;;  %v7492_v26 = vld [vmem:[#allocation6 + $0x5b8] ss:$48 sps:$4 sm:$0xff]  }
 0x2d3   : > { %4955 = vmatpush1.bf16.msra.mxu0 %v7405_v27  ;;  %2347 = vmatprep.subr.bf16.mxu1 %v7410_v28  ;;  %v7495_v27 = vld [vmem:[#allocation8 + $0x5b0] ss:$48 sps:$4 sm:$0xff]   ;;  %v7500_v28 = vld [vmem:[#allocation6 + $0x2c] ss:$48 sps:$4 sm:$0xff]  }
 0x2d4   : > { %4956 = vmatprep.subr.bf16.mxu0 %v7413_v29  ;;  %4986 = vmatprep.mubr.bf16.mxu0 %v8931_v30  ;;  %v7503_v29 = vld [vmem:[#allocation8 + $0x614] ss:$48 sps:$4 sm:$0xff]  }
 0x2d6   : > { %2348 = vmatpush1.bf16.msra.mxu1 %v7408_v31  ;;  %v990_v31 = vld [vmem:[%s9318_s3] sm:$0xff] }
 0x2d7   : > { %4957 = vmatpush1.bf16.msra.mxu0 %v7411_v32  ;;  %2349 = vmatprep.subr.bf16.mxu1 %v7416_v33  ;;  %v994_v32 = vld [vmem:[%s9318_s3 + $0x20] sm:$0xff]  ;;  %v993_v33 = vld [vmem:[%s9318_s3 + $0x18] sm:$0xff] }
 0x2d8   : > { %4958 = vmatprep.subr.bf16.mxu0 %v7419_v34  ;;  %v997_v34 = vld [vmem:[%s9318_s3 + $0x38] sm:$0xff] }
 0x2da   : > { %2350 = vmatpush1.bf16.msra.mxu1 %v7414_v35  ;;  %v7498_v35 = vld [vmem:[#allocation6 + $0x28] ss:$48 sps:$4 sm:$0xff]  }
 0x2db   : > { %4959 = vmatpush1.bf16.msra.mxu0 %v7417_v36  ;;  %2351 = vmatprep.subr.bf16.mxu1 %v7422_v37  ;;  %v8949_v36 = vpack.c.bf16 %v994_v32, %v990_v31  ;;  %v7506_v37 = vld [vmem:[#allocation6 + $0x8c] ss:$48 sps:$4 sm:$0xff]   ;;  %v7587_v31 = vld [vmem:[#allocation8 + $0xb54] ss:$48 sps:$4 sm:$0xff]   ;;  %v7582_v32 = vld [vmem:[#allocation6 + $0x568] ss:$48 sps:$4 sm:$0xff]  }
 0x2dc   : > { %4960 = vmatprep.subr.bf16.mxu0 %v7425_v38  ;;  %v7501_v38 = vld [vmem:[#allocation8 + $0x610] ss:$48 sps:$4 sm:$0xff]  }
 0x2de   : > { %2352 = vmatpush1.bf16.msra.mxu1 %v7420_v39  ;;  %v8951_v39 = vpack.c.bf16 %v997_v34, %v993_v33  ;;  %v7590_v33 = vld [vmem:[#allocation6 + $0x5cc] ss:$48 sps:$4 sm:$0xff]   ;;  %v7585_v34 = vld [vmem:[#allocation8 + $0xb50] ss:$48 sps:$4 sm:$0xff]  }
 0x2df   : > { %4961 = vmatpush1.bf16.msra.mxu0 %v7423_v40  ;;  %2353 = vmatprep.subr.bf16.mxu1 %v7428_v41  ;;  %v7509_v40 = vld [vmem:[#allocation8 + $0x674] ss:$48 sps:$4 sm:$0xff]   ;;  %v7504_v41 = vld [vmem:[#allocation6 + $0x88] ss:$48 sps:$4 sm:$0xff]  }
 0x2e0   : > { %4962 = vmatprep.subr.bf16.mxu0 %v7431_v42  ;;  %v7512_v42 = vld [vmem:[#allocation6 + $0xec] ss:$48 sps:$4 sm:$0xff]  }
 0x2e2   : > { %2354 = vmatpush1.bf16.msra.mxu1 %v7426_v43  ;;  %v7507_v43 = vld [vmem:[#allocation8 + $0x670] ss:$48 sps:$4 sm:$0xff]  }
 0x2e3   : > { %4963 = vmatpush1.bf16.msra.mxu0 %v7429_v44  ;;  %2355 = vmatprep.subr.bf16.mxu1 %v7434_v45  ;;  %v7515_v44 = vld [vmem:[#allocation8 + $0x6d4] ss:$48 sps:$4 sm:$0xff]   ;;  %v7510_v45 = vld [vmem:[#allocation6 + $0xe8] ss:$48 sps:$4 sm:$0xff]  }
 0x2e4   : > { %4964 = vmatprep.subr.bf16.mxu0 %v7437_v46  ;;  %v7518_v46 = vld [vmem:[#allocation6 + $0x14c] ss:$48 sps:$4 sm:$0xff]  }
 0x2e6   : > { %2356 = vmatpush1.bf16.msra.mxu1 %v7432_v47  ;;  %v7513_v47 = vld [vmem:[#allocation8 + $0x6d0] ss:$48 sps:$4 sm:$0xff]  }
 0x2e7   : > { %4965 = vmatpush1.bf16.msra.mxu0 %v7435_v48  ;;  %2357 = vmatprep.subr.bf16.mxu1 %v7440_v49  ;;  %v7521_v48 = vld [vmem:[#allocation8 + $0x734] ss:$48 sps:$4 sm:$0xff]   ;;  %v7524_v49 = vld [vmem:[#allocation6 + $0x1ac] ss:$48 sps:$4 sm:$0xff]  }
 0x2e8   : > { %4966 = vmatprep.subr.bf16.mxu0 %v7443_v50  ;;  %v7519_v50 = vld [vmem:[#allocation8 + $0x730] ss:$48 sps:$4 sm:$0xff]  }
 0x2ea   : > { %2358 = vmatpush1.bf16.msra.mxu1 %v7438_v51  ;;  %v7527_v51 = vld [vmem:[#allocation8 + $0x794] ss:$48 sps:$4 sm:$0xff]  }
 0x2eb   : > { %4967 = vmatpush1.bf16.msra.mxu0 %v7441_v52  ;;  %2359 = vmatprep.subr.bf16.mxu1 %v7446_v53  ;;  %v7522_v52 = vld [vmem:[#allocation6 + $0x1a8] ss:$48 sps:$4 sm:$0xff]   ;;  %v7530_v53 = vld [vmem:[#allocation6 + $0x20c] ss:$48 sps:$4 sm:$0xff]  }
 0x2ec   : > { %4968 = vmatprep.subr.bf16.mxu0 %v7449_v54  ;;  %v7525_v54 = vld [vmem:[#allocation8 + $0x790] ss:$48 sps:$4 sm:$0xff]  }
 0x2ee   : > { %2360 = vmatpush1.bf16.msra.mxu1 %v7444_v55  ;;  %v7533_v55 = vld [vmem:[#allocation8 + $0x7f4] ss:$48 sps:$4 sm:$0xff]  }
 0x2ef   : > { %4969 = vmatpush1.bf16.msra.mxu0 %v7447_v56  ;;  %2361 = vmatprep.subr.bf16.mxu1 %v7452_v57  ;;  %v7528_v56 = vld [vmem:[#allocation6 + $0x208] ss:$48 sps:$4 sm:$0xff]   ;;  %v7536_v57 = vld [vmem:[#allocation6 + $0x26c] ss:$48 sps:$4 sm:$0xff]  }
 0x2f0   : > { %4970 = vmatprep.subr.bf16.mxu0 %v7455_v58  ;;  %v7531_v58 = vld [vmem:[#allocation8 + $0x7f0] ss:$48 sps:$4 sm:$0xff]  }
 0x2f2   : > { %2362 = vmatpush1.bf16.msra.mxu1 %v7450_v59  ;;  %v7539_v59 = vld [vmem:[#allocation8 + $0x854] ss:$48 sps:$4 sm:$0xff]  }
 0x2f3   : > { %4971 = vmatpush1.bf16.msra.mxu0 %v7453_v60  ;;  %2363 = vmatprep.subr.bf16.mxu1 %v7458_v61  ;;  %v7534_v60 = vld [vmem:[#allocation6 + $0x268] ss:$48 sps:$4 sm:$0xff]   ;;  %v7542_v61 = vld [vmem:[#allocation6 + $0x2cc] ss:$48 sps:$4 sm:$0xff]  }
 0x2f4   : > { %4972 = vmatprep.subr.bf16.mxu0 %v7461_v63  ;;  %v7537_v63 = vld [vmem:[#allocation8 + $0x850] ss:$48 sps:$4 sm:$0xff]  }
 0x2f6   : > { %2364 = vmatpush1.bf16.msra.mxu1 %v7456_v0  ;;  %v7545_v0 = vld [vmem:[#allocation8 + $0x8b4] ss:$48 sps:$4 sm:$0xff]  }
 0x2f7   : > { %4973 = vmatpush1.bf16.msra.mxu0 %v7459_v1  ;;  %2365 = vmatprep.subr.bf16.mxu1 %v7464_v2  ;;  %v7540_v1 = vld [vmem:[#allocation6 + $0x2c8] ss:$48 sps:$4 sm:$0xff]   ;;  %v7548_v2 = vld [vmem:[#allocation6 + $0x32c] ss:$48 sps:$4 sm:$0xff]  }
 0x2f8   : > { %4974 = vmatprep.subr.bf16.mxu0 %v7467_v3  ;;  %v7543_v3 = vld [vmem:[#allocation8 + $0x8b0] ss:$48 sps:$4 sm:$0xff]  }
 0x2fa   : > { %2366 = vmatpush1.bf16.msra.mxu1 %v7462_v4  ;;  %v7551_v4 = vld [vmem:[#allocation8 + $0x914] ss:$48 sps:$4 sm:$0xff]  }
 0x2fb   : > { %4975 = vmatpush1.bf16.msra.mxu0 %v7465_v5  ;;  %2367 = vmatprep.subr.bf16.mxu1 %v7470_v6  ;;  %v7546_v5 = vld [vmem:[#allocation6 + $0x328] ss:$48 sps:$4 sm:$0xff]   ;;  %v7554_v6 = vld [vmem:[#allocation6 + $0x38c] ss:$48 sps:$4 sm:$0xff]  }
 0x2fc   : > { %4976 = vmatprep.subr.bf16.mxu0 %v7473_v7  ;;  %v7549_v7 = vld [vmem:[#allocation8 + $0x910] ss:$48 sps:$4 sm:$0xff]  }
 0x2fe   : > { %2368 = vmatpush1.bf16.msra.mxu1 %v7468_v8  ;;  %v7557_v8 = vld [vmem:[#allocation8 + $0x974] ss:$48 sps:$4 sm:$0xff]  }
 0x2ff   : > { %4977 = vmatpush1.bf16.msra.mxu0 %v7471_v9  ;;  %2369 = vmatprep.subr.bf16.mxu1 %v7476_v10  ;;  %v7552_v9 = vld [vmem:[#allocation6 + $0x388] ss:$48 sps:$4 sm:$0xff]   ;;  %v7560_v10 = vld [vmem:[#allocation6 + $0x3ec] ss:$48 sps:$4 sm:$0xff]  }
 0x300   : > { %4978 = vmatprep.subr.bf16.mxu0 %v7479_v11  ;;  %v7555_v11 = vld [vmem:[#allocation8 + $0x970] ss:$48 sps:$4 sm:$0xff]  }
 0x302   : > { %2370 = vmatpush1.bf16.msra.mxu1 %v7474_v12  ;;  %v7563_v12 = vld [vmem:[#allocation8 + $0x9d4] ss:$48 sps:$4 sm:$0xff]  }
 0x303   : > { %4979 = vmatpush1.bf16.msra.mxu0 %v7477_v13  ;;  %2371 = vmatprep.subr.bf16.mxu1 %v7482_v14  ;;  %v7558_v13 = vld [vmem:[#allocation6 + $0x3e8] ss:$48 sps:$4 sm:$0xff]   ;;  %v7566_v14 = vld [vmem:[#allocation6 + $0x44c] ss:$48 sps:$4 sm:$0xff]  }
 0x304   : > { %4980 = vmatprep.subr.bf16.mxu0 %v7485_v15  ;;  %v7561_v15 = vld [vmem:[#allocation8 + $0x9d0] ss:$48 sps:$4 sm:$0xff]  }
 0x306   : > { %2372 = vmatpush1.bf16.msra.mxu1 %v7480_v16  ;;  %v7569_v16 = vld [vmem:[#allocation8 + $0xa34] ss:$48 sps:$4 sm:$0xff]  }
 0x307   : > { %4981 = vmatpush1.bf16.msra.mxu0 %v7483_v17  ;;  %2373 = vmatprep.subr.bf16.mxu1 %v7488_v19  ;;  %v7564_v17 = vld [vmem:[#allocation6 + $0x448] ss:$48 sps:$4 sm:$0xff]   ;;  %v7572_v19 = vld [vmem:[#allocation6 + $0x4ac] ss:$48 sps:$4 sm:$0xff]  }
 0x308   : > { %4982 = vmatprep.subr.bf16.mxu0 %v7491_v21  ;;  %v7567_v21 = vld [vmem:[#allocation8 + $0xa30] ss:$48 sps:$4 sm:$0xff]  }
 0x30a   : > { %2374 = vmatpush1.bf16.msra.mxu1 %v7486_v22  ;;  %v7575_v22 = vld [vmem:[#allocation8 + $0xa94] ss:$48 sps:$4 sm:$0xff]  }
 0x30b   : > { %4983 = vmatpush1.bf16.msra.mxu0 %v7489_v23  ;;  %2375 = vmatprep.subr.bf16.mxu1 %v7494_v24  ;;  %v7570_v23 = vld [vmem:[#allocation6 + $0x4a8] ss:$48 sps:$4 sm:$0xff]   ;;  %v7578_v24 = vld [vmem:[#allocation6 + $0x50c] ss:$48 sps:$4 sm:$0xff]  }
 0x30c   : > { %4984 = vmatprep.subr.bf16.mxu0 %v7497_v25  ;;  %v7573_v25 = vld [vmem:[#allocation8 + $0xa90] ss:$48 sps:$4 sm:$0xff]  }
 0x30e   : > { %2376 = vmatpush1.bf16.msra.mxu1 %v7492_v26  ;;  %v7581_v26 = vld [vmem:[#allocation8 + $0xaf4] ss:$48 sps:$4 sm:$0xff]  }
 0x30f   : > { %4985 = vmatpush1.bf16.msra.mxu0 %v7495_v27  ;;  %2431 = vmatprep.subr.bf16.mxu1 %v7500_v28  ;;  %v7576_v27 = vld [vmem:[#allocation6 + $0x508] ss:$48 sps:$4 sm:$0xff]   ;;  %v7584_v28 = vld [vmem:[#allocation6 + $0x56c] ss:$48 sps:$4 sm:$0xff]  }
 0x310   : > { %4997 = vmatprep.subr.bf16.mxu0 %v7503_v29  ;;  %v7579_v29 = vld [vmem:[#allocation8 + $0xaf0] ss:$48 sps:$4 sm:$0xff]  }
 0x311   : > { %2378 = vmatmul.mubr.bf16.vlgmr.msra.gmra.mrb[8].mxu1 %v8915_v18 }
 0x312   : > { %2432 = vmatpush1.bf16.msra.mxu1 %v7498_v35  ;;  %2463 = vmatprep.mubr.bf16.mxu1 %v8917_v20  ;;  %v7516_v20 = vld [vmem:[#allocation6 + $0x148] ss:$48 sps:$4 sm:$0xff]   ;;  %v7593_v35 = vld [vmem:[#allocation8 + $0xbb4] ss:$48 sps:$4 sm:$0xff]  }
 0x313   : > { %4987 = vmatmul.mubr.bf16.vlgmr.msra.gmra.mrb[4].mxu0 %v8949_v36  ;;  %2433 = vmatprep.subr.bf16.mxu1 %v7506_v37  ;;  %v7588_v37 = vld [vmem:[#allocation6 + $0x5c8] ss:$48 sps:$4 sm:$0xff]  }
 0x314   : > { %4998 = vmatpush1.bf16.msra.mxu0 %v7501_v38  ;;  %5029 = vmatprep.mubr.bf16.mxu0 %v8951_v39  ;;  %v7596_v38 = vld [vmem:[#allocation8 + $0x4] ss:$48 sps:$4 sm:$0xff]  }
 0x315   : > { %4999 = vmatprep.subr.bf16.mxu0 %v7509_v40  ;;  %v7591_v40 = vld [vmem:[#allocation8 + $0xbb0] ss:$48 sps:$4 sm:$0xff]  }
 0x316   : > { %2434 = vmatpush1.bf16.msra.mxu1 %v7504_v41  ;;  %v992_v41 = vld [vmem:[%s9318_s3 + $0x10] sm:$0xff] }
 0x317   : > { %2435 = vmatprep.subr.bf16.mxu1 %v7512_v42  ;;  %v996_v42 = vld [vmem:[%s9318_s3 + $0x30] sm:$0xff] }
 0x318   : > { %5000 = vmatpush1.bf16.msra.mxu0 %v7507_v43  ;;  %v7617_v43 = vld [vmem:[#allocation8 + $0x24] ss:$48 sps:$4 sm:$0xff]  }
 0x319   : > { %5001 = vmatprep.subr.bf16.mxu0 %v7515_v44  ;;  %v7594_v44 = vld [vmem:[#allocation8] ss:$48 sps:$4 sm:$0xff]  }
 0x31a   : > { %2436 = vmatpush1.bf16.msra.mxu1 %v7510_v45  ;;  %v8963_v45 = vpack.c.bf16 %v996_v42, %v992_v41  ;;  %v7660_v41 = vld [vmem:[#allocation8 + $0x540] ss:$48 sps:$4 sm:$0xff]   ;;  %v7668_v42 = vld [vmem:[#allocation8 + $0x5a4] ss:$48 sps:$4 sm:$0xff]  }
 0x31b   : > { %2437 = vmatprep.subr.bf16.mxu1 %v7518_v46  ;;  %v7599_v46 = vld [vmem:[#allocation8 + $0x64] ss:$48 sps:$4 sm:$0xff]  }
 0x31c   : > { %5002 = vmatpush1.bf16.msra.mxu0 %v7513_v47  ;;  %v7615_v47 = vld [vmem:[#allocation8 + $0x20] ss:$48 sps:$4 sm:$0xff]  }
 0x31d   : > { %5003 = vmatprep.subr.bf16.mxu0 %v7521_v48  ;;  %v7623_v48 = vld [vmem:[#allocation8 + $0x84] ss:$48 sps:$4 sm:$0xff]  }
 0x31e   : > { %2438 = vmatpush1.bf16.msra.mxu1 %v7516_v20  ;;  %v7597_v20 = vld [vmem:[#allocation8 + $0x60] ss:$48 sps:$4 sm:$0xff]  }
 0x31f   : > { %2439 = vmatprep.subr.bf16.mxu1 %v7524_v49  ;;  %v7602_v49 = vld [vmem:[#allocation8 + $0xc4] ss:$48 sps:$4 sm:$0xff]  }
 0x320   : > { %5004 = vmatpush1.bf16.msra.mxu0 %v7519_v50  ;;  %v7621_v50 = vld [vmem:[#allocation8 + $0x80] ss:$48 sps:$4 sm:$0xff]  }
 0x321   : > { %5005 = vmatprep.subr.bf16.mxu0 %v7527_v51  ;;  %v7629_v51 = vld [vmem:[#allocation8 + $0xe4] ss:$48 sps:$4 sm:$0xff]  }
 0x322   : > { %2440 = vmatpush1.bf16.msra.mxu1 %v7522_v52  ;;  %v7600_v52 = vld [vmem:[#allocation8 + $0xc0] ss:$48 sps:$4 sm:$0xff]  }
 0x323   : > { %2441 = vmatprep.subr.bf16.mxu1 %v7530_v53  ;;  %v7627_v53 = vld [vmem:[#allocation8 + $0xe0] ss:$48 sps:$4 sm:$0xff]  }
 0x324   : > { %5006 = vmatpush1.bf16.msra.mxu0 %v7525_v54  ;;  %v7635_v54 = vld [vmem:[#allocation8 + $0x144] ss:$48 sps:$4 sm:$0xff]  }
 0x325   : > { %5007 = vmatprep.subr.bf16.mxu0 %v7533_v55  ;;  %v7603_v55 = vld [vmem:[#allocation8 + $0x120] ss:$48 sps:$4 sm:$0xff]  }
 0x326   : > { %2442 = vmatpush1.bf16.msra.mxu1 %v7528_v56  ;;  %v7608_v56 = vld [vmem:[#allocation8 + $0x184] ss:$48 sps:$4 sm:$0xff]  }
 0x327   : > { %2443 = vmatprep.subr.bf16.mxu1 %v7536_v57  ;;  %v7633_v57 = vld [vmem:[#allocation8 + $0x140] ss:$48 sps:$4 sm:$0xff]  }
 0x328   : > { %5008 = vmatpush1.bf16.msra.mxu0 %v7531_v58  ;;  %v7641_v58 = vld [vmem:[#allocation8 + $0x1a4] ss:$48 sps:$4 sm:$0xff]  }
 0x329   : > { %5009 = vmatprep.subr.bf16.mxu0 %v7539_v59  ;;  %v7606_v59 = vld [vmem:[#allocation8 + $0x180] ss:$48 sps:$4 sm:$0xff]  }
 0x32a   : > { %2444 = vmatpush1.bf16.msra.mxu1 %v7534_v60  ;;  %v7611_v60 = vld [vmem:[#allocation8 + $0x1e4] ss:$48 sps:$4 sm:$0xff]  }
 0x32b   : > { %2445 = vmatprep.subr.bf16.mxu1 %v7542_v61  ;;  %v7639_v61 = vld [vmem:[#allocation8 + $0x1a0] ss:$48 sps:$4 sm:$0xff]  }
 0x32c   : > { %5010 = vmatpush1.bf16.msra.mxu0 %v7537_v63  ;;  %v7647_v63 = vld [vmem:[#allocation8 + $0x204] ss:$48 sps:$4 sm:$0xff]  }
 0x32d   : > { %5011 = vmatprep.subr.bf16.mxu0 %v7545_v0  ;;  %v7609_v0 = vld [vmem:[#allocation8 + $0x1e0] ss:$48 sps:$4 sm:$0xff]  }
 0x32e   : > { %2446 = vmatpush1.bf16.msra.mxu1 %v7540_v1  ;;  %v7614_v1 = vld [vmem:[#allocation8 + $0x244] ss:$48 sps:$4 sm:$0xff]  }
 0x32f   : > { %2447 = vmatprep.subr.bf16.mxu1 %v7548_v2  ;;  %v7645_v2 = vld [vmem:[#allocation8 + $0x200] ss:$48 sps:$4 sm:$0xff]  }
 0x330   : > { %5012 = vmatpush1.bf16.msra.mxu0 %v7543_v3  ;;  %v7653_v3 = vld [vmem:[#allocation8 + $0x264] ss:$48 sps:$4 sm:$0xff]  }
 0x331   : > { %5013 = vmatprep.subr.bf16.mxu0 %v7551_v4  ;;  %v7612_v4 = vld [vmem:[#allocation8 + $0x240] ss:$48 sps:$4 sm:$0xff]  }
 0x332   : > { %2448 = vmatpush1.bf16.msra.mxu1 %v7546_v5  ;;  %v7620_v5 = vld [vmem:[#allocation8 + $0x2a4] ss:$48 sps:$4 sm:$0xff]  }
 0x333   : > { %2449 = vmatprep.subr.bf16.mxu1 %v7554_v6  ;;  %v7651_v6 = vld [vmem:[#allocation8 + $0x260] ss:$48 sps:$4 sm:$0xff]  }
 0x334   : > { %5014 = vmatpush1.bf16.msra.mxu0 %v7549_v7  ;;  %v7659_v7 = vld [vmem:[#allocation8 + $0x2c4] ss:$48 sps:$4 sm:$0xff]  }
 0x335   : > { %5015 = vmatprep.subr.bf16.mxu0 %v7557_v8  ;;  %v7618_v8 = vld [vmem:[#allocation8 + $0x2a0] ss:$48 sps:$4 sm:$0xff]  }
 0x336   : > { %2450 = vmatpush1.bf16.msra.mxu1 %v7552_v9  ;;  %v7626_v9 = vld [vmem:[#allocation8 + $0x304] ss:$48 sps:$4 sm:$0xff]  }
 0x337   : > { %2451 = vmatprep.subr.bf16.mxu1 %v7560_v10  ;;  %v7657_v10 = vld [vmem:[#allocation8 + $0x2c0] ss:$48 sps:$4 sm:$0xff]  }
 0x338   : > { %5016 = vmatpush1.bf16.msra.mxu0 %v7555_v11  ;;  %v7665_v11 = vld [vmem:[#allocation8 + $0x324] ss:$48 sps:$4 sm:$0xff]  }
 0x339   : > { %5017 = vmatprep.subr.bf16.mxu0 %v7563_v12  ;;  %v7624_v12 = vld [vmem:[#allocation8 + $0x300] ss:$48 sps:$4 sm:$0xff]  }
 0x33a   : > { %2452 = vmatpush1.bf16.msra.mxu1 %v7558_v13  ;;  %v7632_v13 = vld [vmem:[#allocation8 + $0x364] ss:$48 sps:$4 sm:$0xff]  }
 0x33b   : > { %2453 = vmatprep.subr.bf16.mxu1 %v7566_v14  ;;  %v7663_v14 = vld [vmem:[#allocation8 + $0x320] ss:$48 sps:$4 sm:$0xff]  }
 0x33c   : > { %5018 = vmatpush1.bf16.msra.mxu0 %v7561_v15  ;;  %v7671_v15 = vld [vmem:[#allocation8 + $0x384] ss:$48 sps:$4 sm:$0xff]  }
 0x33d   : > { %5019 = vmatprep.subr.bf16.mxu0 %v7569_v16  ;;  %v7630_v16 = vld [vmem:[#allocation8 + $0x360] ss:$48 sps:$4 sm:$0xff]  }
 0x33e   : > { %2454 = vmatpush1.bf16.msra.mxu1 %v7564_v17  ;;  %v7638_v17 = vld [vmem:[#allocation8 + $0x3c4] ss:$48 sps:$4 sm:$0xff]  }
 0x33f   : > { %2455 = vmatprep.subr.bf16.mxu1 %v7572_v19  ;;  %v7669_v19 = vld [vmem:[#allocation8 + $0x380] ss:$48 sps:$4 sm:$0xff]  }
 0x340   : > { %5020 = vmatpush1.bf16.msra.mxu0 %v7567_v21  ;;  %v7677_v21 = vld [vmem:[#allocation8 + $0x3e4] ss:$48 sps:$4 sm:$0xff]  }
 0x341   : > { %5021 = vmatprep.subr.bf16.mxu0 %v7575_v22  ;;  %v7636_v22 = vld [vmem:[#allocation8 + $0x3c0] ss:$48 sps:$4 sm:$0xff]  }
 0x342   : > { %2456 = vmatpush1.bf16.msra.mxu1 %v7570_v23  ;;  %v7644_v23 = vld [vmem:[#allocation8 + $0x424] ss:$48 sps:$4 sm:$0xff]  }
 0x343   : > { %2457 = vmatprep.subr.bf16.mxu1 %v7578_v24  ;;  %v7675_v24 = vld [vmem:[#allocation8 + $0x3e0] ss:$48 sps:$4 sm:$0xff]  }
 0x344   : > { %5022 = vmatpush1.bf16.msra.mxu0 %v7573_v25  ;;  %v7683_v25 = vld [vmem:[#allocation8 + $0x444] ss:$48 sps:$4 sm:$0xff]  }
 0x345   : > { %5023 = vmatprep.subr.bf16.mxu0 %v7581_v26  ;;  %v7642_v26 = vld [vmem:[#allocation8 + $0x420] ss:$48 sps:$4 sm:$0xff]  }
 0x346   : > { %2458 = vmatpush1.bf16.msra.mxu1 %v7576_v27  ;;  %v7650_v27 = vld [vmem:[#allocation8 + $0x484] ss:$48 sps:$4 sm:$0xff]  }
 0x347   : > { %2459 = vmatprep.subr.bf16.mxu1 %v7584_v28  ;;  %v7681_v28 = vld [vmem:[#allocation8 + $0x440] ss:$48 sps:$4 sm:$0xff]  }
 0x348   : > { %5024 = vmatpush1.bf16.msra.mxu0 %v7579_v29  ;;  %v7689_v29 = vld [vmem:[#allocation8 + $0x4a4] ss:$48 sps:$4 sm:$0xff]  }
 0x349   : > { %5025 = vmatprep.subr.bf16.mxu0 %v7587_v31  ;;  %v7648_v31 = vld [vmem:[#allocation8 + $0x480] ss:$48 sps:$4 sm:$0xff]  }
 0x34a   : > { %2460 = vmatpush1.bf16.msra.mxu1 %v7582_v32  ;;  %v7656_v32 = vld [vmem:[#allocation8 + $0x4e4] ss:$48 sps:$4 sm:$0xff]  }
 0x34b   : > { %2461 = vmatprep.subr.bf16.mxu1 %v7590_v33  ;;  %v7687_v33 = vld [vmem:[#allocation8 + $0x4a0] ss:$48 sps:$4 sm:$0xff]  }
 0x34c   : > { %5026 = vmatpush1.bf16.msra.mxu0 %v7585_v34  ;;  %v7695_v34 = vld [vmem:[#allocation8 + $0x504] ss:$48 sps:$4 sm:$0xff]  }
 0x34d   : > { %5027 = vmatprep.subr.bf16.mxu0 %v7593_v35  ;;  %v7654_v35 = vld [vmem:[#allocation8 + $0x4e0] ss:$48 sps:$4 sm:$0xff]  }
 0x34e   : > { %2462 = vmatpush1.bf16.msra.mxu1 %v7588_v37  ;;  %v7662_v37 = vld [vmem:[#allocation8 + $0x544] ss:$48 sps:$4 sm:$0xff]  }
 0x34f   : > { %4782 = vmatprep.subr.bf16.mxu1 %v7596_v38  ;;  %v7693_v38 = vld [vmem:[#allocation8 + $0x500] ss:$48 sps:$4 sm:$0xff]  }
 0x350   : > { %5028 = vmatpush1.bf16.msra.mxu0 %v7591_v40  ;;  %v7701_v40 = vld [vmem:[#allocation8 + $0x564] ss:$48 sps:$4 sm:$0xff]  }
 0x351   : > { %2464 = vmatmul.mubr.bf16.vlgmr.msra.gmra.mrb[12].mxu1 %v8915_v18  ;;  %5126 = vmatprep.subr.bf16.mxu0 %v7617_v43  ;;  %v7605_v18 = vld [vmem:[#allocation8 + $0x124] ss:$48 sps:$4 sm:$0xff]   ;;  %v7699_v43 = vld [vmem:[#allocation8 + $0x560] ss:$48 sps:$4 sm:$0xff]  }
 0x352   : > { %4783 = vmatpush1.bf16.msra.mxu1 %v7594_v44  ;;  %4814 = vmatprep.mubr.bf16.mxu1 %v8931_v30  ;;  %v7707_v44 = vld [vmem:[#allocation8 + $0x5c4] ss:$48 sps:$4 sm:$0xff]  }
 0x353   : > { %5030 = vmatmul.mubr.bf16.vlgmr.msra.gmra.mrb[4].mxu0 %v8963_v45  ;;  %4784 = vmatprep.subr.bf16.mxu1 %v7599_v46  ;;  %v7666_v46 = vld [vmem:[#allocation8 + $0x5a0] ss:$48 sps:$4 sm:$0xff]  }
 0x354   : > { %5127 = vmatpush1.bf16.msra.mxu0 %v7615_v47  ;;  %5158 = vmatprep.mubr.bf16.mxu0 %v8931_v30  ;;  %v7674_v47 = vld [vmem:[#allocation8 + $0x604] ss:$48 sps:$4 sm:$0xff]  }
 0x355   : > { %5128 = vmatprep.subr.bf16.mxu0 %v7623_v48  ;;  %v7705_v48 = vld [vmem:[#allocation8 + $0x5c0] ss:$48 sps:$4 sm:$0xff]  }
 0x356   : > { %4785 = vmatpush1.bf16.msra.mxu1 %v7597_v20  ;;  %v7713_v20 = vld [vmem:[#allocation8 + $0x624] ss:$48 sps:$4 sm:$0xff]  }
 0x357   : > { %4786 = vmatprep.subr.bf16.mxu1 %v7602_v49  ;;  %v7672_v49 = vld [vmem:[#allocation8 + $0x600] ss:$48 sps:$4 sm:$0xff]  }
 0x358   : > { %5129 = vmatpush1.bf16.msra.mxu0 %v7621_v50  ;;  %v7680_v50 = vld [vmem:[#allocation8 + $0x664] ss:$48 sps:$4 sm:$0xff]  }
 0x359   : > { %5130 = vmatprep.subr.bf16.mxu0 %v7629_v51  ;;  %v7711_v51 = vld [vmem:[#allocation8 + $0x620] ss:$48 sps:$4 sm:$0xff]  }
 0x35a   : > { %4787 = vmatpush1.bf16.msra.mxu1 %v7600_v52  ;;  %v7719_v52 = vld [vmem:[#allocation8 + $0x684] ss:$48 sps:$4 sm:$0xff]  }
 0x35b   : > { %4788 = vmatprep.subr.bf16.mxu1 %v7605_v18  ;;  %v7678_v18 = vld [vmem:[#allocation8 + $0x660] ss:$48 sps:$4 sm:$0xff]  }
 0x35c   : > { %5131 = vmatpush1.bf16.msra.mxu0 %v7627_v53  ;;  %v7686_v53 = vld [vmem:[#allocation8 + $0x6c4] ss:$48 sps:$4 sm:$0xff]  }
 0x35d   : > { %5132 = vmatprep.subr.bf16.mxu0 %v7635_v54  ;;  %v7717_v54 = vld [vmem:[#allocation8 + $0x680] ss:$48 sps:$4 sm:$0xff]  }
 0x35e   : > { %4789 = vmatpush1.bf16.msra.mxu1 %v7603_v55  ;;  %v7725_v55 = vld [vmem:[#allocation8 + $0x6e4] ss:$48 sps:$4 sm:$0xff]  }
 0x35f   : > { %4790 = vmatprep.subr.bf16.mxu1 %v7608_v56  ;;  %v7684_v56 = vld [vmem:[#allocation8 + $0x6c0] ss:$48 sps:$4 sm:$0xff]  }
 0x360   : > { %5133 = vmatpush1.bf16.msra.mxu0 %v7633_v57  ;;  %v7692_v57 = vld [vmem:[#allocation8 + $0x724] ss:$48 sps:$4 sm:$0xff]  }
 0x361   : > { %5134 = vmatprep.subr.bf16.mxu0 %v7641_v58  ;;  %v7723_v58 = vld [vmem:[#allocation8 + $0x6e0] ss:$48 sps:$4 sm:$0xff]  }
 0x362   : > { %4791 = vmatpush1.bf16.msra.mxu1 %v7606_v59  ;;  %v7731_v59 = vld [vmem:[#allocation8 + $0x744] ss:$48 sps:$4 sm:$0xff]  }
 0x363   : > { %4792 = vmatprep.subr.bf16.mxu1 %v7611_v60  ;;  %v7690_v60 = vld [vmem:[#allocation8 + $0x720] ss:$48 sps:$4 sm:$0xff]  }
 0x364   : > { %5135 = vmatpush1.bf16.msra.mxu0 %v7639_v61  ;;  %v7698_v61 = vld [vmem:[#allocation8 + $0x784] ss:$48 sps:$4 sm:$0xff]  }
 0x365   : > { %5136 = vmatprep.subr.bf16.mxu0 %v7647_v63  ;;  %v7729_v63 = vld [vmem:[#allocation8 + $0x740] ss:$48 sps:$4 sm:$0xff]  }
 0x366   : > { %4793 = vmatpush1.bf16.msra.mxu1 %v7609_v0  ;;  %v7737_v0 = vld [vmem:[#allocation8 + $0x7a4] ss:$48 sps:$4 sm:$0xff]  }
 0x367   : > { %4794 = vmatprep.subr.bf16.mxu1 %v7614_v1  ;;  %v7696_v1 = vld [vmem:[#allocation8 + $0x780] ss:$48 sps:$4 sm:$0xff]  }
 0x368   : > { %5137 = vmatpush1.bf16.msra.mxu0 %v7645_v2  ;;  %v7704_v2 = vld [vmem:[#allocation8 + $0x7e4] ss:$48 sps:$4 sm:$0xff]  }
 0x369   : > { %5138 = vmatprep.subr.bf16.mxu0 %v7653_v3  ;;  %v7735_v3 = vld [vmem:[#allocation8 + $0x7a0] ss:$48 sps:$4 sm:$0xff]  }
 0x36a   : > { %4795 = vmatpush1.bf16.msra.mxu1 %v7612_v4  ;;  %v7743_v4 = vld [vmem:[#allocation8 + $0x804] ss:$48 sps:$4 sm:$0xff]  }
 0x36b   : > { %4796 = vmatprep.subr.bf16.mxu1 %v7620_v5  ;;  %v7702_v5 = vld [vmem:[#allocation8 + $0x7e0] ss:$48 sps:$4 sm:$0xff]  }
 0x36c   : > { %5139 = vmatpush1.bf16.msra.mxu0 %v7651_v6  ;;  %v7710_v6 = vld [vmem:[#allocation8 + $0x844] ss:$48 sps:$4 sm:$0xff]  }
 0x36d   : > { %5140 = vmatprep.subr.bf16.mxu0 %v7659_v7 }
 0x36e   : > { %4797 = vmatpush1.bf16.msra.mxu1 %v7618_v8  ;;  %v7741_v8 = vld [vmem:[#allocation8 + $0x800] ss:$48 sps:$4 sm:$0xff]  }
 0x36f   : > { %4798 = vmatprep.subr.bf16.mxu1 %v7626_v9 }
 0x370   : > { %5141 = vmatpush1.bf16.msra.mxu0 %v7657_v10  ;;  %v7749_v10 = vld [vmem:[#allocation8 + $0x864] ss:$48 sps:$4 sm:$0xff]  }
 0x371   : > { %5142 = vmatprep.subr.bf16.mxu0 %v7665_v11 }
 0x372   : > { %4799 = vmatpush1.bf16.msra.mxu1 %v7624_v12  ;;  %v7708_v12 = vld [vmem:[#allocation8 + $0x840] ss:$48 sps:$4 sm:$0xff]  }
 0x373   : > { %4800 = vmatprep.subr.bf16.mxu1 %v7632_v13 }
 0x374   : > { %5143 = vmatpush1.bf16.msra.mxu0 %v7663_v14  ;;  %v7716_v14 = vld [vmem:[#allocation8 + $0x8a4] ss:$48 sps:$4 sm:$0xff]  }
 0x375   : > { %5144 = vmatprep.subr.bf16.mxu0 %v7671_v15  ;;  %v7747_v15 = vld [vmem:[#allocation8 + $0x860] ss:$48 sps:$4 sm:$0xff]  }
 0x376   : > { %4801 = vmatpush1.bf16.msra.mxu1 %v7630_v16  ;;  %v7755_v16 = vld [vmem:[#allocation8 + $0x8c4] ss:$48 sps:$4 sm:$0xff]  }
 0x377   : > { %4802 = vmatprep.subr.bf16.mxu1 %v7638_v17  ;;  %v7714_v17 = vld [vmem:[#allocation8 + $0x8a0] ss:$48 sps:$4 sm:$0xff]  }
 0x378   : > { %5145 = vmatpush1.bf16.msra.mxu0 %v7669_v19  ;;  %v7722_v19 = vld [vmem:[#allocation8 + $0x904] ss:$48 sps:$4 sm:$0xff]  }
 0x379   : > { %5146 = vmatprep.subr.bf16.mxu0 %v7677_v21  ;;  %v7753_v21 = vld [vmem:[#allocation8 + $0x8c0] ss:$48 sps:$4 sm:$0xff]  }
 0x37a   : > { %4803 = vmatpush1.bf16.msra.mxu1 %v7636_v22  ;;  %v7761_v22 = vld [vmem:[#allocation8 + $0x924] ss:$48 sps:$4 sm:$0xff]  }
 0x37b   : > { %4804 = vmatprep.subr.bf16.mxu1 %v7644_v23  ;;  %v7720_v23 = vld [vmem:[#allocation8 + $0x900] ss:$48 sps:$4 sm:$0xff]  }
 0x37c   : > { %5147 = vmatpush1.bf16.msra.mxu0 %v7675_v24  ;;  %v7728_v24 = vld [vmem:[#allocation8 + $0x964] ss:$48 sps:$4 sm:$0xff]  }
 0x37d   : > { %5148 = vmatprep.subr.bf16.mxu0 %v7683_v25  ;;  %v7759_v25 = vld [vmem:[#allocation8 + $0x920] ss:$48 sps:$4 sm:$0xff]  }
 0x37e   : > { %4805 = vmatpush1.bf16.msra.mxu1 %v7642_v26  ;;  %v7767_v26 = vld [vmem:[#allocation8 + $0x984] ss:$48 sps:$4 sm:$0xff]  }
 0x37f   : > { %4806 = vmatprep.subr.bf16.mxu1 %v7650_v27  ;;  %v7726_v27 = vld [vmem:[#allocation8 + $0x960] ss:$48 sps:$4 sm:$0xff]  }
 0x380   : > { %5149 = vmatpush1.bf16.msra.mxu0 %v7681_v28  ;;  %v7734_v28 = vld [vmem:[#allocation8 + $0x9c4] ss:$48 sps:$4 sm:$0xff]  }
 0x381   : > { %5150 = vmatprep.subr.bf16.mxu0 %v7689_v29  ;;  %v7765_v29 = vld [vmem:[#allocation8 + $0x980] ss:$48 sps:$4 sm:$0xff]  }
 0x382   : > { %4807 = vmatpush1.bf16.msra.mxu1 %v7648_v31  ;;  %v7773_v31 = vld [vmem:[#allocation8 + $0x9e4] ss:$48 sps:$4 sm:$0xff]  }
 0x383   : > { %4808 = vmatprep.subr.bf16.mxu1 %v7656_v32  ;;  %v7732_v32 = vld [vmem:[#allocation8 + $0x9c0] ss:$48 sps:$4 sm:$0xff]  }
 0x384   : > { %5151 = vmatpush1.bf16.msra.mxu0 %v7687_v33  ;;  %v7740_v33 = vld [vmem:[#allocation8 + $0xa24] ss:$48 sps:$4 sm:$0xff]  }
 0x385   : > { %5152 = vmatprep.subr.bf16.mxu0 %v7695_v34  ;;  %v7771_v34 = vld [vmem:[#allocation8 + $0x9e0] ss:$48 sps:$4 sm:$0xff]  }
 0x386   : > { %4809 = vmatpush1.bf16.msra.mxu1 %v7654_v35  ;;  %v7779_v35 = vld [vmem:[#allocation8 + $0xa44] ss:$48 sps:$4 sm:$0xff]  }
 0x387   : > { %4810 = vmatprep.subr.bf16.mxu1 %v7662_v37  ;;  %v7738_v37 = vld [vmem:[#allocation8 + $0xa20] ss:$48 sps:$4 sm:$0xff]  }
 0x388   : > { %5153 = vmatpush1.bf16.msra.mxu0 %v7693_v38  ;;  %v7746_v38 = vld [vmem:[#allocation8 + $0xa84] ss:$48 sps:$4 sm:$0xff]  }
 0x389   : > { %5154 = vmatprep.subr.bf16.mxu0 %v7701_v40  ;;  %v7777_v40 = vld [vmem:[#allocation8 + $0xa40] ss:$48 sps:$4 sm:$0xff]  }
 0x38a   : > { %4811 = vmatpush1.bf16.msra.mxu1 %v7660_v41  ;;  %v7785_v41 = vld [vmem:[#allocation8 + $0xaa4] ss:$48 sps:$4 sm:$0xff]  }
 0x38b   : > { %4812 = vmatprep.subr.bf16.mxu1 %v7668_v42  ;;  %v7744_v42 = vld [vmem:[#allocation8 + $0xa80] ss:$48 sps:$4 sm:$0xff]  }
 0x38c   : > { %5155 = vmatpush1.bf16.msra.mxu0 %v7699_v43  ;;  %v7752_v43 = vld [vmem:[#allocation8 + $0xae4] ss:$48 sps:$4 sm:$0xff]  }
 0x38d   : > { %5156 = vmatprep.subr.bf16.mxu0 %v7707_v44  ;;  %v7783_v44 = vld [vmem:[#allocation8 + $0xaa0] ss:$48 sps:$4 sm:$0xff]  }
 0x38e   : > { %4813 = vmatpush1.bf16.msra.mxu1 %v7666_v46  ;;  %v7791_v46 = vld [vmem:[#allocation8 + $0xb04] ss:$48 sps:$4 sm:$0xff]  }
 0x38f   : > { %4825 = vmatprep.subr.bf16.mxu1 %v7674_v47  ;;  %v7750_v47 = vld [vmem:[#allocation8 + $0xae0] ss:$48 sps:$4 sm:$0xff]  }
 0x390   : > { %5157 = vmatpush1.bf16.msra.mxu0 %v7705_v48  ;;  %v7758_v48 = vld [vmem:[#allocation8 + $0xb44] ss:$48 sps:$4 sm:$0xff]  }
 0x391   : > { %4815 = vmatmul.mubr.bf16.vlgmr.msra.gmra.mrb[0].mxu1 %v8949_v36  ;;  %5169 = vmatprep.subr.bf16.mxu0 %v7713_v20  ;;  %v7789_v20 = vld [vmem:[#allocation8 + $0xb00] ss:$48 sps:$4 sm:$0xff]  }
 0x392   : > { %4826 = vmatpush1.bf16.msra.mxu1 %v7672_v49  ;;  %4857 = vmatprep.mubr.bf16.mxu1 %v8951_v39  ;;  %v7797_v49 = vld [vmem:[#allocation8 + $0xb64] ss:$48 sps:$4 sm:$0xff]  }
 0x393   : > { %4827 = vmatprep.subr.bf16.mxu1 %v7680_v50  ;;  %5159 = vmatmul.mubr.bf16.vlgmr.msra.gmra.mrb[12].mxu0 %v8949_v36  ;;  %v7756_v50 = vld [vmem:[#allocation8 + $0xb40] ss:$48 sps:$4 sm:$0xff]  }
 0x394   : > { %5170 = vmatpush1.bf16.msra.mxu0 %v7711_v51  ;;  %5201 = vmatprep.mubr.bf16.mxu0 %v8951_v39  ;;  %v7764_v51 = vld [vmem:[#allocation8 + $0xba4] ss:$48 sps:$4 sm:$0xff]  }
 0x395   : > { %5171 = vmatprep.subr.bf16.mxu0 %v7719_v52  ;;  %v7795_v52 = vld [vmem:[#allocation8 + $0xb60] ss:$48 sps:$4 sm:$0xff]  }
 0x396   : > { %4828 = vmatpush1.bf16.msra.mxu1 %v7678_v18  ;;  %v7803_v18 = vld [vmem:[#allocation8 + $0xbc4] ss:$48 sps:$4 sm:$0xff]  }
 0x397   : > { %4829 = vmatprep.subr.bf16.mxu1 %v7686_v53  ;;  %v7762_v53 = vld [vmem:[#allocation8 + $0xba0] ss:$48 sps:$4 sm:$0xff]  }
 0x398   : > { %5172 = vmatpush1.bf16.msra.mxu0 %v7717_v54  ;;  %v7770_v54 = vld [vmem:[#allocation8 + $0xc] ss:$48 sps:$4 sm:$0xff]  }
 0x399   : > { %5173 = vmatprep.subr.bf16.mxu0 %v7725_v55  ;;  %v7801_v55 = vld [vmem:[#allocation8 + $0xbc0] ss:$48 sps:$4 sm:$0xff]  }
 0x39a   : > { %4830 = vmatpush1.bf16.msra.mxu1 %v7684_v56  ;;  %v7809_v56 = vld [vmem:[#allocation8 + $0x2c] ss:$48 sps:$4 sm:$0xff]  }
 0x39b   : > { %4831 = vmatprep.subr.bf16.mxu1 %v7692_v57  ;;  %v7768_v57 = vld [vmem:[#allocation8 + $0x8] ss:$48 sps:$4 sm:$0xff]  }
 0x39c   : > { %5174 = vmatpush1.bf16.msra.mxu0 %v7723_v58  ;;  %v7776_v58 = vld [vmem:[#allocation8 + $0x6c] ss:$48 sps:$4 sm:$0xff]  }
 0x39d   : > { %5175 = vmatprep.subr.bf16.mxu0 %v7731_v59  ;;  %v7807_v59 = vld [vmem:[#allocation8 + $0x28] ss:$48 sps:$4 sm:$0xff]  }
 0x39e   : > { %4832 = vmatpush1.bf16.msra.mxu1 %v7690_v60  ;;  %v7815_v60 = vld [vmem:[#allocation8 + $0x8c] ss:$48 sps:$4 sm:$0xff]  }
 0x39f   : > { %4833 = vmatprep.subr.bf16.mxu1 %v7698_v61  ;;  %v7774_v61 = vld [vmem:[#allocation8 + $0x68] ss:$48 sps:$4 sm:$0xff]  }
 0x3a0   : > { %5176 = vmatpush1.bf16.msra.mxu0 %v7729_v63  ;;  %v7782_v63 = vld [vmem:[#allocation8 + $0xcc] ss:$48 sps:$4 sm:$0xff]  }
 0x3a1   : > { %5177 = vmatprep.subr.bf16.mxu0 %v7737_v0  ;;  %v7813_v0 = vld [vmem:[#allocation8 + $0x88] ss:$48 sps:$4 sm:$0xff]  }
 0x3a2   : > { %4834 = vmatpush1.bf16.msra.mxu1 %v7696_v1  ;;  %v7821_v1 = vld [vmem:[#allocation8 + $0xec] ss:$48 sps:$4 sm:$0xff]  }
 0x3a3   : > { %4835 = vmatprep.subr.bf16.mxu1 %v7704_v2  ;;  %v7780_v2 = vld [vmem:[#allocation8 + $0xc8] ss:$48 sps:$4 sm:$0xff]  }
 0x3a4   : > { %v8973_v7 = vpop.f32.mrb[8].mxu0  ;;  %5178 = vmatpush1.bf16.msra.mxu0 %v7735_v3  ;;  %v7788_v3 = vld [vmem:[#allocation8 + $0x12c] ss:$48 sps:$4 sm:$0xff]  }
 0x3a5   : > { %v8975_v9 = vpop.f32.mrb[9].mxu0  ;;  %5179 = vmatprep.subr.bf16.mxu0 %v7743_v4  ;;  %v7819_v4 = vld [vmem:[#allocation8 + $0xe8] ss:$48 sps:$4 sm:$0xff]  }
 0x3a6   : > { %v8977_v11 = vpop.f32.mrb[10].mxu0  ;;  %4836 = vmatpush1.bf16.msra.mxu1 %v7702_v5  ;;  %v7827_v5 = vld [vmem:[#allocation8 + $0x14c] ss:$48 sps:$4 sm:$0xff]  }
 0x3a7   : > { %v8979_v13 = vpop.f32.mrb[11].mxu0  ;;  %4837 = vmatprep.subr.bf16.mxu1 %v7710_v6  ;;  %v7786_v6 = vld [vmem:[#allocation8 + $0x128] ss:$48 sps:$4 sm:$0xff]  }
 0x3a8   : > { %5180 = vmatpush1.bf16.msra.mxu0 %v7741_v8  ;;  %v7794_v8 = vld [vmem:[#allocation8 + $0x18c] ss:$48 sps:$4 sm:$0xff]  }
 0x3a9   : > { %5181 = vmatprep.subr.bf16.mxu0 %v7749_v10  ;;  %v7825_v10 = vld [vmem:[#allocation8 + $0x148] ss:$48 sps:$4 sm:$0xff]  }
 0x3aa   : > { %4838 = vmatpush1.bf16.msra.mxu1 %v7708_v12  ;;  %v7833_v12 = vld [vmem:[#allocation8 + $0x1ac] ss:$48 sps:$4 sm:$0xff]  }
 0x3ab   : > { %4839 = vmatprep.subr.bf16.mxu1 %v7716_v14  ;;  %v7792_v14 = vld [vmem:[#allocation8 + $0x188] ss:$48 sps:$4 sm:$0xff]  }
 0x3ac   : > { %5182 = vmatpush1.bf16.msra.mxu0 %v7747_v15  ;;  %v7800_v15 = vld [vmem:[#allocation8 + $0x1ec] ss:$48 sps:$4 sm:$0xff]  }
 0x3ad   : > { %5183 = vmatprep.subr.bf16.mxu0 %v7755_v16  ;;  %v7831_v16 = vld [vmem:[#allocation8 + $0x1a8] ss:$48 sps:$4 sm:$0xff]  }
 0x3ae   : > { %4840 = vmatpush1.bf16.msra.mxu1 %v7714_v17  ;;  %v7839_v17 = vld [vmem:[#allocation8 + $0x20c] ss:$48 sps:$4 sm:$0xff]  }
 0x3af   : > { %4841 = vmatprep.subr.bf16.mxu1 %v7722_v19  ;;  %v7798_v19 = vld [vmem:[#allocation8 + $0x1e8] ss:$48 sps:$4 sm:$0xff]  }
 0x3b0   : > { %5184 = vmatpush1.bf16.msra.mxu0 %v7753_v21  ;;  %v7806_v21 = vld [vmem:[#allocation8 + $0x24c] ss:$48 sps:$4 sm:$0xff]  }
 0x3b1   : > { %5185 = vmatprep.subr.bf16.mxu0 %v7761_v22  ;;  %v7837_v22 = vld [vmem:[#allocation8 + $0x208] ss:$48 sps:$4 sm:$0xff]  }
 0x3b2   : > { %4842 = vmatpush1.bf16.msra.mxu1 %v7720_v23  ;;  %v7845_v23 = vld [vmem:[#allocation8 + $0x26c] ss:$48 sps:$4 sm:$0xff]  }
 0x3b3   : > { %4843 = vmatprep.subr.bf16.mxu1 %v7728_v24  ;;  %v7804_v24 = vld [vmem:[#allocation8 + $0x248] ss:$48 sps:$4 sm:$0xff]  }
 0x3b4   : > { %5186 = vmatpush1.bf16.msra.mxu0 %v7759_v25  ;;  %v7812_v25 = vld [vmem:[#allocation8 + $0x2ac] ss:$48 sps:$4 sm:$0xff]  }
 0x3b5   : > { %5187 = vmatprep.subr.bf16.mxu0 %v7767_v26  ;;  %v7843_v26 = vld [vmem:[#allocation8 + $0x268] ss:$48 sps:$4 sm:$0xff]  }
 0x3b6   : > { %4844 = vmatpush1.bf16.msra.mxu1 %v7726_v27  ;;  %v7851_v27 = vld [vmem:[#allocation8 + $0x2cc] ss:$48 sps:$4 sm:$0xff]  }
 0x3b7   : > { %4845 = vmatprep.subr.bf16.mxu1 %v7734_v28  ;;  %v7810_v28 = vld [vmem:[#allocation8 + $0x2a8] ss:$48 sps:$4 sm:$0xff]  }
 0x3b8   : > { %5188 = vmatpush1.bf16.msra.mxu0 %v7765_v29  ;;  %v7818_v29 = vld [vmem:[#allocation8 + $0x30c] ss:$48 sps:$4 sm:$0xff]  }
 0x3b9   : > { %5189 = vmatprep.subr.bf16.mxu0 %v7773_v31  ;;  %v7849_v31 = vld [vmem:[#allocation8 + $0x2c8] ss:$48 sps:$4 sm:$0xff]  }
 0x3ba   : > { %4846 = vmatpush1.bf16.msra.mxu1 %v7732_v32  ;;  %v7857_v32 = vld [vmem:[#allocation8 + $0x32c] ss:$48 sps:$4 sm:$0xff]  }
 0x3bb   : > { %4847 = vmatprep.subr.bf16.mxu1 %v7740_v33  ;;  %v7816_v33 = vld [vmem:[#allocation8 + $0x308] ss:$48 sps:$4 sm:$0xff]  }
 0x3bc   : > { %5190 = vmatpush1.bf16.msra.mxu0 %v7771_v34  ;;  %v7824_v34 = vld [vmem:[#allocation8 + $0x36c] ss:$48 sps:$4 sm:$0xff]  }
 0x3bd   : > { %5191 = vmatprep.subr.bf16.mxu0 %v7779_v35  ;;  %v7855_v35 = vld [vmem:[#allocation8 + $0x328] ss:$48 sps:$4 sm:$0xff]  }
 0x3be   : > { %4848 = vmatpush1.bf16.msra.mxu1 %v7738_v37  ;;  %v7863_v37 = vld [vmem:[#allocation8 + $0x38c] ss:$48 sps:$4 sm:$0xff]  }
 0x3bf   : > { %4849 = vmatprep.subr.bf16.mxu1 %v7746_v38  ;;  %v7822_v38 = vld [vmem:[#allocation8 + $0x368] ss:$48 sps:$4 sm:$0xff]  }
 0x3c0   : > { %5192 = vmatpush1.bf16.msra.mxu0 %v7777_v40  ;;  %v7830_v40 = vld [vmem:[#allocation8 + $0x3cc] ss:$48 sps:$4 sm:$0xff]  }
 0x3c1   : > { %5193 = vmatprep.subr.bf16.mxu0 %v7785_v41  ;;  %v7861_v41 = vld [vmem:[#allocation8 + $0x388] ss:$48 sps:$4 sm:$0xff]  }
 0x3c2   : > { %4850 = vmatpush1.bf16.msra.mxu1 %v7744_v42  ;;  %v7869_v42 = vld [vmem:[#allocation8 + $0x3ec] ss:$48 sps:$4 sm:$0xff]  }
 0x3c3   : > { %4851 = vmatprep.subr.bf16.mxu1 %v7752_v43  ;;  %v7828_v43 = vld [vmem:[#allocation8 + $0x3c8] ss:$48 sps:$4 sm:$0xff]  }
 0x3c4   : > { %5194 = vmatpush1.bf16.msra.mxu0 %v7783_v44  ;;  %v7836_v44 = vld [vmem:[#allocation8 + $0x42c] ss:$48 sps:$4 sm:$0xff]  }
 0x3c5   : > { %5195 = vmatprep.subr.bf16.mxu0 %v7791_v46  ;;  %v7867_v46 = vld [vmem:[#allocation8 + $0x3e8] ss:$48 sps:$4 sm:$0xff]  }
 0x3c6   : > { %4852 = vmatpush1.bf16.msra.mxu1 %v7750_v47  ;;  %v7875_v47 = vld [vmem:[#allocation8 + $0x44c] ss:$48 sps:$4 sm:$0xff]  }
 0x3c7   : > { %4853 = vmatprep.subr.bf16.mxu1 %v7758_v48  ;;  %v7834_v48 = vld [vmem:[#allocation8 + $0x428] ss:$48 sps:$4 sm:$0xff]  }
 0x3c8   : > { %5196 = vmatpush1.bf16.msra.mxu0 %v7789_v20  ;;  %v7842_v20 = vld [vmem:[#allocation8 + $0x48c] ss:$48 sps:$4 sm:$0xff]  }
 0x3c9   : > { %5197 = vmatprep.subr.bf16.mxu0 %v7797_v49  ;;  %v7873_v49 = vld [vmem:[#allocation8 + $0x448] ss:$48 sps:$4 sm:$0xff]  }
 0x3ca   : > { %4854 = vmatpush1.bf16.msra.mxu1 %v7756_v50  ;;  %v7881_v50 = vld [vmem:[#allocation8 + $0x4ac] ss:$48 sps:$4 sm:$0xff]  }
 0x3cb   : > { %4855 = vmatprep.subr.bf16.mxu1 %v7764_v51  ;;  %v7840_v51 = vld [vmem:[#allocation8 + $0x488] ss:$48 sps:$4 sm:$0xff]  }
 0x3cc   : > { %5198 = vmatpush1.bf16.msra.mxu0 %v7795_v52  ;;  %v7848_v52 = vld [vmem:[#allocation8 + $0x4ec] ss:$48 sps:$4 sm:$0xff]  }
 0x3cd   : > { %5199 = vmatprep.subr.bf16.mxu0 %v7803_v18  ;;  %v7879_v18 = vld [vmem:[#allocation8 + $0x4a8] ss:$48 sps:$4 sm:$0xff]  }
 0x3ce   : > { %4856 = vmatpush1.bf16.msra.mxu1 %v7762_v53  ;;  %v7887_v53 = vld [vmem:[#allocation8 + $0x50c] ss:$48 sps:$4 sm:$0xff]  }
 0x3cf   : > { %4868 = vmatprep.subr.bf16.mxu1 %v7770_v54  ;;  %v7846_v54 = vld [vmem:[#allocation8 + $0x4e8] ss:$48 sps:$4 sm:$0xff]  }
 0x3d0   : > { %5200 = vmatpush1.bf16.msra.mxu0 %v7801_v55  ;;  %v7854_v55 = vld [vmem:[#allocation8 + $0x54c] ss:$48 sps:$4 sm:$0xff]  }
 0x3d1   : > { %4858 = vmatmul.mubr.bf16.vlgmr.msra.gmra.mrb[0].mxu1 %v8963_v45  ;;  %5212 = vmatprep.subr.bf16.mxu0 %v7809_v56  ;;  %v7885_v56 = vld [vmem:[#allocation8 + $0x508] ss:$48 sps:$4 sm:$0xff]  }
 0x3d2   : > { %4869 = vmatpush1.bf16.msra.mxu1 %v7768_v57  ;;  %4900 = vmatprep.mubr.bf16.mxu1 %v8931_v30  ;;  %v7893_v57 = vld [vmem:[#allocation8 + $0x56c] ss:$48 sps:$4 sm:$0xff]  }
 0x3d3   : > { %4870 = vmatprep.subr.bf16.mxu1 %v7776_v58  ;;  %5202 = vmatmul.mubr.bf16.vlgmr.msra.gmra.mrb[12].mxu0 %v8963_v45  ;;  %v7852_v58 = vld [vmem:[#allocation8 + $0x548] ss:$48 sps:$4 sm:$0xff]  }
 0x3d4   : > { %5213 = vmatpush1.bf16.msra.mxu0 %v7807_v59  ;;  %5244 = vmatprep.mubr.bf16.mxu0 %v8931_v30  ;;  %v7860_v59 = vld [vmem:[#allocation8 + $0x5ac] ss:$48 sps:$4 sm:$0xff]  }
 0x3d5   : > { %5214 = vmatprep.subr.bf16.mxu0 %v7815_v60  ;;  %v7891_v60 = vld [vmem:[#allocation8 + $0x568] ss:$48 sps:$4 sm:$0xff]  }
 0x3d6   : > { %4871 = vmatpush1.bf16.msra.mxu1 %v7774_v61  ;;  %v7899_v61 = vld [vmem:[#allocation8 + $0x5cc] ss:$48 sps:$4 sm:$0xff]  }
 0x3d7   : > { %4872 = vmatprep.subr.bf16.mxu1 %v7782_v63  ;;  %v7858_v63 = vld [vmem:[#allocation8 + $0x5a8] ss:$48 sps:$4 sm:$0xff]  }
 0x3d8   : > { %5215 = vmatpush1.bf16.msra.mxu0 %v7813_v0  ;;  %v7866_v0 = vld [vmem:[#allocation8 + $0x60c] ss:$48 sps:$4 sm:$0xff]  }
 0x3d9   : > { %5216 = vmatprep.subr.bf16.mxu0 %v7821_v1  ;;  %v7897_v1 = vld [vmem:[#allocation8 + $0x5c8] ss:$48 sps:$4 sm:$0xff]  }
 0x3da   : > { %4873 = vmatpush1.bf16.msra.mxu1 %v7780_v2  ;;  %v7905_v2 = vld [vmem:[#allocation8 + $0x62c] ss:$48 sps:$4 sm:$0xff]  }
 0x3db   : > { %4874 = vmatprep.subr.bf16.mxu1 %v7788_v3  ;;  %v7864_v3 = vld [vmem:[#allocation8 + $0x608] ss:$48 sps:$4 sm:$0xff]  }
 0x3dc   : > { %5217 = vmatpush1.bf16.msra.mxu0 %v7819_v4  ;;  %v7872_v4 = vld [vmem:[#allocation8 + $0x66c] ss:$48 sps:$4 sm:$0xff]  }
 0x3dd   : > { %5218 = vmatprep.subr.bf16.mxu0 %v7827_v5  ;;  %v7903_v5 = vld [vmem:[#allocation8 + $0x628] ss:$48 sps:$4 sm:$0xff]  }
 0x3de   : > { %4875 = vmatpush1.bf16.msra.mxu1 %v7786_v6  ;;  %v7911_v6 = vld [vmem:[#allocation8 + $0x68c] ss:$48 sps:$4 sm:$0xff]  }
 0x3df   : > { %4876 = vmatprep.subr.bf16.mxu1 %v7794_v8  ;;  %v7870_v8 = vld [vmem:[#allocation8 + $0x668] ss:$48 sps:$4 sm:$0xff]  }
 0x3e0   : > { %5219 = vmatpush1.bf16.msra.mxu0 %v7825_v10  ;;  %v7878_v10 = vld [vmem:[#allocation8 + $0x6cc] ss:$48 sps:$4 sm:$0xff]  }
 0x3e1   : > { %5220 = vmatprep.subr.bf16.mxu0 %v7833_v12  ;;  %v7909_v12 = vld [vmem:[#allocation8 + $0x688] ss:$48 sps:$4 sm:$0xff]  }
 0x3e2   : > { %4877 = vmatpush1.bf16.msra.mxu1 %v7792_v14  ;;  %v7917_v14 = vld [vmem:[#allocation8 + $0x6ec] ss:$48 sps:$4 sm:$0xff]  }
 0x3e3   : > { %4878 = vmatprep.subr.bf16.mxu1 %v7800_v15  ;;  %v7876_v15 = vld [vmem:[#allocation8 + $0x6c8] ss:$48 sps:$4 sm:$0xff]  }
 0x3e4   : > { %5221 = vmatpush1.bf16.msra.mxu0 %v7831_v16  ;;  %v7884_v16 = vld [vmem:[#allocation8 + $0x72c] ss:$48 sps:$4 sm:$0xff]  }
 0x3e5   : > { %5222 = vmatprep.subr.bf16.mxu0 %v7839_v17  ;;  %v7915_v17 = vld [vmem:[#allocation8 + $0x6e8] ss:$48 sps:$4 sm:$0xff]  }
 0x3e6   : > { %4879 = vmatpush1.bf16.msra.mxu1 %v7798_v19  ;;  %v7923_v19 = vld [vmem:[#allocation8 + $0x74c] ss:$48 sps:$4 sm:$0xff]  }
 0x3e7   : > { %4880 = vmatprep.subr.bf16.mxu1 %v7806_v21  ;;  %v7882_v21 = vld [vmem:[#allocation8 + $0x728] ss:$48 sps:$4 sm:$0xff]  }
 0x3e8   : > { %5223 = vmatpush1.bf16.msra.mxu0 %v7837_v22  ;;  %v7890_v22 = vld [vmem:[#allocation8 + $0x78c] ss:$48 sps:$4 sm:$0xff]  }
 0x3e9   : > { %5224 = vmatprep.subr.bf16.mxu0 %v7845_v23  ;;  %v7921_v23 = vld [vmem:[#allocation8 + $0x748] ss:$48 sps:$4 sm:$0xff]  }
 0x3ea   : > { %4881 = vmatpush1.bf16.msra.mxu1 %v7804_v24  ;;  %v7929_v24 = vld [vmem:[#allocation8 + $0x7ac] ss:$48 sps:$4 sm:$0xff]  }
 0x3eb   : > { %4882 = vmatprep.subr.bf16.mxu1 %v7812_v25  ;;  %v7888_v25 = vld [vmem:[#allocation8 + $0x788] ss:$48 sps:$4 sm:$0xff]  }
 0x3ec   : > { %5225 = vmatpush1.bf16.msra.mxu0 %v7843_v26  ;;  %v7896_v26 = vld [vmem:[#allocation8 + $0x7ec] ss:$48 sps:$4 sm:$0xff]  }
 0x3ed   : > { %5226 = vmatprep.subr.bf16.mxu0 %v7851_v27  ;;  %v7927_v27 = vld [vmem:[#allocation8 + $0x7a8] ss:$48 sps:$4 sm:$0xff]  }
 0x3ee   : > { %4883 = vmatpush1.bf16.msra.mxu1 %v7810_v28  ;;  %v7935_v28 = vld [vmem:[#allocation8 + $0x80c] ss:$48 sps:$4 sm:$0xff]  }
 0x3ef   : > { %4884 = vmatprep.subr.bf16.mxu1 %v7818_v29  ;;  %v7894_v29 = vld [vmem:[#allocation8 + $0x7e8] ss:$48 sps:$4 sm:$0xff]  }
 0x3f0   : > { %5227 = vmatpush1.bf16.msra.mxu0 %v7849_v31  ;;  %v7902_v31 = vld [vmem:[#allocation8 + $0x84c] ss:$48 sps:$4 sm:$0xff]  }
 0x3f1   : > { %5228 = vmatprep.subr.bf16.mxu0 %v7857_v32 }
 0x3f2   : > { %4885 = vmatpush1.bf16.msra.mxu1 %v7816_v33  ;;  %v7933_v33 = vld [vmem:[#allocation8 + $0x808] ss:$48 sps:$4 sm:$0xff]  }
 0x3f3   : > { %4886 = vmatprep.subr.bf16.mxu1 %v7824_v34 }
 0x3f4   : > { %5229 = vmatpush1.bf16.msra.mxu0 %v7855_v35  ;;  %v7941_v35 = vld [vmem:[#allocation8 + $0x86c] ss:$48 sps:$4 sm:$0xff]  }
 0x3f5   : > { %5230 = vmatprep.subr.bf16.mxu0 %v7863_v37 }
 0x3f6   : > { %4887 = vmatpush1.bf16.msra.mxu1 %v7822_v38 }
 0x3f7   : > { %4888 = vmatprep.subr.bf16.mxu1 %v7830_v40  ;;  %v7900_v40 = vld [vmem:[#allocation8 + $0x848] ss:$48 sps:$4 sm:$0xff]  }
 0x3f8   : > { %5231 = vmatpush1.bf16.msra.mxu0 %v7861_v41 }
 0x3f9   : > { %5232 = vmatprep.subr.bf16.mxu0 %v7869_v42 }
 0x3fa   : > { %4889 = vmatpush1.bf16.msra.mxu1 %v7828_v43  ;;  %v7908_v43 = vld [vmem:[#allocation8 + $0x8ac] ss:$48 sps:$4 sm:$0xff]  }
 0x3fb   : > { %4890 = vmatprep.subr.bf16.mxu1 %v7836_v44 }
 0x3fc   : > { %5233 = vmatpush1.bf16.msra.mxu0 %v7867_v46  ;;  %v7939_v46 = vld [vmem:[#allocation8 + $0x868] ss:$48 sps:$4 sm:$0xff]  }
 0x3fd   : > { %5234 = vmatprep.subr.bf16.mxu0 %v7875_v47 }
 0x3fe   : > { %4891 = vmatpush1.bf16.msra.mxu1 %v7834_v48  ;;  %v7947_v48 = vld [vmem:[#allocation8 + $0x8cc] ss:$48 sps:$4 sm:$0xff]  }
 0x3ff   : > { %4892 = vmatprep.subr.bf16.mxu1 %v7842_v20  ;;  %v7906_v20 = vld [vmem:[#allocation8 + $0x8a8] ss:$48 sps:$4 sm:$0xff]  }
 0x400   : > { %5235 = vmatpush1.bf16.msra.mxu0 %v7873_v49  ;;  %v7914_v49 = vld [vmem:[#allocation8 + $0x90c] ss:$48 sps:$4 sm:$0xff]  }
 0x401   : > { %5236 = vmatprep.subr.bf16.mxu0 %v7881_v50  ;;  %v7945_v50 = vld [vmem:[#allocation8 + $0x8c8] ss:$48 sps:$4 sm:$0xff]  }
 0x402   : > { %4893 = vmatpush1.bf16.msra.mxu1 %v7840_v51  ;;  %v7953_v51 = vld [vmem:[#allocation8 + $0x92c] ss:$48 sps:$4 sm:$0xff]  }
 0x403   : > { %4894 = vmatprep.subr.bf16.mxu1 %v7848_v52  ;;  %v7912_v52 = vld [vmem:[#allocation8 + $0x908] ss:$48 sps:$4 sm:$0xff]  }
 0x404   : > { %5237 = vmatpush1.bf16.msra.mxu0 %v7879_v18  ;;  %v7920_v18 = vld [vmem:[#allocation8 + $0x96c] ss:$48 sps:$4 sm:$0xff]  }
 0x405   : > { %5238 = vmatprep.subr.bf16.mxu0 %v7887_v53  ;;  %v7951_v53 = vld [vmem:[#allocation8 + $0x928] ss:$48 sps:$4 sm:$0xff]  }
 0x406   : > { %4895 = vmatpush1.bf16.msra.mxu1 %v7846_v54  ;;  %v7959_v54 = vld [vmem:[#allocation8 + $0x98c] ss:$48 sps:$4 sm:$0xff]  }
 0x407   : > { %4896 = vmatprep.subr.bf16.mxu1 %v7854_v55  ;;  %v7918_v55 = vld [vmem:[#allocation8 + $0x968] ss:$48 sps:$4 sm:$0xff]  }
 0x408   : > { %5239 = vmatpush1.bf16.msra.mxu0 %v7885_v56  ;;  %v7926_v56 = vld [vmem:[#allocation8 + $0x9cc] ss:$48 sps:$4 sm:$0xff]  }
 0x409   : > { %5240 = vmatprep.subr.bf16.mxu0 %v7893_v57  ;;  %v7957_v57 = vld [vmem:[#allocation8 + $0x988] ss:$48 sps:$4 sm:$0xff]  }
 0x40a   : > { %4897 = vmatpush1.bf16.msra.mxu1 %v7852_v58  ;;  %v7965_v58 = vld [vmem:[#allocation8 + $0x9ec] ss:$48 sps:$4 sm:$0xff]  }
 0x40b   : > { %4898 = vmatprep.subr.bf16.mxu1 %v7860_v59  ;;  %v7924_v59 = vld [vmem:[#allocation8 + $0x9c8] ss:$48 sps:$4 sm:$0xff]  }
 0x40c   : > { %5241 = vmatpush1.bf16.msra.mxu0 %v7891_v60  ;;  %v7932_v60 = vld [vmem:[#allocation8 + $0xa2c] ss:$48 sps:$4 sm:$0xff]  }
 0x40d   : > { %5242 = vmatprep.subr.bf16.mxu0 %v7899_v61  ;;  %v7963_v61 = vld [vmem:[#allocation8 + $0x9e8] ss:$48 sps:$4 sm:$0xff]  }
 0x40e   : > { %4899 = vmatpush1.bf16.msra.mxu1 %v7858_v63  ;;  %v7971_v63 = vld [vmem:[#allocation8 + $0xa4c] ss:$48 sps:$4 sm:$0xff]  }
 0x40f   : > { %4911 = vmatprep.subr.bf16.mxu1 %v7866_v0  ;;  %v7930_v0 = vld [vmem:[#allocation8 + $0xa28] ss:$48 sps:$4 sm:$0xff]  }
 0x410   : > { %5243 = vmatpush1.bf16.msra.mxu0 %v7897_v1  ;;  %v7938_v1 = vld [vmem:[#allocation8 + $0xa8c] ss:$48 sps:$4 sm:$0xff]  }
 0x411   : > { %4901 = vmatmul.mubr.bf16.vlgmr.msra.gmra.mrb[4].mxu1 %v8949_v36  ;;  %5255 = vmatprep.subr.bf16.mxu0 %v7905_v2  ;;  %v7969_v2 = vld [vmem:[#allocation8 + $0xa48] ss:$48 sps:$4 sm:$0xff]  }
 0x412   : > { %4912 = vmatpush1.bf16.msra.mxu1 %v7864_v3  ;;  %4943 = vmatprep.mubr.bf16.mxu1 %v8951_v39  ;;  %v7977_v3 = vld [vmem:[#allocation8 + $0xaac] ss:$48 sps:$4 sm:$0xff]  }
 0x413   : > { %4913 = vmatprep.subr.bf16.mxu1 %v7872_v4  ;;  %5245 = vmatmul.mubr.bf16.vlgmr.msra.gmra.mrb[16].mxu0 %v8949_v36  ;;  %v7936_v4 = vld [vmem:[#allocation8 + $0xa88] ss:$48 sps:$4 sm:$0xff]  }
 0x414   : > { %5256 = vmatpush1.bf16.msra.mxu0 %v7903_v5  ;;  %5287 = vmatprep.mubr.bf16.mxu0 %v8951_v39  ;;  %v7944_v5 = vld [vmem:[#allocation8 + $0xaec] ss:$48 sps:$4 sm:$0xff]  }
 0x415   : > { %5257 = vmatprep.subr.bf16.mxu0 %v7911_v6  ;;  %v7975_v6 = vld [vmem:[#allocation8 + $0xaa8] ss:$48 sps:$4 sm:$0xff]  }
 0x416   : > { %4914 = vmatpush1.bf16.msra.mxu1 %v7870_v8  ;;  %v7983_v8 = vld [vmem:[#allocation8 + $0xb0c] ss:$48 sps:$4 sm:$0xff]  }
 0x417   : > { %4915 = vmatprep.subr.bf16.mxu1 %v7878_v10  ;;  %v7942_v10 = vld [vmem:[#allocation8 + $0xae8] ss:$48 sps:$4 sm:$0xff]  }
 0x418   : > { %5258 = vmatpush1.bf16.msra.mxu0 %v7909_v12  ;;  %v7950_v12 = vld [vmem:[#allocation8 + $0xb4c] ss:$48 sps:$4 sm:$0xff]  }
 0x419   : > { %5259 = vmatprep.subr.bf16.mxu0 %v7917_v14  ;;  %v7981_v14 = vld [vmem:[#allocation8 + $0xb08] ss:$48 sps:$4 sm:$0xff]  }
 0x41a   : > { %4916 = vmatpush1.bf16.msra.mxu1 %v7876_v15  ;;  %v7989_v15 = vld [vmem:[#allocation8 + $0xb6c] ss:$48 sps:$4 sm:$0xff]  }
 0x41b   : > { %4917 = vmatprep.subr.bf16.mxu1 %v7884_v16  ;;  %v7948_v16 = vld [vmem:[#allocation8 + $0xb48] ss:$48 sps:$4 sm:$0xff]  }
 0x41c   : > { %5260 = vmatpush1.bf16.msra.mxu0 %v7915_v17  ;;  %v7956_v17 = vld [vmem:[#allocation8 + $0xbac] ss:$48 sps:$4 sm:$0xff]  }
 0x41d   : > { %5261 = vmatprep.subr.bf16.mxu0 %v7923_v19  ;;  %v7987_v19 = vld [vmem:[#allocation8 + $0xb68] ss:$48 sps:$4 sm:$0xff]  }
 0x41e   : > { %4918 = vmatpush1.bf16.msra.mxu1 %v7882_v21  ;;  %v7995_v21 = vld [vmem:[#allocation8 + $0xbcc] ss:$48 sps:$4 sm:$0xff]  }
 0x41f   : > { %4919 = vmatprep.subr.bf16.mxu1 %v7890_v22  ;;  %v7954_v22 = vld [vmem:[#allocation8 + $0xba8] ss:$48 sps:$4 sm:$0xff]  }
 0x420   : > { %5262 = vmatpush1.bf16.msra.mxu0 %v7921_v23  ;;  %v7962_v23 = vld [vmem:[#allocation8 + $0x1c] ss:$48 sps:$4 sm:$0xff]  }
 0x421   : > { %5263 = vmatprep.subr.bf16.mxu0 %v7929_v24  ;;  %v7993_v24 = vld [vmem:[#allocation8 + $0xbc8] ss:$48 sps:$4 sm:$0xff]  }
 0x422   : > { %4920 = vmatpush1.bf16.msra.mxu1 %v7888_v25  ;;  %v7960_v25 = vld [vmem:[#allocation8 + $0x18] ss:$48 sps:$4 sm:$0xff]  }
 0x423   : > { %4921 = vmatprep.subr.bf16.mxu1 %v7896_v26  ;;  %v7968_v26 = vld [vmem:[#allocation8 + $0x7c] ss:$48 sps:$4 sm:$0xff]  }
 0x424   : > { %v8989_v32 = vpop.f32.mrb[12].mxu1  ;;  %5264 = vmatpush1.bf16.msra.mxu0 %v7927_v27  ;;  %v7966_v27 = vld [vmem:[#allocation8 + $0x78] ss:$48 sps:$4 sm:$0xff]  }
 0x425   : > { %v8991_v34 = vpop.f32.mrb[13].mxu1  ;;  %5265 = vmatprep.subr.bf16.mxu0 %v7935_v28  ;;  %v7974_v28 = vld [vmem:[#allocation8 + $0xdc] ss:$48 sps:$4 sm:$0xff]  }
 0x426   : > { %v8993_v37 = vpop.f32.mrb[4].mxu0  ;;  %v8995_v38 = vpop.f32.mrb[14].mxu1  ;;  %4922 = vmatpush1.bf16.msra.mxu1 %v7894_v29  ;;  %v7972_v29 = vld [vmem:[#allocation8 + $0xd8] ss:$48 sps:$4 sm:$0xff]  }
 0x427   : > { %v8997_v41 = vpop.f32.mrb[5].mxu0  ;;  %v8999_v42 = vpop.f32.mrb[15].mxu1  ;;  %4923 = vmatprep.subr.bf16.mxu1 %v7902_v31  ;;  %v7980_v31 = vld [vmem:[#allocation8 + $0x13c] ss:$48 sps:$4 sm:$0xff]  }
 0x428   : > { %v9001_v44 = vpop.f32.mrb[6].mxu0  ;;  %5266 = vmatpush1.bf16.msra.mxu0 %v7933_v33  ;;  %v7978_v33 = vld [vmem:[#allocation8 + $0x138] ss:$48 sps:$4 sm:$0xff]  }
 0x429   : > { %v9003_v47 = vpop.f32.mrb[7].mxu0  ;;  %5267 = vmatprep.subr.bf16.mxu0 %v7941_v35  ;;  %v7986_v35 = vld [vmem:[#allocation8 + $0x19c] ss:$48 sps:$4 sm:$0xff]  }
 0x42a   : > { %4924 = vmatpush1.bf16.msra.mxu1 %v7900_v40  ;;  %v7984_v40 = vld [vmem:[#allocation8 + $0x198] ss:$48 sps:$4 sm:$0xff]  }
 0x42b   : > { %4925 = vmatprep.subr.bf16.mxu1 %v7908_v43  ;;  %v7992_v43 = vld [vmem:[#allocation8 + $0x1fc] ss:$48 sps:$4 sm:$0xff]  }
 0x42c   : > { %5268 = vmatpush1.bf16.msra.mxu0 %v7939_v46  ;;  %v7990_v46 = vld [vmem:[#allocation8 + $0x1f8] ss:$48 sps:$4 sm:$0xff]  }
 0x42d   : > { %5269 = vmatprep.subr.bf16.mxu0 %v7947_v48  ;;  %v7996_v48 = vld [vmem:[#allocation8 + $0x258] ss:$48 sps:$4 sm:$0xff]  }
 0x42e   : > { %4926 = vmatpush1.bf16.msra.mxu1 %v7906_v20  ;;  %v8001_v20 = vld [vmem:[#allocation8 + $0x2bc] ss:$48 sps:$4 sm:$0xff]  }
 0x42f   : > { %4927 = vmatprep.subr.bf16.mxu1 %v7914_v49  ;;  %v7999_v49 = vld [vmem:[#allocation8 + $0x2b8] ss:$48 sps:$4 sm:$0xff]  }
 0x430   : > { %5270 = vmatpush1.bf16.msra.mxu0 %v7945_v50  ;;  %v8004_v50 = vld [vmem:[#allocation8 + $0x31c] ss:$48 sps:$4 sm:$0xff]  }
 0x431   : > { %5271 = vmatprep.subr.bf16.mxu0 %v7953_v51  ;;  %v8002_v51 = vld [vmem:[#allocation8 + $0x318] ss:$48 sps:$4 sm:$0xff]  }
 0x432   : > { %4928 = vmatpush1.bf16.msra.mxu1 %v7912_v52  ;;  %v8007_v52 = vld [vmem:[#allocation8 + $0x37c] ss:$48 sps:$4 sm:$0xff]  }
 0x433   : > { %4929 = vmatprep.subr.bf16.mxu1 %v7920_v18  ;;  %v8005_v18 = vld [vmem:[#allocation8 + $0x378] ss:$48 sps:$4 sm:$0xff]  }
 0x434   : > { %5272 = vmatpush1.bf16.msra.mxu0 %v7951_v53  ;;  %v8010_v53 = vld [vmem:[#allocation8 + $0x3dc] ss:$48 sps:$4 sm:$0xff]  }
 0x435   : > { %5273 = vmatprep.subr.bf16.mxu0 %v7959_v54  ;;  %v8008_v54 = vld [vmem:[#allocation8 + $0x3d8] ss:$48 sps:$4 sm:$0xff]  }
 0x436   : > { %4930 = vmatpush1.bf16.msra.mxu1 %v7918_v55  ;;  %v8013_v55 = vld [vmem:[#allocation8 + $0x43c] ss:$48 sps:$4 sm:$0xff]  }
 0x437   : > { %4931 = vmatprep.subr.bf16.mxu1 %v7926_v56  ;;  %v8011_v56 = vld [vmem:[#allocation8 + $0x438] ss:$48 sps:$4 sm:$0xff]  }
 0x438   : > { %5274 = vmatpush1.bf16.msra.mxu0 %v7957_v57  ;;  %v8016_v57 = vld [vmem:[#allocation8 + $0x49c] ss:$48 sps:$4 sm:$0xff]  }
 0x439   : > { %5275 = vmatprep.subr.bf16.mxu0 %v7965_v58  ;;  %v8014_v58 = vld [vmem:[#allocation8 + $0x498] ss:$48 sps:$4 sm:$0xff]  }
 0x43a   : > { %4932 = vmatpush1.bf16.msra.mxu1 %v7924_v59  ;;  %v8019_v59 = vld [vmem:[#allocation8 + $0x4fc] ss:$48 sps:$4 sm:$0xff]  }
 0x43b   : > { %4933 = vmatprep.subr.bf16.mxu1 %v7932_v60  ;;  %v8017_v60 = vld [vmem:[#allocation8 + $0x4f8] ss:$48 sps:$4 sm:$0xff]  }
 0x43c   : > { %5276 = vmatpush1.bf16.msra.mxu0 %v7963_v61  ;;  %v8022_v61 = vld [vmem:[#allocation8 + $0x55c] ss:$48 sps:$4 sm:$0xff]  }
 0x43d   : > { %5277 = vmatprep.subr.bf16.mxu0 %v7971_v63  ;;  %v8020_v63 = vld [vmem:[#allocation8 + $0x558] ss:$48 sps:$4 sm:$0xff]  }
 0x43e   : > { %4934 = vmatpush1.bf16.msra.mxu1 %v7930_v0  ;;  %v8025_v0 = vld [vmem:[#allocation8 + $0x5bc] ss:$48 sps:$4 sm:$0xff]  }
 0x43f   : > { %4935 = vmatprep.subr.bf16.mxu1 %v7938_v1  ;;  %v8023_v1 = vld [vmem:[#allocation8 + $0x5b8] ss:$48 sps:$4 sm:$0xff]  }
 0x440   : > { %5278 = vmatpush1.bf16.msra.mxu0 %v7969_v2  ;;  %v8028_v2 = vld [vmem:[#allocation8 + $0x61c] ss:$48 sps:$4 sm:$0xff]  }
 0x441   : > { %5279 = vmatprep.subr.bf16.mxu0 %v7977_v3  ;;  %v8026_v3 = vld [vmem:[#allocation8 + $0x618] ss:$48 sps:$4 sm:$0xff]  }
 0x442   : > { %4936 = vmatpush1.bf16.msra.mxu1 %v7936_v4  ;;  %v8031_v4 = vld [vmem:[#allocation8 + $0x67c] ss:$48 sps:$4 sm:$0xff]  }
 0x443   : > { %4937 = vmatprep.subr.bf16.mxu1 %v7944_v5  ;;  %v8029_v5 = vld [vmem:[#allocation8 + $0x678] ss:$48 sps:$4 sm:$0xff]  }
 0x444   : > { %5280 = vmatpush1.bf16.msra.mxu0 %v7975_v6  ;;  %v8034_v6 = vld [vmem:[#allocation8 + $0x6dc] ss:$48 sps:$4 sm:$0xff]  }
 0x445   : > { %5281 = vmatprep.subr.bf16.mxu0 %v7983_v8  ;;  %v8032_v8 = vld [vmem:[#allocation8 + $0x6d8] ss:$48 sps:$4 sm:$0xff]  }
 0x446   : > { %4938 = vmatpush1.bf16.msra.mxu1 %v7942_v10  ;;  %v8037_v10 = vld [vmem:[#allocation8 + $0x73c] ss:$48 sps:$4 sm:$0xff]  }
 0x447   : > { %4939 = vmatprep.subr.bf16.mxu1 %v7950_v12  ;;  %v8035_v12 = vld [vmem:[#allocation8 + $0x738] ss:$48 sps:$4 sm:$0xff]  }
 0x448   : > { %5282 = vmatpush1.bf16.msra.mxu0 %v7981_v14  ;;  %v9011_v14 = vshrl.u32 %v489_v62, 7 }
 0x449   : > { %5283 = vmatprep.subr.bf16.mxu0 %v7989_v15  ;;  %v8040_v15 = vld [vmem:[#allocation8 + $0x79c] ss:$48 sps:$4 sm:$0xff]  }
 0x44a   : > { %4940 = vmatpush1.bf16.msra.mxu1 %v7948_v16  ;;  %v8038_v16 = vld [vmem:[#allocation8 + $0x798] ss:$48 sps:$4 sm:$0xff]  }
 0x44b   : > { %4941 = vmatprep.subr.bf16.mxu1 %v7956_v17  ;;  %v9017_v17 = vsub.s32 1, %v9011_v14 }
 0x44c   : > { %5284 = vmatpush1.bf16.msra.mxu0 %v7987_v19  ;;  %v9019_v19 = vld [vmem:[#allocation9] sm:$0xff] }
 0x44d   : > { %5285 = vmatprep.subr.bf16.mxu0 %v7995_v21  ;;  %v1214_v21 = vsub.s32 4, %v9011_v14 }
 0x44e   : > { %4942 = vmatpush1.bf16.msra.mxu1 %v7954_v22  ;;  %v1218_v22 = vsub.s32 5, %v9011_v14 }
 0x44f   : > { %5040 = vmatprep.subr.bf16.mxu1 %v7962_v23  ;;  %v1203_v23 = vrot.slane %v9019_v19, %v9017_v17 }
 0x450   : > { %5286 = vmatpush1.bf16.msra.mxu0 %v7993_v24  ;;  %v8041_v24 = vld [vmem:[#allocation8 + $0x7f8] ss:$48 sps:$4 sm:$0xff]  }
 0x451   : > { %4944 = vmatmul.mubr.bf16.vlgmr.msra.gmra.mrb[4].mxu1 %v8963_v45 }
 0x452   : > { %5041 = vmatpush1.bf16.msra.mxu1 %v7960_v25  ;;  %5072 = vmatprep.mubr.bf16.mxu1 %v8931_v30  ;;  %v7998_v30 = vld [vmem:[#allocation8 + $0x25c] ss:$48 sps:$4 sm:$0xff]  }
 0x453   : > { %5042 = vmatprep.subr.bf16.mxu1 %v7968_v26  ;;  %5288 = vmatmul.mubr.bf16.vlgmr.msra.gmra.mrb[16].mxu0 %v8963_v45  ;;  %v8046_v25 = vld [vmem:[#allocation8 + $0x85c] ss:$48 sps:$4 sm:$0xff]   ;;  %v1215_v26 = vrot.slane %v9019_v19, %v1214_v21 }
 0x456   : > { %5043 = vmatpush1.bf16.msra.mxu1 %v7966_v27 }
 0x457   : > { %5044 = vmatprep.subr.bf16.mxu1 %v7974_v28  ;;  %v1219_v28 = vrot.slane %v9019_v19, %v1218_v22 }
 0x45a   : > { %5045 = vmatpush1.bf16.msra.mxu1 %v7972_v29 }
 0x45b   : > { %5046 = vmatprep.subr.bf16.mxu1 %v7980_v31 }
 0x45e   : > { %5047 = vmatpush1.bf16.msra.mxu1 %v7978_v33 }
 0x45f   : > { %5048 = vmatprep.subr.bf16.mxu1 %v7986_v35 }
 0x462   : > { %5049 = vmatpush1.bf16.msra.mxu1 %v7984_v40  ;;  %v8044_v40 = vld [vmem:[#allocation8 + $0x858] ss:$48 sps:$4 sm:$0xff]  }
 0x463   : > { %5050 = vmatprep.subr.bf16.mxu1 %v7992_v43 }
 0x466   : > { %5051 = vmatpush1.bf16.msra.mxu1 %v7990_v46 }
 0x467   : > { %5052 = vmatprep.subr.bf16.mxu1 %v7998_v30 }
 0x46a   : > { %5053 = vmatpush1.bf16.msra.mxu1 %v7996_v48 }
 0x46b   : > { %5054 = vmatprep.subr.bf16.mxu1 %v8001_v20  ;;  %v8049_v20 = vld [vmem:[#allocation8 + $0x8bc] ss:$48 sps:$4 sm:$0xff]  }
 0x46e   : > { %5055 = vmatpush1.bf16.msra.mxu1 %v7999_v49 }
 0x46f   : > { %5056 = vmatprep.subr.bf16.mxu1 %v8004_v50  ;;  %v6941_v50 = vadd.f32 %v8993_v37, %v1215_v26  ;;  %v8052_v37 = vld [vmem:[#allocation8 + $0x91c] ss:$48 sps:$4 sm:$0xff]  }
 0x472   : > { %5057 = vmatpush1.bf16.msra.mxu1 %v8002_v51 }
 0x473   : > { %5058 = vmatprep.subr.bf16.mxu1 %v8007_v52 }
 0x476   : > { %5059 = vmatpush1.bf16.msra.mxu1 %v8005_v18 }
 0x477   : > { %5060 = vmatprep.subr.bf16.mxu1 %v8010_v53  ;;  %v6942_v53 = vadd.f32 %v8997_v41, %v1219_v28  ;;  %v8050_v41 = vld [vmem:[#allocation8 + $0x918] ss:$48 sps:$4 sm:$0xff]  }
 0x47a   : > { %5061 = vmatpush1.bf16.msra.mxu1 %v8008_v54 }
 0x47b   : > { %5062 = vmatprep.subr.bf16.mxu1 %v8013_v55 }
 0x47e   : > { %5063 = vmatpush1.bf16.msra.mxu1 %v8011_v56  ;;  %v6943_v56 = vadd.f32 %v9001_v44, %v1215_v26  ;;  %v8053_v44 = vld [vmem:[#allocation8 + $0x978] ss:$48 sps:$4 sm:$0xff]   ;;  %v8064_v26 = vld [vmem:[#allocation8 + $0xa9c] ss:$48 sps:$4 sm:$0xff]  }
 0x47f   : > { %5064 = vmatprep.subr.bf16.mxu1 %v8016_v57 }
 0x482   : > { %5065 = vmatpush1.bf16.msra.mxu1 %v8014_v58  ;;  %v8047_v58 = vld [vmem:[#allocation8 + $0x8b8] ss:$48 sps:$4 sm:$0xff]  }
 0x483   : > { %5066 = vmatprep.subr.bf16.mxu1 %v8019_v59  ;;  %v6944_v59 = vadd.f32 %v9003_v47, %v1219_v28  ;;  %v8058_v47 = vld [vmem:[#allocation8 + $0x9dc] ss:$48 sps:$4 sm:$0xff]  }
 0x486   : > { %5067 = vmatpush1.bf16.msra.mxu1 %v8017_v60  ;;  %v6849_v60 = vmul.f32 -1.442695, %v6941_v50  ;;  %v8067_v50 = vld [vmem:[#allocation8 + $0xafc] ss:$48 sps:$4 sm:$0xff]  }
 0x487   : > { %5068 = vmatprep.subr.bf16.mxu1 %v8022_v61  ;;  %v6850_v61 = vmul.f32 -1.442695, %v6942_v53 }
 0x48a   : > { %5069 = vmatpush1.bf16.msra.mxu1 %v8020_v63  ;;  %v6857_v63 = vmul.f32 -1.442695, %v6943_v56 }
 0x48b   : > { %5070 = vmatprep.subr.bf16.mxu1 %v8025_v0  ;;  %v6858_v0 = vmul.f32 -1.442695, %v6944_v59 }
 0x48e   : > { %5071 = vmatpush1.bf16.msra.mxu1 %v8023_v1  ;;  %v8055_v1 = vld [vmem:[#allocation8 + $0x97c] ss:$48 sps:$4 sm:$0xff]  }
 0x48f   : > { %5083 = vmatprep.subr.bf16.mxu1 %v8028_v2 }
 0x491   : > { %5073 = vmatmul.mubr.bf16.vlgmr.msra.gmra.mrb[8].mxu1 %v8949_v36  ;;  %v9014_v36 = vsub.s32 0, %v9011_v14 }
 0x492   : > { %5084 = vmatpush1.bf16.msra.mxu1 %v8026_v3  ;;  %5115 = vmatprep.mubr.bf16.mxu1 %v8951_v39  ;;  %v8043_v39 = vld [vmem:[#allocation8 + $0x7fc] ss:$48 sps:$4 sm:$0xff]  }
 0x493   : > { %5085 = vmatprep.subr.bf16.mxu1 %v8031_v4  ;;  %v1199_v62 = vrot.slane %v9019_v19, %v9014_v36 }
 0x496   : > { %5086 = vmatpush1.bf16.msra.mxu1 %v8029_v5 }
 0x497   : > { %5087 = vmatprep.subr.bf16.mxu1 %v8034_v6 }
 0x49a   : > { %5088 = vmatpush1.bf16.msra.mxu1 %v8032_v8 }
 0x49b   : > { %5089 = vmatprep.subr.bf16.mxu1 %v8037_v10 }
 0x49e   : > { %5090 = vmatpush1.bf16.msra.mxu1 %v8035_v12  ;;  %v8056_v12 = vld [vmem:[#allocation8 + $0x9d8] ss:$48 sps:$4 sm:$0xff]  }
 0x49f   : > { %5091 = vmatprep.subr.bf16.mxu1 %v8040_v15  ;;  %v9041_v15 = vld [vmem:[#allocation11] sm:$0xf] }
 0x4a0   : > { %v5415_v21 = vrot.slane %v9041_v15, %v9014_v36 }
 0x4a2   : > { %5092 = vmatpush1.bf16.msra.mxu1 %v8038_v16 }
 0x4a3   : > { %5093 = vmatprep.subr.bf16.mxu1 %v8043_v39  ;;  %v8061_v39 = vld [vmem:[#allocation8 + $0xa3c] ss:$48 sps:$4 sm:$0xff]  }
 0x4a4   : > { %v4859_v27 = vpop.f32.mrb[0].mxu1 }
 0x4a5   : > { %v6933_v29 = vadd.f32 %v4859_v27, %v1199_v62  ;;  %v4861_v31 = vpop.f32.mrb[1].mxu1 }
 0x4a6   : > { %v6934_v33 = vadd.f32 %v4861_v31, %v1203_v23  ;;  %v4863_v35 = vpop.f32.mrb[2].mxu1  ;;  %5094 = vmatpush1.bf16.msra.mxu1 %v8041_v24  ;;  %v9029_v43 = vpop.f32.mrb[12].mxu0  ;;  %v5419_v24 = vrot.slane %v9041_v15, %v9017_v17 }
 0x4a7   : > { %v6845_v46 = vmul.f32 -1.442695, %v6933_v29  ;;  %v6935_v30 = vadd.f32 %v4863_v35, %v1199_v62  ;;  %v4865_v48 = vpop.f32.mrb[3].mxu1  ;;  %5095 = vmatprep.subr.bf16.mxu1 %v8046_v25  ;;  %v9031_v49 = vpop.f32.mrb[13].mxu0  ;;  %v9045_v62 = vld [vmem:[#allocation9 + $0x8] sm:$0xf] }
 0x4a8   : > { %v6846_v51 = vmul.f32 -1.442695, %v6934_v33  ;;  %v6936_v52 = vadd.f32 %v4865_v48, %v1203_v23  ;;  %v9034_v18 = vpop.f32.mrb[14].mxu0  ;;  %v8059_v23 = vld [vmem:[#allocation8 + $0xa38] ss:$48 sps:$4 sm:$0xff]   ;;  %v1231_v29 = vrot.slane %v9045_v62, %v9014_v36  ;;  %v5432_v33 = vadd.f32 %v5415_v21, %v9029_v43 }
 0x4a9   : > { %8074 = vpow2.f32 %v6845_v46  ;;  %v6853_v54 = vmul.f32 -1.442695, %v6935_v30  ;;  %v9037_v55 = vpop.f32.mrb[15].mxu0  ;;  %v1235_v35 = vrot.slane %v9045_v62, %v9017_v17  ;;  %v5433_v46 = vadd.f32 %v5419_v24, %v9031_v49  ;;  %v8062_v30 = vld [vmem:[#allocation8 + $0xa98] ss:$48 sps:$4 sm:$0xff]  }
 0x4aa   : > { %8076 = vpow2.f32 %v6846_v51  ;;  %v6854_v57 = vmul.f32 -1.442695, %v6936_v52  ;;  %5096 = vmatpush1.bf16.msra.mxu1 %v8044_v40  ;;  %v5437_v36 = vadd.f32 %v5419_v24, %v9037_v55  ;;  %v2423_v43 = vadd.f32 %v8973_v7, %v1231_v29  ;;  %v8070_v55 = vld [vmem:[#allocation8 + $0xb5c] ss:$48 sps:$4 sm:$0xff]  }
 0x4ab   : > { %8078 = vpow2.f32 %v6853_v54  ;;  %5097 = vmatprep.subr.bf16.mxu1 %v8049_v20  ;;  %v5436_v20 = vadd.f32 %v5415_v21, %v9034_v18  ;;  %v2425_v56 = vadd.f32 %v8975_v9, %v1235_v35  ;;  %v2427_v18 = vadd.f32 %v8977_v11, %v1231_v29  ;;  %v8071_v11 = vld [vmem:[#allocation8 + $0xbb8] ss:$48 sps:$4 sm:$0xff]  }
 0x4ac   : > { %8080 = vpow2.f32 %v6854_v57  ;;  %v8065_v57 = vld [vmem:[#allocation8 + $0xaf8] ss:$48 sps:$4 sm:$0xff]  }
 0x4ad   : > { %8082 = vpow2.f32 %v6849_v60  ;;  %v2429_v60 = vadd.f32 %v8979_v13, %v1235_v35  ;;  %v8157_v29 = vld [vmem:[%s9318_s3 + $0x28] sm:$0xff] }
 0x4ae   : > { %5098 = vmatpush1.bf16.msra.mxu1 %v8047_v58  ;;  %8084 = vpow2.f32 %v6850_v61 }
 0x4af   : > { %5099 = vmatprep.subr.bf16.mxu1 %v8052_v37  ;;  %8086 = vpow2.f32 %v6857_v63 }
 0x4b0   : > { %8088 = vpow2.f32 %v6858_v0  ;;  %v8073_v0 = vld [vmem:[#allocation8 + $0xbbc] ss:$48 sps:$4 sm:$0xff]  }
 0x4b2   : > { %5100 = vmatpush1.bf16.msra.mxu1 %v8050_v41  ;;  %v8068_v41 = vld [vmem:[#allocation8 + $0xb58] ss:$48 sps:$4 sm:$0xff]  }
 0x4b3   : > { %v8075_v2 = vpop.eup %8074  ;;  %5101 = vmatprep.subr.bf16.mxu1 %v8055_v1 }
 0x4b4   : > { %v8077_v3 = vpop.eup %8076  ;;  %v5362_v4 = vadd.f32 1.0, %v8075_v2 }
 0x4b5   : > { %v8079_v5 = vpop.eup %8078  ;;  %v5363_v6 = vadd.f32 1.0, %v8077_v3 }
 0x4b6   : > { %v8081_v8 = vpop.eup %8080  ;;  %8090 = vrcp.f32 %v5362_v4  ;;  %v5370_v10 = vadd.f32 1.0, %v8079_v5  ;;  %5102 = vmatpush1.bf16.msra.mxu1 %v8053_v44 }
 0x4b7   : > { %8092 = vrcp.f32 %v5363_v6  ;;  %v5371_v16 = vadd.f32 1.0, %v8081_v8  ;;  %5103 = vmatprep.subr.bf16.mxu1 %v8058_v47  ;;  %v8083_v22 = vpop.eup %8082  ;;  %v8154_v6 = vld [vmem:[%s9318_s3] sm:$0xff] }
 0x4b8   : > { %8094 = vrcp.f32 %v5370_v10  ;;  %v8085_v25 = vpop.eup %8084  ;;  %v5366_v31 = vadd.f32 1.0, %v8083_v22 }
 0x4b9   : > { %8096 = vrcp.f32 %v5371_v16  ;;  %v8087_v27 = vpop.eup %8086  ;;  %v5367_v40 = vadd.f32 1.0, %v8085_v25  ;;  %v8156_v25 = vld [vmem:[%s9318_s3 + $0x20] sm:$0xff] }
 0x4ba   : > { %5104 = vmatpush1.bf16.msra.mxu1 %v8056_v12  ;;  %v8089_v28 = vpop.eup %8088  ;;  %v5374_v48 = vadd.f32 1.0, %v8087_v27  ;;  %8098 = vrcp.f32 %v5366_v31 }
 0x4bb   : > { %5105 = vmatprep.subr.bf16.mxu1 %v8061_v39  ;;  %v5375_v52 = vadd.f32 1.0, %v8089_v28  ;;  %8100 = vrcp.f32 %v5367_v40  ;;  %v8155_v39 = vld [vmem:[%s9318_s3 + $0x8] sm:$0xff] }
 0x4bc   : > { %8102 = vrcp.f32 %v5374_v48 }
 0x4bd   : > { %8104 = vrcp.f32 %v5375_v52 }
 0x4be   : > { %5106 = vmatpush1.bf16.msra.mxu1 %v8059_v23 }
 0x4bf   : > { %5107 = vmatprep.subr.bf16.mxu1 %v8064_v26 }
 0x4c0   : > { %v8091_v51 = vpop.eup %8090 }
 0x4c1   : > { %v8093_v53 = vpop.eup %8092  ;;  %v5440_v54 = vmul.f32 %v8091_v51, %v5432_v33 }
 0x4c2   : > { %v8095_v17 = vpop.eup %8094  ;;  %v5441_v49 = vmul.f32 %v8093_v53, %v5433_v46  ;;  %5108 = vmatpush1.bf16.msra.mxu1 %v8062_v30  ;;  %v1206_v46 = vsub.s32 2, %v9011_v14  ;;  %v1210_v30 = vsub.s32 3, %v9011_v14 }
 0x4c3   : > { %v8097_v58 = vpop.eup %8096  ;;  %v5448_v59 = vadd.f32 %v5440_v54, %v2423_v43  ;;  %v5444_v37 = vmul.f32 %v8095_v17, %v5436_v20  ;;  %5109 = vmatprep.subr.bf16.mxu1 %v8067_v50 }
 0x4c4   : > { %v5449_v7 = vadd.f32 %v5441_v49, %v2425_v56  ;;  %v5445_v61 = vmul.f32 %v8097_v58, %v5437_v36  ;;  %v8099_v1 = vpop.eup %8098  ;;  %v1207_v48 = vrot.slane %v9019_v19, %v1206_v46  ;;  %v1211_v20 = vrot.slane %v9019_v19, %v1210_v30 }
 0x4c5   : > { %8106 = vtanh.f32 %v5448_v59  ;;  %v5452_v63 = vadd.f32 %v5444_v37, %v2427_v18  ;;  %v8101_v44 = vpop.eup %8100  ;;  %v5464_v47 = vsub.f32 1.0, %v8099_v1  ;;  %v5480_v8 = vmul.f32 %v8154_v6, %v8099_v1 }
 0x4c6   : > { %8108 = vtanh.f32 %v5449_v7  ;;  %v5453_v9 = vadd.f32 %v5445_v61, %v2429_v60  ;;  %5110 = vmatpush1.bf16.msra.mxu1 %v8065_v57  ;;  %v8103_v2 = vpop.eup %8102  ;;  %v5465_v4 = vsub.f32 1.0, %v8101_v44  ;;  %v5481_v21 = vmul.f32 %v8155_v39, %v8101_v44 }
 0x4c7   : > { %8110 = vtanh.f32 %v5452_v63  ;;  %5111 = vmatprep.subr.bf16.mxu1 %v8070_v55  ;;  %v8105_v13 = vpop.eup %8104  ;;  %v5468_v10 = vsub.f32 1.0, %v8103_v2  ;;  %v5484_v26 = vmul.f32 %v8156_v25, %v8103_v2  ;;  %v5423_v1 = vrot.slane %v9041_v15, %v1206_v46 }
 0x4c8   : > { %8112 = vtanh.f32 %v5453_v9  ;;  %v5469_v22 = vsub.f32 1.0, %v8105_v13  ;;  %v5485_v31 = vmul.f32 %v8157_v29, %v8105_v13  ;;  %v5427_v44 = vrot.slane %v9041_v15, %v1210_v30 }
 0x4c9   : > { %v1239_v2 = vrot.slane %v9045_v62, %v1206_v46  ;;  %v1222_v29 = vsub.s32 6, %v9011_v14 }
 0x4ca   : > { %5112 = vmatpush1.bf16.msra.mxu1 %v8068_v41 }
 0x4cb   : > { %5113 = vmatprep.subr.bf16.mxu1 %v8073_v0  ;;  %v2470_v15 = vadd.f32 %v8995_v38, %v1239_v2 }
 0x4ce   : > { %5114 = vmatpush1.bf16.msra.mxu1 %v8071_v11 }
 0x4cf   : > { %v8107_v3 = vpop.eup %8106 }
 0x4d0   : > { %v8109_v5 = vpop.eup %8108  ;;  %v5472_v12 = vmul.f32 %v8107_v3, %v5464_v47  ;;  %v1243_v47 = vrot.slane %v9045_v62, %v1210_v30 }
 0x4d1   : > { %v8111_v16 = vpop.eup %8110  ;;  %v5473_v23 = vmul.f32 %v8109_v5, %v5465_v4  ;;  %5116 = vmatmul.mubr.bf16.vlgmr.msra.gmra.mrb[8].mxu1 %v8963_v45 }
 0x4d2   : > { %v8113_v24 = vpop.eup %8112  ;;  %v5488_v27 = vadd.f32 %v5480_v8, %v5472_v12  ;;  %v5476_v28 = vmul.f32 %v8111_v16, %v5468_v10  ;;  %v2466_v10 = vadd.f32 %v8989_v32, %v1239_v2  ;;  %v2468_v39 = vadd.f32 %v8991_v34, %v1243_v47 }
 0x4d3   : > { %v5489_v33 = vadd.f32 %v5481_v21, %v5473_v23  ;;  %v5477_v35 = vmul.f32 %v8113_v24, %v5469_v22  ;;  %v2472_v25 = vadd.f32 %v8999_v42, %v1243_v47  ;;  %v1226_v32 = vsub.s32 7, %v9011_v14 }
 0x4d4   : > { %5496 = vst [vmem:[#allocation2] sm:$0xff] %v5488_v27  ;;  %5504 = vst [vmem:[%s9319_s29] sm:$0xff] %v5488_v27  ;;  %v5492_v45 = vadd.f32 %v5484_v26, %v5476_v28 }
 0x4d5   : > { %5497 = vst [vmem:[#allocation2 + $0x8] sm:$0xff] %v5489_v33  ;;  %5505 = vst [vmem:[%s9319_s29 + $0x8] sm:$0xff] %v5489_v33  ;;  %v5493_v40 = vadd.f32 %v5485_v31, %v5477_v35  ;;  %v1223_v31 = vrot.slane %v9019_v19, %v1222_v29  ;;  %v1227_v34 = vrot.slane %v9019_v19, %v1226_v32 }
 0x4d6   : > { %5500 = vst [vmem:[#allocation2 + $0x20] sm:$0xff] %v5492_v45  ;;  %5508 = vst [vmem:[%s9319_s29 + $0x20] sm:$0xff] %v5492_v45 }
 0x4d7   : > { %5501 = vst [vmem:[#allocation2 + $0x28] sm:$0xff] %v5493_v40  ;;  %5509 = vst [vmem:[%s9319_s29 + $0x28] sm:$0xff] %v5493_v40 }
 0x4de   : > { %v8160_v47 = vld [vmem:[%s9318_s3 + $0x30] sm:$0xff] }
 0x524   : > { %v4945_v50 = vpop.f32.mrb[4].mxu1 }
 0x525   : > { %v6937_v51 = vadd.f32 %v4945_v50, %v1207_v48  ;;  %v4947_v52 = vpop.f32.mrb[5].mxu1 }
 0x526   : > { %v6938_v36 = vadd.f32 %v4947_v52, %v1211_v20  ;;  %v4949_v53 = vpop.f32.mrb[6].mxu1  ;;  %v5289_v43 = vpop.f32.mrb[16].mxu0 }
 0x527   : > { %v6847_v54 = vmul.f32 -1.442695, %v6937_v51  ;;  %v6939_v17 = vadd.f32 %v4949_v53, %v1207_v48  ;;  %v4951_v56 = vpop.f32.mrb[7].mxu1  ;;  %v5291_v49 = vpop.f32.mrb[17].mxu0  ;;  %v5434_v13 = vadd.f32 %v5423_v1, %v5289_v43 }
 0x528   : > { %v6848_v57 = vmul.f32 -1.442695, %v6938_v36  ;;  %v6940_v58 = vadd.f32 %v4951_v56, %v1211_v20  ;;  %v5293_v18 = vpop.f32.mrb[18].mxu0  ;;  %v5435_v3 = vadd.f32 %v5427_v44, %v5291_v49 }
 0x529   : > { %8114 = vpow2.f32 %v6847_v54  ;;  %v6855_v59 = vmul.f32 -1.442695, %v6939_v17  ;;  %v5295_v37 = vpop.f32.mrb[19].mxu0  ;;  %v5438_v4 = vadd.f32 %v5423_v1, %v5293_v18 }
 0x52a   : > { %8116 = vpow2.f32 %v6848_v57  ;;  %v6856_v55 = vmul.f32 -1.442695, %v6940_v58  ;;  %v5439_v6 = vadd.f32 %v5427_v44, %v5295_v37 }
 0x52b   : > { %8118 = vpow2.f32 %v6855_v59 }
 0x52c   : > { %8120 = vpow2.f32 %v6856_v55 }
 0x533   : > { %v8115_v60 = vpop.eup %8114 }
 0x534   : > { %v8117_v7 = vpop.eup %8116  ;;  %v5364_v61 = vadd.f32 1.0, %v8115_v60 }
 0x535   : > { %v8119_v63 = vpop.eup %8118  ;;  %v5365_v9 = vadd.f32 1.0, %v8117_v7  ;;  %v8158_v7 = vld [vmem:[%s9318_s3 + $0x10] sm:$0xff] }
 0x536   : > { %v8121_v41 = vpop.eup %8120  ;;  %8122 = vrcp.f32 %v5364_v61  ;;  %v5372_v0 = vadd.f32 1.0, %v8119_v63 }
 0x537   : > { %8124 = vrcp.f32 %v5365_v9  ;;  %v5373_v11 = vadd.f32 1.0, %v8121_v41 }
 0x538   : > { %8126 = vrcp.f32 %v5372_v0  ;;  %v8159_v0 = vld [vmem:[%s9318_s3 + $0x18] sm:$0xff] }
 0x539   : > { %8128 = vrcp.f32 %v5373_v11 }
 0x540   : > { %v8123_v5 = vpop.eup %8122 }
 0x541   : > { %v8125_v8 = vpop.eup %8124  ;;  %v5442_v12 = vmul.f32 %v8123_v5, %v5434_v13 }
 0x542   : > { %v8127_v16 = vpop.eup %8126  ;;  %v5443_v21 = vmul.f32 %v8125_v8, %v5435_v3 }
 0x543   : > { %v8129_v22 = vpop.eup %8128  ;;  %v5450_v23 = vadd.f32 %v5442_v12, %v2466_v10  ;;  %v5446_v24 = vmul.f32 %v8127_v16, %v5438_v4 }
 0x544   : > { %v5451_v62 = vadd.f32 %v5443_v21, %v2468_v39  ;;  %v5447_v26 = vmul.f32 %v8129_v22, %v5439_v6  ;;  %v8161_v6 = vld [vmem:[%s9318_s3 + $0x38] sm:$0xff] }
 0x545   : > { %v5454_v27 = vadd.f32 %v5446_v24, %v2470_v15 }
 0x546   : > { %v5455_v28 = vadd.f32 %v5447_v26, %v2472_v25 }
 0x5a4   : > { %v5117_v33 = vpop.f32.mrb[8].mxu1 }
 0x5a5   : > { %v6945_v35 = vadd.f32 %v5117_v33, %v1223_v31  ;;  %v5119_v45 = vpop.f32.mrb[9].mxu1 }
 0x5a6   : > { %v6946_v38 = vadd.f32 %v5119_v45, %v1227_v34  ;;  %v5121_v40 = vpop.f32.mrb[10].mxu1 }
 0x5a7   : > { %v6851_v46 = vmul.f32 -1.442695, %v6945_v35  ;;  %v6947_v30 = vadd.f32 %v5121_v40, %v1223_v31  ;;  %v5123_v42 = vpop.f32.mrb[11].mxu1 }
 0x5a8   : > { %v6852_v48 = vmul.f32 -1.442695, %v6946_v38  ;;  %v6948_v20 = vadd.f32 %v5123_v42, %v1227_v34 }
 0x5a9   : > { %8130 = vpow2.f32 %v6851_v46  ;;  %v6859_v50 = vmul.f32 -1.442695, %v6947_v30 }
 0x5aa   : > { %8132 = vpow2.f32 %v6852_v48  ;;  %v6860_v51 = vmul.f32 -1.442695, %v6948_v20 }
 0x5ab   : > { %8134 = vpow2.f32 %v6859_v50 }
 0x5ac   : > { %8136 = vpow2.f32 %v6860_v51 }
 0x5ad   : > { %8138 = vtanh.f32 %v5450_v23 }
 0x5ae   : > { %8140 = vtanh.f32 %v5451_v62 }
 0x5b3   : > { %v8131_v14 = vpop.eup %8130 }
 0x5b4   : > { %v8133_v52 = vpop.eup %8132  ;;  %v5368_v19 = vadd.f32 1.0, %v8131_v14 }
 0x5b5   : > { %v8135_v36 = vpop.eup %8134  ;;  %v5369_v53 = vadd.f32 1.0, %v8133_v52 }
 0x5b6   : > { %v8137_v43 = vpop.eup %8136  ;;  %8142 = vrcp.f32 %v5368_v19  ;;  %v5376_v54 = vadd.f32 1.0, %v8135_v36 }
 0x5b7   : > { %8144 = vrcp.f32 %v5369_v53  ;;  %v5377_v17 = vadd.f32 1.0, %v8137_v43  ;;  %v8139_v56 = vpop.eup %8138 }
 0x5b8   : > { %8146 = vrcp.f32 %v5376_v54  ;;  %v8141_v49 = vpop.eup %8140 }
 0x5b9   : > { %8148 = vrcp.f32 %v5377_v17 }
 0x5ba   : > { %8150 = vtanh.f32 %v5454_v27 }
 0x5bb   : > { %8152 = vtanh.f32 %v5455_v28 }
 0x5c0   : > { %v8143_v57 = vpop.eup %8142 }
 0x5c1   : > { %v8145_v58 = vpop.eup %8144  ;;  %v5466_v18 = vsub.f32 1.0, %v8143_v57  ;;  %v5482_v61 = vmul.f32 %v8158_v7, %v8143_v57 }
 0x5c2   : > { %v8147_v59 = vpop.eup %8146  ;;  %v5467_v37 = vsub.f32 1.0, %v8145_v58  ;;  %v5483_v11 = vmul.f32 %v8159_v0, %v8145_v58 }
 0x5c3   : > { %v8149_v55 = vpop.eup %8148  ;;  %v5474_v60 = vmul.f32 %v8139_v56, %v5466_v18  ;;  %v5470_v63 = vsub.f32 1.0, %v8147_v59  ;;  %v5486_v3 = vmul.f32 %v8160_v47, %v8147_v59 }
 0x5c4   : > { %v8151_v9 = vpop.eup %8150  ;;  %v5475_v41 = vmul.f32 %v8141_v49, %v5467_v37  ;;  %v5471_v1 = vsub.f32 1.0, %v8149_v55  ;;  %v5487_v8 = vmul.f32 %v8161_v6, %v8149_v55 }
 0x5c5   : > { %v8153_v44 = vpop.eup %8152  ;;  %v5490_v2 = vadd.f32 %v5482_v61, %v5474_v60  ;;  %v5478_v13 = vmul.f32 %v8151_v9, %v5470_v63 }
 0x5c6   : > { %v5491_v4 = vadd.f32 %v5483_v11, %v5475_v41  ;;  %v5479_v5 = vmul.f32 %v8153_v44, %v5471_v1 }
 0x5c7   : > { %5498 = vst [vmem:[#allocation2 + $0x10] sm:$0xff] %v5490_v2  ;;  %5506 = vst [vmem:[%s9319_s29 + $0x10] sm:$0xff] %v5490_v2  ;;  %v5494_v10 = vadd.f32 %v5486_v3, %v5478_v13 }
 0x5c8   : > { %5499 = vst [vmem:[#allocation2 + $0x18] sm:$0xff] %v5491_v4  ;;  %5507 = vst [vmem:[%s9319_s29 + $0x18] sm:$0xff] %v5491_v4  ;;  %v5495_v12 = vadd.f32 %v5487_v8, %v5479_v5 }
 0x5c9   : > { %5502 = vst [vmem:[#allocation2 + $0x30] sm:$0xff] %v5494_v10  ;;  %5510 = vst [vmem:[%s9319_s29 + $0x30] sm:$0xff] %v5494_v10 }
 0x5ca   : > { %5503 = vst [vmem:[#allocation2 + $0x38] sm:$0xff] %v5495_v12  ;;  %5511 = vst [vmem:[%s9319_s29 + $0x38] sm:$0xff] %v5495_v12 }
 0x5cb PF: > { %v8162_v16 = vld [vmem:[%s8884_s9 + $0x4] ss:$8 sps:$4 sm:$0xff]   ;;  %v8166_v21 = vld [vmem:[%s8884_s9] ss:$8 sps:$4 sm:$0xff]   ;;  %v8168_v15 = vld [vmem:[%s8884_s9 + $0x14] ss:$8 sps:$4 sm:$0xff]  }
 0x5cc   : > { %v8164_v39 = vld [vmem:[%s8884_s9 + $0x104] ss:$8 sps:$4 sm:$0xff]   ;;  %5920 = vmatprep.subr.bf16.mxu1 %v8162_v16  ;;  %v8167_v22 = vld [vmem:[%s8884_s9 + $0x100] ss:$8 sps:$4 sm:$0xff]   ;;  %v8170_v23 = vld [vmem:[%s8884_s9 + $0x114] ss:$8 sps:$4 sm:$0xff]  }
 0x5cd   : > { %5963 = vmatprep.subr.bf16.mxu0 %v8164_v39  ;;  %5921 = vmatpush1.bf16.msra.mxu1 %v8166_v21  ;;  %v8172_v24 = vld [vmem:[%s8884_s9 + $0x10] ss:$8 sps:$4 sm:$0xff]   ;;  %v8174_v62 = vld [vmem:[%s8884_s9 + $0x24] ss:$8 sps:$4 sm:$0xff]   ;;  %v8178_v27 = vld [vmem:[%s8884_s9 + $0x20] ss:$8 sps:$4 sm:$0xff]  }
 0x5ce   : > { %5964 = vmatpush1.bf16.msra.mxu0 %v8167_v22  ;;  %5922 = vmatprep.subr.bf16.mxu1 %v8168_v15  ;;  %v8173_v25 = vld [vmem:[%s8884_s9 + $0x110] ss:$8 sps:$4 sm:$0xff]   ;;  %v8176_v26 = vld [vmem:[%s8884_s9 + $0x124] ss:$8 sps:$4 sm:$0xff]   ;;  %v8179_v28 = vld [vmem:[%s8884_s9 + $0x120] ss:$8 sps:$4 sm:$0xff]  }
 0x5cf   : > { %5965 = vmatprep.subr.bf16.mxu0 %v8170_v23  ;;  %v8180_v29 = vld [vmem:[%s8884_s9 + $0x34] ss:$8 sps:$4 sm:$0xff]   ;;  %v8184_v31 = vld [vmem:[%s8884_s9 + $0x30] ss:$8 sps:$4 sm:$0xff]   ;;  %v8186_v33 = vld [vmem:[%s8884_s9 + $0x44] ss:$8 sps:$4 sm:$0xff]  }
 0x5d0   : > { %v8182_v32 = vld [vmem:[%s8884_s9 + $0x134] ss:$8 sps:$4 sm:$0xff]   ;;  %v8185_v34 = vld [vmem:[%s8884_s9 + $0x130] ss:$8 sps:$4 sm:$0xff]   ;;  %v8188_v35 = vld [vmem:[%s8884_s9 + $0x144] ss:$8 sps:$4 sm:$0xff]  }
 0x5d1   : > { %5923 = vmatpush1.bf16.msra.mxu1 %v8172_v24  ;;  %v8190_v45 = vld [vmem:[%s8884_s9 + $0x40] ss:$8 sps:$4 sm:$0xff]   ;;  %v8192_v40 = vld [vmem:[%s8884_s9 + $0x54] ss:$8 sps:$4 sm:$0xff]   ;;  %v8196_v30 = vld [vmem:[%s8884_s9 + $0x50] ss:$8 sps:$4 sm:$0xff]  }
 0x5d2   : > { %5966 = vmatpush1.bf16.msra.mxu0 %v8173_v25  ;;  %5924 = vmatprep.subr.bf16.mxu1 %v8174_v62  ;;  %v8191_v38 = vld [vmem:[%s8884_s9 + $0x140] ss:$8 sps:$4 sm:$0xff]   ;;  %v8194_v46 = vld [vmem:[%s8884_s9 + $0x154] ss:$8 sps:$4 sm:$0xff]   ;;  %v8197_v42 = vld [vmem:[%s8884_s9 + $0x150] ss:$8 sps:$4 sm:$0xff]  }
 0x5d3   : > { %5967 = vmatprep.subr.bf16.mxu0 %v8176_v26  ;;  %v8198_v48 = vld [vmem:[%s8884_s9 + $0x64] ss:$8 sps:$4 sm:$0xff]   ;;  %v8202_v50 = vld [vmem:[%s8884_s9 + $0x60] ss:$8 sps:$4 sm:$0xff]   ;;  %v8204_v14 = vld [vmem:[%s8884_s9 + $0x74] ss:$8 sps:$4 sm:$0xff]  }
 0x5d4   : > { %v8200_v20 = vld [vmem:[%s8884_s9 + $0x164] ss:$8 sps:$4 sm:$0xff]   ;;  %v8203_v51 = vld [vmem:[%s8884_s9 + $0x160] ss:$8 sps:$4 sm:$0xff]   ;;  %v8206_v52 = vld [vmem:[%s8884_s9 + $0x174] ss:$8 sps:$4 sm:$0xff]  }
 0x5d5   : > { %5925 = vmatpush1.bf16.msra.mxu1 %v8178_v27  ;;  %v8208_v19 = vld [vmem:[%s8884_s9 + $0x70] ss:$8 sps:$4 sm:$0xff]   ;;  %v8210_v53 = vld [vmem:[%s8884_s9 + $0x84] ss:$8 sps:$4 sm:$0xff]   ;;  %v8214_v54 = vld [vmem:[%s8884_s9 + $0x80] ss:$8 sps:$4 sm:$0xff]  }
 0x5d6   : > { %5968 = vmatpush1.bf16.msra.mxu0 %v8179_v28  ;;  %5926 = vmatprep.subr.bf16.mxu1 %v8180_v29  ;;  %v8209_v36 = vld [vmem:[%s8884_s9 + $0x170] ss:$8 sps:$4 sm:$0xff]   ;;  %v8212_v43 = vld [vmem:[%s8884_s9 + $0x184] ss:$8 sps:$4 sm:$0xff]   ;;  %v8215_v17 = vld [vmem:[%s8884_s9 + $0x180] ss:$8 sps:$4 sm:$0xff]   ;;  %v5590_v29 = vlaneseq }
 0x5d7   : > { %5969 = vmatprep.subr.bf16.mxu0 %v8182_v32  ;;  %v8216_v56 = vld [vmem:[%s8884_s9 + $0x94] ss:$8 sps:$4 sm:$0xff]   ;;  %v8220_v57 = vld [vmem:[%s8884_s9 + $0x90] ss:$8 sps:$4 sm:$0xff]   ;;  %v8222_v18 = vld [vmem:[%s8884_s9 + $0xa4] ss:$8 sps:$4 sm:$0xff]  }
 0x5d8   : > { %v8218_v49 = vld [vmem:[%s8884_s9 + $0x194] ss:$8 sps:$4 sm:$0xff]   ;;  %v8221_v58 = vld [vmem:[%s8884_s9 + $0x190] ss:$8 sps:$4 sm:$0xff]   ;;  %v8224_v59 = vld [vmem:[%s8884_s9 + $0x1a4] ss:$8 sps:$4 sm:$0xff]  }
 0x5d9   : > { %5927 = vmatpush1.bf16.msra.mxu1 %v8184_v31  ;;  %v8226_v37 = vld [vmem:[%s8884_s9 + $0xa0] ss:$8 sps:$4 sm:$0xff]   ;;  %v8228_v60 = vld [vmem:[%s8884_s9 + $0xb4] ss:$8 sps:$4 sm:$0xff]   ;;  %v8232_v0 = vld [vmem:[%s8884_s9 + $0xb0] ss:$8 sps:$4 sm:$0xff]  }
 0x5da   : > { %5970 = vmatpush1.bf16.msra.mxu0 %v8185_v34  ;;  %5928 = vmatprep.subr.bf16.mxu1 %v8186_v33  ;;  %v8227_v55 = vld [vmem:[%s8884_s9 + $0x1a0] ss:$8 sps:$4 sm:$0xff]   ;;  %v8230_v7 = vld [vmem:[%s8884_s9 + $0x1b4] ss:$8 sps:$4 sm:$0xff]   ;;  %v8233_v11 = vld [vmem:[%s8884_s9 + $0x1b0] ss:$8 sps:$4 sm:$0xff]  }
 0x5db   : > { %5971 = vmatprep.subr.bf16.mxu0 %v8188_v35  ;;  %v5513_v61 = vld [vmem:[#allocation2 + $0x8] sm:$0xff]  ;;  %v5515_v9 = vld [vmem:[#allocation2 + $0x18] sm:$0xff]  ;;  %v5512_v24 = vld [vmem:[#allocation2] sm:$0xff]  ;;  %v5591_v32 = vshrl.u32 %v5590_v29, 7  ;;  %s6024_s20 = sshll.u32 %s8894_s28, 4  ;;  %s9321_s26 = sld [smem:[#allocation30_spill]]  ;;  %s9199_s20 = int_to_ptr.vmem [resolvable:$true] %s6024_s20 }
 0x5dc   : > { %v5517_v63 = vld [vmem:[#allocation2 + $0x28] sm:$0xff]  ;;  %v5519_v41 = vld [vmem:[#allocation2 + $0x38] sm:$0xff]  ;;  %v5516_v25 = vld [vmem:[#allocation2 + $0x20] sm:$0xff]  ;;  %s8458_s1 = scalar_lea.vmem %s9199_s20, 512  ;;  %s8552_s23 = smov [#allocation15]  }
 0x5dd   : > { %5929 = vmatpush1.bf16.msra.mxu1 %v8190_v45  ;;  %v5521_v1 = vpack.c.bf16 %v5517_v63, %v5513_v61  ;;  %v5523_v44 = vpack.c.bf16 %v5519_v41, %v5515_v9  ;;  %v8234_v2 = vld [vmem:[%s8884_s9 + $0xc4] ss:$8 sps:$4 sm:$0xff]   ;;  %v8238_v47 = vld [vmem:[%s8884_s9 + $0xc0] ss:$8 sps:$4 sm:$0xff]   ;;  %v8240_v4 = vld [vmem:[%s8884_s9 + $0xd4] ss:$8 sps:$4 sm:$0xff]   ;;  %v5520_v27 = vpack.c.bf16 %v5516_v25, %v5512_v24  ;;  %p8459_p0 = scmp.ne.s32.totalorder %s9199_s20, %s8458_s1 }
 0x5de   : > { %5972 = vmatpush1.bf16.msra.mxu0 %v8191_v38  ;;  %5930 = vmatprep.subr.bf16.mxu1 %v8192_v40  ;;  %v8236_v13 = vld [vmem:[%s8884_s9 + $0x1c4] ss:$8 sps:$4 sm:$0xff]   ;;  %v8239_v3 = vld [vmem:[%s8884_s9 + $0x1c0] ss:$8 sps:$4 sm:$0xff]   ;;  %v8242_v5 = vld [vmem:[%s8884_s9 + $0x1d4] ss:$8 sps:$4 sm:$0xff]  }
 0x5df   : > { %5973 = vmatprep.subr.bf16.mxu0 %v8194_v46  ;;  %5952 = vmatprep.mubr.bf16.mxu1 %v5521_v1  ;;  %v8244_v6 = vld [vmem:[%s8884_s9 + $0xd0] ss:$8 sps:$4 sm:$0xff]   ;;  %v8246_v10 = vld [vmem:[%s8884_s9 + $0xe4] ss:$8 sps:$4 sm:$0xff]   ;;  %v8250_v16 = vld [vmem:[%s8884_s9 + $0xe0] ss:$8 sps:$4 sm:$0xff]  }
 0x5e0   : > { %5995 = vmatprep.mubr.bf16.mxu0 %v5523_v44  ;;  %v8245_v8 = vld [vmem:[%s8884_s9 + $0x1d0] ss:$8 sps:$4 sm:$0xff]   ;;  %v8248_v12 = vld [vmem:[%s8884_s9 + $0x1e4] ss:$8 sps:$4 sm:$0xff]   ;;  %v8251_v39 = vld [vmem:[%s8884_s9 + $0x1e0] ss:$8 sps:$4 sm:$0xff]  }
 0x5e1   : > { %5931 = vmatpush1.bf16.msra.mxu1 %v8196_v30  ;;  %v8252_v21 = vld [vmem:[%s8884_s9 + $0xf4] ss:$8 sps:$4 sm:$0xff]   ;;  %v8256_v15 = vld [vmem:[%s8884_s9 + $0xf0] ss:$8 sps:$4 sm:$0xff]   ;;  %v5514_v62 = vld [vmem:[#allocation2 + $0x10] sm:$0xff]  ;;  %v5592_v31 = vsub.s32 0, %v5591_v32 }
 0x5e2   : > { %5974 = vmatpush1.bf16.msra.mxu0 %v8197_v42  ;;  %5932 = vmatprep.subr.bf16.mxu1 %v8198_v48  ;;  %v8254_v22 = vld [vmem:[%s8884_s9 + $0x1f4] ss:$8 sps:$4 sm:$0xff]   ;;  %v8257_v23 = vld [vmem:[%s8884_s9 + $0x1f0] ss:$8 sps:$4 sm:$0xff]   ;;  %v5518_v26 = vld [vmem:[#allocation2 + $0x30] sm:$0xff]  ;;  %v5596_v33 = vsub.s32 1, %v5591_v32 }
 0x5e3   : > { %5975 = vmatprep.subr.bf16.mxu0 %v8200_v20  ;;  %v5522_v28 = vpack.c.bf16 %v5518_v26, %v5514_v62  ;;  %v5588_v34 = vld [vmem:[%s8892_s5] sm:$0x3]  ;;  %s6932_s9 = sshll.u32 %s8632_s17, 8  ;;  %s9320_s5 = sld [smem:[#allocation24_spill]] }
 0x5e4   : > { %v5593_v35 = vrot.slane %v5588_v34, %v5592_v31  ;;  %v5597_v45 = vrot.slane %v5588_v34, %v5596_v33  ;;  %s9196_s27 = scalar_lea.hbm %s9321_s26, %s6932_s9  ;;  %s6011_s17 = scalar_lea.sflag [#allocation5], %s8881_s25 }
 0x5e5   : > { %5933 = vmatpush1.bf16.msra.mxu1 %v8202_v50  ;;  %s8462_s22 = sshll.u32 %s8552_s23, 4  ;;  %s8463_s22 = int_to_ptr.vmem [resolvable:$false] %s8462_s22 }
 0x5e6   : > { %5976 = vmatpush1.bf16.msra.mxu0 %v8203_v51  ;;  %5934 = vmatprep.subr.bf16.mxu1 %v8204_v14  ;;  %s8464_s18 = scalar_lea.vmem %s8463_s22, 1024  ;;  %p8465_p4 = scmp.lt.s32.totalorder %s9199_s20, %s8463_s22 }
 0x5e7   : > { %5977 = vmatprep.subr.bf16.mxu0 %v8206_v52  ;;  %p8466_p7 = scmp.lt.s32.totalorder %s8464_s18, %s8458_s1 }
 0x5e9   : > { %5935 = vmatpush1.bf16.msra.mxu1 %v8208_v19  ;;  %p9322_p9 = scmp.ne.s32.totalorder %s9320_s5, 0  ;;  %p8467_p8 = por %p8466_p7, %p8465_p4 }
 0x5ea   : > { %5978 = vmatpush1.bf16.msra.mxu0 %v8209_v36  ;;  %5936 = vmatprep.subr.bf16.mxu1 %v8210_v53 }
 0x5eb   : > { %5979 = vmatprep.subr.bf16.mxu0 %v8212_v43  ;;  %p8460_p12 = pnand %p8459_p0, %p9322_p9 }
 0x5ed   : > { %5937 = vmatpush1.bf16.msra.mxu1 %v8214_v54  ;;  %p8461_p2 = pneg %p8460_p12 }
 0x5ee   : > { %5980 = vmatpush1.bf16.msra.mxu0 %v8215_v17  ;;  %5938 = vmatprep.subr.bf16.mxu1 %v8216_v56 }
 0x5ef   : > { %5981 = vmatprep.subr.bf16.mxu0 %v8218_v49  ;;  %p8468_p13 = pnand %p8467_p8, %p8461_p2 }
 0x5f1   : > { %5939 = vmatpush1.bf16.msra.mxu1 %v8220_v57 }
 0x5f2   : > { %5982 = vmatpush1.bf16.msra.mxu0 %v8221_v58  ;;  %5940 = vmatprep.subr.bf16.mxu1 %v8222_v18 }
 0x5f3   : > { %5983 = vmatprep.subr.bf16.mxu0 %v8224_v59 }
 0x5f5   : > { %5941 = vmatpush1.bf16.msra.mxu1 %v8226_v37 }
 0x5f6   : > { %5984 = vmatpush1.bf16.msra.mxu0 %v8227_v55  ;;  %5942 = vmatprep.subr.bf16.mxu1 %v8228_v60 }
 0x5f7   : > { %5985 = vmatprep.subr.bf16.mxu0 %v8230_v7 }
 0x5f9   : > { %5943 = vmatpush1.bf16.msra.mxu1 %v8232_v0 }
 0x5fa   : > { %5986 = vmatpush1.bf16.msra.mxu0 %v8233_v11  ;;  %5944 = vmatprep.subr.bf16.mxu1 %v8234_v2 }
 0x5fb   : > { %5987 = vmatprep.subr.bf16.mxu0 %v8236_v13 }
 0x5fd   : > { %5945 = vmatpush1.bf16.msra.mxu1 %v8238_v47 }
 0x5fe   : > { %5988 = vmatpush1.bf16.msra.mxu0 %v8239_v3  ;;  %5946 = vmatprep.subr.bf16.mxu1 %v8240_v4 }
 0x5ff   : > { %5989 = vmatprep.subr.bf16.mxu0 %v8242_v5 }
 0x601   : > { %5947 = vmatpush1.bf16.msra.mxu1 %v8244_v6 }
 0x602   : > { %5990 = vmatpush1.bf16.msra.mxu0 %v8245_v8  ;;  %5948 = vmatprep.subr.bf16.mxu1 %v8246_v10 }
 0x603   : > { %5991 = vmatprep.subr.bf16.mxu0 %v8248_v12 }
 0x605   : > { %5949 = vmatpush1.bf16.msra.mxu1 %v8250_v16 }
 0x606   : > { %5992 = vmatpush1.bf16.msra.mxu0 %v8251_v39  ;;  %5950 = vmatprep.subr.bf16.mxu1 %v8252_v21 }
 0x607   : > { %5993 = vmatprep.subr.bf16.mxu0 %v8254_v22 }
 0x609   : > { %5951 = vmatpush1.bf16.msra.mxu1 %v8256_v15 }
 0x60a   : > { %5994 = vmatpush1.bf16.msra.mxu0 %v8257_v23 }
 0x60c   : > { %5953 = vmatmul.mubr.bf16.vlgmr.msra.gmra.mrb[0].mxu1 %v5520_v27 }
 0x60d   : > { %5996 = vmatmul.mubr.bf16.vlgmr.msra.gmra.mrb[0].mxu0 %v5522_v28 }
 0x6df   : > { %v5954_v38 = vpop.f32.mrb[0].mxu1 }
 0x6e0   : > { %v5997_v40 = vpop.f32.mrb[0].mxu0  ;;  %v5955_v46 = vadd.f32 %v5954_v38, %v5593_v35  ;;  %v5956_v30 = vpop.f32.mrb[1].mxu1 }
 0x6e1   : > { %v5999_v42 = vpop.f32.mrb[1].mxu0  ;;  %v5957_v48 = vadd.f32 %v5956_v30, %v5597_v45  ;;  %v5958_v20 = vpop.f32.mrb[2].mxu1 }
 0x6e2   : > { %v6001_v50 = vpop.f32.mrb[2].mxu0  ;;  %v5998_v51 = vadd.f32 %v5997_v40, %v5955_v46  ;;  %v5959_v14 = vadd.f32 %v5958_v20, %v5593_v35  ;;  %v5960_v52 = vpop.f32.mrb[3].mxu1 }
 0x6e3   : > { %v6003_v19 = vpop.f32.mrb[3].mxu0  ;;  %v6000_v36 = vadd.f32 %v5999_v42, %v5957_v48  ;;  %v5961_v53 = vadd.f32 %v5960_v52, %v5597_v45 }
 0x6e4   : > { %6006 = vst [vmem:[%s8894_s28] sm:$0xff] %v5998_v51  ;;  %v6002_v43 = vadd.f32 %v6001_v50, %v5959_v14 }
 0x6e5   : > { %6007 = vst [vmem:[%s8894_s28 + $0x8] sm:$0xff] %v6000_v36  ;;  %v6004_v54 = vadd.f32 %v6003_v19, %v5961_v53 }
 0x6e6   : > { %6008 = vst [vmem:[%s8894_s28 + $0x10] sm:$0xff] %v6002_v43 }
 0x6e7   : > { %6009 = vst [vmem:[%s8894_s28 + $0x18] sm:$0xff] %v6004_v54 }
 0x6e8   : > { %8471 = shalt.err (!%p8468_p13)
}
 0x6e9   : > { %s8472_s28 = scalar_lea.hbm %s9196_s27, 512  ;;  %s8476_s30 = scalar_lea.hbm %s9321_s26, 1024 }
 0x6ea   : > { %p8473_p1 = scmp.ne.s32.totalorder %s9196_s27, %s8472_s28  ;;  %p8477_p3 = scmp.lt.u32.totalorder %s9196_s27, %s9321_s26 }
 0x6eb   : > { %p8478_p5 = scmp.lt.u32.totalorder %s8476_s30, %s8472_s28  ;;  %p8480_p0 = scmp.lt.u32.totalorder %s8472_s28, %s9196_s27 }
 0x6ec   : > { %p8474_p6 = pnand %p8473_p1, %p9322_p9 }
 0x6ed   : > { %p8479_p10 = por %p8478_p5, %p8477_p3 }
 0x6ee   : > { %p8475_p11 = pneg %p8474_p6 }
 0x6ef   : > { %p8481_p12 = por %p8480_p0, %p8479_p10 }
 0x6f1   : > { %p8482_p2 = pnand %p8481_p12, %p8475_p11 }
 0x6f3   : > { %8485 = shalt.err (!%p8482_p2)
}
 0x6f4   : > { %s8553_s10 = smov 256   ;;  %s8554_s19 = smov 512  }
 0x6f5   : > { %s8555_s9 = smov 16  }
 0x6f6   : > { %7025 = dma.vmem_to_hbm [thread:$0]  (%p9322_p9), %s9199_s20, 512, %s9196_s27, %s6011_s17, %s8553_s10, %s8554_s19, %s8555_s9  }
 0x6f7 PF: > { %s9323_s24 = sld [smem:[#allocation21_spill]]  ;;  %s9324_s11 = sld [smem:[#allocation22_spill]] }
 0x6f8   : > { %p9326_p7 = scmp.ge.s32.totalorder %s8536_s16, 2 }
 0x6fd   : > { %s6045_s1 = sand.u32 1, %s9323_s24   ;;  %p9325_p4 = scmp.ne.s32.totalorder %s9324_s11, 0 }
 0x6fe   : > { %s6046_s23 = scalar_lea.sflag [#allocation5], %s6045_s1 }
 0x6ff   : > { %p7051_p8 = pnand %p9326_p7, %p9325_p4 }
 0x701   : > { %8519 = dma.done.wait (!%p7051_p8), %s6046_s23, 512  }
 0x702   : > { %8521 = vsyncadd (!%p7051_p8), %s6046_s23, 4294966784  ;;  %s9327_s16 = sld [smem:[#allocation23_spill]]  ;;  %s9328_s22 = sld [smem:[#allocation25_spill]] }
 0x703   : > { %s9329_s13 = smov %s8528_s14  ;;  %s9330_s14 = smov %s8532_s15 }
 0x708   : > { %p27_p13 = scmp.ge.s32.totalorder %s9327_s16, 4   ;;  %s9331_s15 = smov %s9328_s22 }
 0x70a   :  { %29 = sbr.rel (!%p27_p13) target bundleno = 15 (0xf), region = 145 }
 0x711   :  { %6051 = vsyncpa [#allocation4], 1 }
 0x712   :  { %6053 = vsyncpa [#allocation4 + $0x1], 1 }
 0x713   :  { %6054 = vsyncpa [#allocation7], 1 }
 0x714   :  { %6055 = vsyncpa [#allocation10], 1 }
 0x715   :  { %6056 = vsyncpa [#allocation13], 1 }
 0x716   :  { %6058 = vsyncpa [#allocation13 + $0x1], 1 }
 0x717   :  { %6059 = vsyncpa [#allocation5], 1 }
 0x718   :  { %6061 = vsyncpa [#allocation5 + $0x1], 1 }

</bundles_post_ra>
